<compile_context>
chip_gen: v6e
topology: v6e:2x2x1
jax: 0.10.0
libtpu: 0.0.40
codegen_flags: <defaults>
</compile_context>

<pallas_src>
import functools

import jax
import jax.numpy as jnp
from jax.experimental import pallas as pl
from jax.experimental.pallas import tpu as pltpu

BN_EPS = 1e-5


def _vmem_limit_bytes():
    # v5e/v6e: 128 MiB physical VMEM, v7x: 64 MiB. Use ~3/4 of capacity,
    # conservative fallback if the query is unavailable.
    try:
        cap = int(pltpu.get_tpu_info().vmem_capacity_bytes)
        return max(32 * 1024 * 1024, min(3 * cap // 4, 96 * 1024 * 1024))
    except Exception:
        return 48 * 1024 * 1024


# ----------------------------------------------------------------------------
# Kernel A: [optional fused BN+ReLU prologue] -> 3x3 same conv (stride 1) via a
# padded VMEM scratch + 9 accumulating MXU dots -> lane-dense bf16 conv output
# + per-image per-channel sum / sum-of-squares (for the following BN).
# ----------------------------------------------------------------------------
def _conv_bn_stats_kernel(*refs, H, W, Cin, Cout, apply_bn):
    if apply_bn:
        x_ref, scale_ref, bias_ref, w_ref, y_ref, s_ref, q_ref, xp_ref = refs
    else:
        x_ref, w_ref, y_ref, s_ref, q_ref, xp_ref = refs

    # (Cin, H*W) channel-major (NCHW-flat) tile, upcast to f32.
    x = x_ref[0].astype(jnp.float32)
    if apply_bn:
        # Fused BN(previous stage) + ReLU prologue; per-channel params come in
        # as (Cin, 1) columns and broadcast along the lane (spatial) axis.
        x = jnp.maximum(x * scale_ref[...] + bias_ref[...], 0.0)

    # Layout change C,(HW) -> H,W,C: one 2-D XLU transpose + a major-dim split
    # (the lane dim Cin is untouched by the reshape).
    x_hwc = x.T.reshape(H, W, Cin)

    # Zero padding lives in a persistent VMEM scratch.  The batch grid axis is
    # parallel, so the scratch is re-zeroed every step (no cross-step state).
    xp_ref[...] = jnp.zeros((H + 2, W + 2, Cin), jnp.float32)
    xp_ref[1:H + 1, 1:W + 1, :] = x_hwc

    # 3x3 conv = 9 accumulating MXU dots from statically shifted windows of the
    # padded scratch (no concat-built im2col).
    acc = jnp.zeros((H * W, Cout), jnp.float32)
    for dy in range(3):
        for dx in range(3):
            win = xp_ref[dy:dy + H, dx:dx + W, :]                 # (H, W, Cin)
            acc += jnp.dot(win.reshape(H * W, Cin).astype(jnp.bfloat16),
                           w_ref[dy, dx],
                           preferred_element_type=jnp.float32)

    # Lane-dense (Cout, H*W) bf16 store; BN partial stats stay f32.
    y_ref[...] = acc.T.astype(y_ref.dtype).reshape(1, Cout, H * W)
    s_ref[...] = jnp.sum(acc, axis=0, keepdims=True).reshape(1, 1, Cout)
    q_ref[...] = jnp.sum(acc * acc, axis=0, keepdims=True).reshape(1, 1, Cout)


def conv3x3_bn_stats(x_ncl, w_hwio, *, H, W, scale=None, bias=None):
    """3x3 conv (stride 1, pad 1) on an (N, Cin, H*W) NCHW-flat input.

    Returns (y, mean, var): y is (N, Cout, H*W) bfloat16; mean/var are the
    per-channel batch statistics of y in f32.  If scale/bias are given,
    relu(x*scale + bias) is applied per channel to the input tile first (folds
    the previous BN+ReLU into this kernel, so that tensor never hits HBM)."""
    N, Cin, L = x_ncl.shape
    assert L == H * W
    Cout = w_hwio.shape[-1]
    w = w_hwio.astype(jnp.bfloat16)                       # (3, 3, Cin, Cout)
    apply_bn = scale is not None

    args = [x_ncl]
    in_specs = [pl.BlockSpec((1, Cin, L), lambda n: (n, 0, 0))]
    if apply_bn:
        args += [scale.reshape(Cin, 1).astype(jnp.float32),
                 bias.reshape(Cin, 1).astype(jnp.float32)]
        in_specs += [pl.BlockSpec((Cin, 1), lambda n: (0, 0)),
                     pl.BlockSpec((Cin, 1), lambda n: (0, 0))]
    args.append(w)
    in_specs.append(pl.BlockSpec((3, 3, Cin, Cout), lambda n: (0, 0, 0, 0)))

    kernel = functools.partial(_conv_bn_stats_kernel, H=H, W=W,
                               Cin=Cin, Cout=Cout, apply_bn=apply_bn)
    y, s, q = pl.pallas_call(
        kernel,
        out_shape=(jax.ShapeDtypeStruct((N, Cout, L), jnp.bfloat16),
                   jax.ShapeDtypeStruct((N, 1, Cout), jnp.float32),
                   jax.ShapeDtypeStruct((N, 1, Cout), jnp.float32)),
        grid=(N,),
        in_specs=in_specs,
        out_specs=(pl.BlockSpec((1, Cout, L), lambda n: (n, 0, 0)),
                   pl.BlockSpec((1, 1, Cout), lambda n: (n, 0, 0)),
                   pl.BlockSpec((1, 1, Cout), lambda n: (n, 0, 0))),
        scratch_shapes=[pltpu.VMEM((H + 2, W + 2, Cin), jnp.float32)],
        compiler_params=pltpu.CompilerParams(
            dimension_semantics=("parallel",),     # per-image partial stats
            vmem_limit_bytes=_vmem_limit_bytes()),
    )(*args)

    cnt = float(N * H * W)
    mean = jnp.sum(s[:, 0, :], axis=0) / cnt
    # Clamp: one-pass E[x^2] - E[x]^2 can go slightly negative in f32.
    # TODO(synk): shifted / Welford accumulation would be safer at large scale.
    var = jnp.maximum(jnp.sum(q[:, 0, :], axis=0) / cnt - mean * mean, 0.0)
    return y, mean, var


# ----------------------------------------------------------------------------
# Kernel B: fused BN-apply + residual add + ReLU on the lane-dense NCHW-flat
# (N*C, H*W) view -> writes the final NCHW output directly (no transposes).
# ----------------------------------------------------------------------------
def _bn_add_relu_kernel(y_ref, r_ref, s_ref, b_ref, o_ref):
    y = y_ref[...].astype(jnp.float32)
    o_ref[...] = jnp.maximum(y * s_ref[...] + b_ref[...] + r_ref[...], 0.0)


def bn_add_relu(y_ncl, x_nchw, scale, bias):
    """out = relu(y*scale + bias + x) in the (N*C, H*W) view: the output last
    dim (H*W) is lane-dense and the result is already NCHW."""
    N, C, H, W = x_nchw.shape
    L = H * W
    R = N * C
    y2d = y_ncl.reshape(R, L)
    r2d = x_nchw.reshape(R, L)
    scol = jnp.tile(scale.astype(jnp.float32), N).reshape(R, 1)
    bcol = jnp.tile(bias.astype(jnp.float32), N).reshape(R, 1)

    # One big block when small; otherwise row-tile by a multiple of 8.
    if R > 256 and R % 8 == 0:
        TR = 8
        for d in range(16, 257, 8):
            if R % d == 0:
                TR = d
    else:
        TR = R

    row_spec = pl.BlockSpec((TR, L), lambda i: (i, 0))
    col_spec = pl.BlockSpec((TR, 1), lambda i: (i, 0))
    out2d = pl.pallas_call(
        _bn_add_relu_kernel,
        out_shape=jax.ShapeDtypeStruct((R, L), jnp.float32),
        grid=(R // TR,),
        in_specs=[row_spec, row_spec, col_spec, col_spec],
        out_specs=row_spec,
        compiler_params=pltpu.CompilerParams(
            dimension_semantics=("parallel",),
            vmem_limit_bytes=_vmem_limit_bytes()),
    )(y2d, r2d, scol, bcol)
    return out2d.reshape(N, C, H, W)


# ----------------------------------------------------------------------------
# BasicBlock forward (stride=1, downsample=None); NCHW in / NCHW out.
# ----------------------------------------------------------------------------
@jax.jit
def basic_block_forward(x_nchw, params):
    w1, g1, b1, w2, g2, b2 = params
    N, C, H, W = x_nchw.shape
    x_ncl = x_nchw.reshape(N, C, H * W)       # NCHW-flat view (free reshape)

    # Stage 1: conv1 + fused per-image batch statistics of y1.
    y1, m1, v1 = conv3x3_bn_stats(x_ncl, w1, H=H, W=W)
    scale1 = g1 * jax.lax.rsqrt(v1 + BN_EPS)
    bias1 = b1 - m1 * scale1

    # Stage 2: bn1+relu folded into the conv2 prologue + fused stats of y2
    # (h1 never materializes in HBM).
    y2, m2, v2 = conv3x3_bn_stats(y1, w2, H=H, W=W, scale=scale1, bias=bias1)
    scale2 = g2 * jax.lax.rsqrt(v2 + BN_EPS)
    bias2 = b2 - m2 * scale2

    # Stage 3: bn2 + identity + relu, lane-dense elementwise pass in NCHW.
    return bn_add_relu(y2, x_nchw, scale2, bias2)


# ----------------------------------------------------------------------------
# Pure-JAX reference (same training-mode BN semantics) for verification.
# ----------------------------------------------------------------------------
def reference_forward(x_nchw, params):
    w1, g1, b1, w2, g2, b2 = params
    x = jnp.transpose(x_nchw, (0, 2, 3, 1))

    def conv(x, w):
        return jax.lax.conv_general_dilated(
            x, w, window_strides=(1, 1), padding=((1, 1), (1, 1)),
            dimension_numbers=("NHWC", "HWIO", "NHWC"))

    def bn(y, g, b):
        m = y.mean((0, 1, 2))
        v = y.var((0, 1, 2))
        return (y - m) / jnp.sqrt(v + BN_EPS) * g + b

    h = jax.nn.relu(bn(conv(x, w1), g1, b1))
    o = jax.nn.relu(bn(conv(h, w2), g2, b2) + x)
    return jnp.transpose(o, (0, 3, 1, 2))


if __name__ == "__main__":
    key = jax.random.PRNGKey(0)
    k_x, k_w1, k_w2 = jax.random.split(key, 3)

    N, C, H, W = 2, 4, 16, 16            # in_channel = out_channel = 4, stride = 1
    x = jax.random.normal(k_x, (N, C, H, W), dtype=jnp.float32)

    # Conv weights in HWIO layout (PyTorch OIHW transposed); deterministic init.
    w1 = 0.1 * jax.random.normal(k_w1, (3, 3, C, C), dtype=jnp.float32)
    w2 = 0.1 * jax.random.normal(k_w2, (3, 3, C, C), dtype=jnp.float32)
    g1 = jnp.ones((C,), jnp.float32)     # bn1.weight
    b1 = jnp.zeros((C,), jnp.float32)    # bn1.bias
    g2 = jnp.ones((C,), jnp.float32)     # bn2.weight
    b2 = jnp.zeros((C,), jnp.float32)    # bn2.bias
    params = (w1, g1, b1, w2, g2, b2)

    out = jax.block_until_ready(basic_block_forward(x, params))
    ref = reference_forward(x, params)

    max_err = float(jnp.max(jnp.abs(out - ref)))
    assert out.shape == (N, C, H, W), out.shape
    # bf16 MXU operands + bf16 y1/y2 intermediates vs f32 reference.
    assert max_err < 1e-1, f"max abs error {max_err}"

    print("KERNEL_OK")
</pallas_src>

<mosaic_0001>
module attributes {stable_mosaic.version = 11 : i64} {
  func.func @_conv_bn_stats_kernel(%arg0: i32, %arg1: memref<1x4x256xf32, #tpu.memory_space<vmem>>, %arg2: memref<3x3x4x4xbf16, #tpu.memory_space<vmem>>, %arg3: memref<1x4x256xbf16, #tpu.memory_space<vmem>>, %arg4: memref<1x1x4xf32, #tpu.memory_space<vmem>>, %arg5: memref<1x1x4xf32, #tpu.memory_space<vmem>>, %arg6: memref<18x18x4xf32, #tpu.memory_space<vmem>>) attributes {dimension_semantics = [#tpu.dimension_semantics<parallel>], iteration_bounds = array<i64: 2>, scalar_prefetch = 0 : i64, scratch_operands = 1 : i64, tpu.core_type = #tpu.core_type<tc>, window_params = [{transform_indices = @transform_0, window_bounds = array<i64: 1, 4, 256>}, {pipeline_mode = #tpu.pipeline_mode<synchronous>, transform_indices = @transform_1, window_bounds = array<i64: 3, 3, 4, 4>}, {transform_indices = @transform_2, window_bounds = array<i64: 1, 4, 256>}, {transform_indices = @transform_3, window_bounds = array<i64: 1, 1, 4>}, {transform_indices = @transform_4, window_bounds = array<i64: 1, 1, 4>}]} {
    %c0 = arith.constant 0 : index
    %c0_0 = arith.constant 0 : index
    %c0_1 = arith.constant 0 : index
    %0 = vector.load %arg1[%c0, %c0_0, %c0_1] : memref<1x4x256xf32, #tpu.memory_space<vmem>>, vector<1x4x256xf32>
    %1 = vector.shape_cast %0 : vector<1x4x256xf32> to vector<4x256xf32>
    %2 = tpu.transpose %1, [1, 0] : vector<4x256xf32> -> vector<256x4xf32>
    %3 = vector.shape_cast %2 : vector<256x4xf32> to vector<16x16x4xf32>
    %cst = arith.constant 0.000000e+00 : f32
    %4 = vector.broadcast %cst : f32 to vector<18x18x4xf32>
    %c0_2 = arith.constant 0 : index
    %c0_3 = arith.constant 0 : index
    %c0_4 = arith.constant 0 : index
    %5 = vector.load %arg6[%c0_2, %c0_3, %c0_4] : memref<18x18x4xf32, #tpu.memory_space<vmem>>, vector<18x18x4xf32>
    tpu.vector_store %arg6[%c0_2, %c0_3, %c0_4], %4 {strides = array<i32>} : memref<18x18x4xf32, #tpu.memory_space<vmem>>, vector<18x18x4xf32>,
    %c1 = arith.constant 1 : index
    %c1_5 = arith.constant 1 : index
    %c0_6 = arith.constant 0 : index
    %6 = vector.load %arg6[%c1, %c1_5, %c0_6] : memref<18x18x4xf32, #tpu.memory_space<vmem>>, vector<16x16x4xf32>
    tpu.vector_store %arg6[%c1, %c1_5, %c0_6], %3 {strides = array<i32>} : memref<18x18x4xf32, #tpu.memory_space<vmem>>, vector<16x16x4xf32>,
    %cst_7 = arith.constant 0.000000e+00 : f32
    %7 = vector.broadcast %cst_7 : f32 to vector<256x4xf32>
    %c0_8 = arith.constant 0 : index
    %c0_9 = arith.constant 0 : index
    %c0_10 = arith.constant 0 : index
    %8 = vector.load %arg6[%c0_8, %c0_9, %c0_10] : memref<18x18x4xf32, #tpu.memory_space<vmem>>, vector<16x16x4xf32>
    %9 = vector.shape_cast %8 : vector<16x16x4xf32> to vector<256x4xf32>
    %10 = arith.truncf %9 : vector<256x4xf32> to vector<256x4xbf16>
    %c0_11 = arith.constant 0 : index
    %c0_12 = arith.constant 0 : index
    %c0_13 = arith.constant 0 : index
    %c0_14 = arith.constant 0 : index
    %11 = vector.load %arg2[%c0_11, %c0_12, %c0_13, %c0_14] : memref<3x3x4x4xbf16, #tpu.memory_space<vmem>>, vector<1x1x4x4xbf16>
    %12 = vector.shape_cast %11 : vector<1x1x4x4xbf16> to vector<4x4xbf16>
    %cst_15 = arith.constant dense<0.000000e+00> : vector<256x4xf32>
    %13 = tpu.matmul %10, %12, %cst_15 {dimension_numbers = #tpu.dot_dimension_numbers<[1], [0], [0], [1], [0, 0, 1, 1], [], []>} : vector<256x4xbf16>, vector<4x4xbf16>, vector<256x4xf32> -> vector<256x4xf32>
    %14 = arith.addf %7, %13 : vector<256x4xf32>
    %c0_16 = arith.constant 0 : index
    %c1_17 = arith.constant 1 : index
    %c0_18 = arith.constant 0 : index
    %15 = vector.load %arg6[%c0_16, %c1_17, %c0_18] : memref<18x18x4xf32, #tpu.memory_space<vmem>>, vector<16x16x4xf32>
    %16 = vector.shape_cast %15 : vector<16x16x4xf32> to vector<256x4xf32>
    %17 = arith.truncf %16 : vector<256x4xf32> to vector<256x4xbf16>
    %c0_19 = arith.constant 0 : index
    %c1_20 = arith.constant 1 : index
    %c0_21 = arith.constant 0 : index
    %c0_22 = arith.constant 0 : index
    %18 = vector.load %arg2[%c0_19, %c1_20, %c0_21, %c0_22] : memref<3x3x4x4xbf16, #tpu.memory_space<vmem>>, vector<1x1x4x4xbf16>
    %19 = vector.shape_cast %18 : vector<1x1x4x4xbf16> to vector<4x4xbf16>
    %cst_23 = arith.constant dense<0.000000e+00> : vector<256x4xf32>
    %20 = tpu.matmul %17, %19, %cst_23 {dimension_numbers = #tpu.dot_dimension_numbers<[1], [0], [0], [1], [0, 0, 1, 1], [], []>} : vector<256x4xbf16>, vector<4x4xbf16>, vector<256x4xf32> -> vector<256x4xf32>
    %21 = arith.addf %14, %20 : vector<256x4xf32>
    %c0_24 = arith.constant 0 : index
    %c2 = arith.constant 2 : index
    %c0_25 = arith.constant 0 : index
    %22 = vector.load %arg6[%c0_24, %c2, %c0_25] : memref<18x18x4xf32, #tpu.memory_space<vmem>>, vector<16x16x4xf32>
    %23 = vector.shape_cast %22 : vector<16x16x4xf32> to vector<256x4xf32>
    %24 = arith.truncf %23 : vector<256x4xf32> to vector<256x4xbf16>
    %c0_26 = arith.constant 0 : index
    %c2_27 = arith.constant 2 : index
    %c0_28 = arith.constant 0 : index
    %c0_29 = arith.constant 0 : index
    %25 = vector.load %arg2[%c0_26, %c2_27, %c0_28, %c0_29] : memref<3x3x4x4xbf16, #tpu.memory_space<vmem>>, vector<1x1x4x4xbf16>
    %26 = vector.shape_cast %25 : vector<1x1x4x4xbf16> to vector<4x4xbf16>
    %cst_30 = arith.constant dense<0.000000e+00> : vector<256x4xf32>
    %27 = tpu.matmul %24, %26, %cst_30 {dimension_numbers = #tpu.dot_dimension_numbers<[1], [0], [0], [1], [0, 0, 1, 1], [], []>} : vector<256x4xbf16>, vector<4x4xbf16>, vector<256x4xf32> -> vector<256x4xf32>
    %28 = arith.addf %21, %27 : vector<256x4xf32>
    %c1_31 = arith.constant 1 : index
    %c0_32 = arith.constant 0 : index
    %c0_33 = arith.constant 0 : index
    %29 = vector.load %arg6[%c1_31, %c0_32, %c0_33] : memref<18x18x4xf32, #tpu.memory_space<vmem>>, vector<16x16x4xf32>
    %30 = vector.shape_cast %29 : vector<16x16x4xf32> to vector<256x4xf32>
    %31 = arith.truncf %30 : vector<256x4xf32> to vector<256x4xbf16>
    %c1_34 = arith.constant 1 : index
    %c0_35 = arith.constant 0 : index
    %c0_36 = arith.constant 0 : index
    %c0_37 = arith.constant 0 : index
    %32 = vector.load %arg2[%c1_34, %c0_35, %c0_36, %c0_37] : memref<3x3x4x4xbf16, #tpu.memory_space<vmem>>, vector<1x1x4x4xbf16>
    %33 = vector.shape_cast %32 : vector<1x1x4x4xbf16> to vector<4x4xbf16>
    %cst_38 = arith.constant dense<0.000000e+00> : vector<256x4xf32>
    %34 = tpu.matmul %31, %33, %cst_38 {dimension_numbers = #tpu.dot_dimension_numbers<[1], [0], [0], [1], [0, 0, 1, 1], [], []>} : vector<256x4xbf16>, vector<4x4xbf16>, vector<256x4xf32> -> vector<256x4xf32>
    %35 = arith.addf %28, %34 : vector<256x4xf32>
    %c1_39 = arith.constant 1 : index
    %c1_40 = arith.constant 1 : index
    %c0_41 = arith.constant 0 : index
    %36 = vector.load %arg6[%c1_39, %c1_40, %c0_41] : memref<18x18x4xf32, #tpu.memory_space<vmem>>, vector<16x16x4xf32>
    %37 = vector.shape_cast %36 : vector<16x16x4xf32> to vector<256x4xf32>
    %38 = arith.truncf %37 : vector<256x4xf32> to vector<256x4xbf16>
    %c1_42 = arith.constant 1 : index
    %c1_43 = arith.constant 1 : index
    %c0_44 = arith.constant 0 : index
    %c0_45 = arith.constant 0 : index
    %39 = vector.load %arg2[%c1_42, %c1_43, %c0_44, %c0_45] : memref<3x3x4x4xbf16, #tpu.memory_space<vmem>>, vector<1x1x4x4xbf16>
    %40 = vector.shape_cast %39 : vector<1x1x4x4xbf16> to vector<4x4xbf16>
    %cst_46 = arith.constant dense<0.000000e+00> : vector<256x4xf32>
    %41 = tpu.matmul %38, %40, %cst_46 {dimension_numbers = #tpu.dot_dimension_numbers<[1], [0], [0], [1], [0, 0, 1, 1], [], []>} : vector<256x4xbf16>, vector<4x4xbf16>, vector<256x4xf32> -> vector<256x4xf32>
    %42 = arith.addf %35, %41 : vector<256x4xf32>
    %c1_47 = arith.constant 1 : index
    %c2_48 = arith.constant 2 : index
    %c0_49 = arith.constant 0 : index
    %43 = vector.load %arg6[%c1_47, %c2_48, %c0_49] : memref<18x18x4xf32, #tpu.memory_space<vmem>>, vector<16x16x4xf32>
    %44 = vector.shape_cast %43 : vector<16x16x4xf32> to vector<256x4xf32>
    %45 = arith.truncf %44 : vector<256x4xf32> to vector<256x4xbf16>
    %c1_50 = arith.constant 1 : index
    %c2_51 = arith.constant 2 : index
    %c0_52 = arith.constant 0 : index
    %c0_53 = arith.constant 0 : index
    %46 = vector.load %arg2[%c1_50, %c2_51, %c0_52, %c0_53] : memref<3x3x4x4xbf16, #tpu.memory_space<vmem>>, vector<1x1x4x4xbf16>
    %47 = vector.shape_cast %46 : vector<1x1x4x4xbf16> to vector<4x4xbf16>
    %cst_54 = arith.constant dense<0.000000e+00> : vector<256x4xf32>
    %48 = tpu.matmul %45, %47, %cst_54 {dimension_numbers = #tpu.dot_dimension_numbers<[1], [0], [0], [1], [0, 0, 1, 1], [], []>} : vector<256x4xbf16>, vector<4x4xbf16>, vector<256x4xf32> -> vector<256x4xf32>
    %49 = arith.addf %42, %48 : vector<256x4xf32>
    %c2_55 = arith.constant 2 : index
    %c0_56 = arith.constant 0 : index
    %c0_57 = arith.constant 0 : index
    %50 = vector.load %arg6[%c2_55, %c0_56, %c0_57] : memref<18x18x4xf32, #tpu.memory_space<vmem>>, vector<16x16x4xf32>
    %51 = vector.shape_cast %50 : vector<16x16x4xf32> to vector<256x4xf32>
    %52 = arith.truncf %51 : vector<256x4xf32> to vector<256x4xbf16>
    %c2_58 = arith.constant 2 : index
    %c0_59 = arith.constant 0 : index
    %c0_60 = arith.constant 0 : index
    %c0_61 = arith.constant 0 : index
    %53 = vector.load %arg2[%c2_58, %c0_59, %c0_60, %c0_61] : memref<3x3x4x4xbf16, #tpu.memory_space<vmem>>, vector<1x1x4x4xbf16>
    %54 = vector.shape_cast %53 : vector<1x1x4x4xbf16> to vector<4x4xbf16>
    %cst_62 = arith.constant dense<0.000000e+00> : vector<256x4xf32>
    %55 = tpu.matmul %52, %54, %cst_62 {dimension_numbers = #tpu.dot_dimension_numbers<[1], [0], [0], [1], [0, 0, 1, 1], [], []>} : vector<256x4xbf16>, vector<4x4xbf16>, vector<256x4xf32> -> vector<256x4xf32>
    %56 = arith.addf %49, %55 : vector<256x4xf32>
    %c2_63 = arith.constant 2 : index
    %c1_64 = arith.constant 1 : index
    %c0_65 = arith.constant 0 : index
    %57 = vector.load %arg6[%c2_63, %c1_64, %c0_65] : memref<18x18x4xf32, #tpu.memory_space<vmem>>, vector<16x16x4xf32>
    %58 = vector.shape_cast %57 : vector<16x16x4xf32> to vector<256x4xf32>
    %59 = arith.truncf %58 : vector<256x4xf32> to vector<256x4xbf16>
    %c2_66 = arith.constant 2 : index
    %c1_67 = arith.constant 1 : index
    %c0_68 = arith.constant 0 : index
    %c0_69 = arith.constant 0 : index
    %60 = vector.load %arg2[%c2_66, %c1_67, %c0_68, %c0_69] : memref<3x3x4x4xbf16, #tpu.memory_space<vmem>>, vector<1x1x4x4xbf16>
    %61 = vector.shape_cast %60 : vector<1x1x4x4xbf16> to vector<4x4xbf16>
    %cst_70 = arith.constant dense<0.000000e+00> : vector<256x4xf32>
    %62 = tpu.matmul %59, %61, %cst_70 {dimension_numbers = #tpu.dot_dimension_numbers<[1], [0], [0], [1], [0, 0, 1, 1], [], []>} : vector<256x4xbf16>, vector<4x4xbf16>, vector<256x4xf32> -> vector<256x4xf32>
    %63 = arith.addf %56, %62 : vector<256x4xf32>
    %c2_71 = arith.constant 2 : index
    %c2_72 = arith.constant 2 : index
    %c0_73 = arith.constant 0 : index
    %64 = vector.load %arg6[%c2_71, %c2_72, %c0_73] : memref<18x18x4xf32, #tpu.memory_space<vmem>>, vector<16x16x4xf32>
    %65 = vector.shape_cast %64 : vector<16x16x4xf32> to vector<256x4xf32>
    %66 = arith.truncf %65 : vector<256x4xf32> to vector<256x4xbf16>
    %c2_74 = arith.constant 2 : index
    %c2_75 = arith.constant 2 : index
    %c0_76 = arith.constant 0 : index
    %c0_77 = arith.constant 0 : index
    %67 = vector.load %arg2[%c2_74, %c2_75, %c0_76, %c0_77] : memref<3x3x4x4xbf16, #tpu.memory_space<vmem>>, vector<1x1x4x4xbf16>
    %68 = vector.shape_cast %67 : vector<1x1x4x4xbf16> to vector<4x4xbf16>
    %cst_78 = arith.constant dense<0.000000e+00> : vector<256x4xf32>
    %69 = tpu.matmul %66, %68, %cst_78 {dimension_numbers = #tpu.dot_dimension_numbers<[1], [0], [0], [1], [0, 0, 1, 1], [], []>} : vector<256x4xbf16>, vector<4x4xbf16>, vector<256x4xf32> -> vector<256x4xf32>
    %70 = arith.addf %63, %69 : vector<256x4xf32>
    %71 = tpu.transpose %70, [1, 0] : vector<256x4xf32> -> vector<4x256xf32>
    %72 = arith.truncf %71 : vector<4x256xf32> to vector<4x256xbf16>
    %73 = vector.shape_cast %72 : vector<4x256xbf16> to vector<1x4x256xbf16>
    %c0_79 = arith.constant 0 : index
    %c0_80 = arith.constant 0 : index
    %c0_81 = arith.constant 0 : index
    %74 = vector.load %arg3[%c0_79, %c0_80, %c0_81] : memref<1x4x256xbf16, #tpu.memory_space<vmem>>, vector<1x4x256xbf16>
    tpu.vector_store %arg3[%c0_79, %c0_80, %c0_81], %73 {strides = array<i32>} : memref<1x4x256xbf16, #tpu.memory_space<vmem>>, vector<1x4x256xbf16>,
    %cst_82 = arith.constant dense<0.000000e+00> : vector<4xf32>
    %75 = vector.multi_reduction <add>, %70, %cst_82 [0] : vector<256x4xf32> to vector<4xf32>
    %76 = vector.shape_cast %75 : vector<4xf32> to vector<1x4xf32>
    %77 = vector.shape_cast %76 : vector<1x4xf32> to vector<1x1x4xf32>
    %c0_83 = arith.constant 0 : index
    %c0_84 = arith.constant 0 : index
    %c0_85 = arith.constant 0 : index
    %78 = vector.load %arg4[%c0_83, %c0_84, %c0_85] : memref<1x1x4xf32, #tpu.memory_space<vmem>>, vector<1x1x4xf32>
    tpu.vector_store %arg4[%c0_83, %c0_84, %c0_85], %77 {strides = array<i32>} : memref<1x1x4xf32, #tpu.memory_space<vmem>>, vector<1x1x4xf32>,
    %79 = arith.mulf %70, %70 : vector<256x4xf32>
    %cst_86 = arith.constant dense<0.000000e+00> : vector<4xf32>
    %80 = vector.multi_reduction <add>, %79, %cst_86 [0] : vector<256x4xf32> to vector<4xf32>
    %81 = vector.shape_cast %80 : vector<4xf32> to vector<1x4xf32>
    %82 = vector.shape_cast %81 : vector<1x4xf32> to vector<1x1x4xf32>
    %c0_87 = arith.constant 0 : index
    %c0_88 = arith.constant 0 : index
    %c0_89 = arith.constant 0 : index
    %83 = vector.load %arg5[%c0_87, %c0_88, %c0_89] : memref<1x1x4xf32, #tpu.memory_space<vmem>>, vector<1x1x4xf32>
    tpu.vector_store %arg5[%c0_87, %c0_88, %c0_89], %82 {strides = array<i32>} : memref<1x1x4xf32, #tpu.memory_space<vmem>>, vector<1x1x4xf32>,
    return
  }
  func.func @transform_0(%arg0: i32) -> (i32, i32, i32) {
    %c0_i32 = arith.constant 0 : i32
    %c0_i32_0 = arith.constant 0 : i32
    %c0_i32_1 = arith.constant 0 : i32
    return %arg0, %c0_i32, %c0_i32_0 : i32, i32, i32
  }
  func.func @transform_1(%arg0: i32) -> (i32, i32, i32, i32) {
    %c0_i32 = arith.constant 0 : i32
    %c0_i32_0 = arith.constant 0 : i32
    %c0_i32_1 = arith.constant 0 : i32
    %c0_i32_2 = arith.constant 0 : i32
    %c0_i32_3 = arith.constant 0 : i32
    return %c0_i32, %c0_i32_0, %c0_i32_1, %c0_i32_2 : i32, i32, i32, i32
  }
  func.func @transform_2(%arg0: i32) -> (i32, i32, i32) {
    %c0_i32 = arith.constant 0 : i32
    %c0_i32_0 = arith.constant 0 : i32
    %c0_i32_1 = arith.constant 0 : i32
    return %arg0, %c0_i32, %c0_i32_0 : i32, i32, i32
  }
  func.func @transform_3(%arg0: i32) -> (i32, i32, i32) {
    %c0_i32 = arith.constant 0 : i32
    %c0_i32_0 = arith.constant 0 : i32
    %c0_i32_1 = arith.constant 0 : i32
    return %arg0, %c0_i32, %c0_i32_0 : i32, i32, i32
  }
  func.func @transform_4(%arg0: i32) -> (i32, i32, i32) {
    %c0_i32 = arith.constant 0 : i32
    %c0_i32_0 = arith.constant 0 : i32
    %c0_i32_1 = arith.constant 0 : i32
    return %arg0, %c0_i32, %c0_i32_0 : i32, i32, i32
  }
}

module attributes {stable_mosaic.version = 11 : i64} {
  func.func @_conv_bn_stats_kernel(%arg0: i32, %arg1: memref<1x4x256xbf16, #tpu.memory_space<vmem>>, %arg2: memref<4x1xf32, #tpu.memory_space<vmem>>, %arg3: memref<4x1xf32, #tpu.memory_space<vmem>>, %arg4: memref<3x3x4x4xbf16, #tpu.memory_space<vmem>>, %arg5: memref<1x4x256xbf16, #tpu.memory_space<vmem>>, %arg6: memref<1x1x4xf32, #tpu.memory_space<vmem>>, %arg7: memref<1x1x4xf32, #tpu.memory_space<vmem>>, %arg8: memref<18x18x4xf32, #tpu.memory_space<vmem>>) attributes {dimension_semantics = [#tpu.dimension_semantics<parallel>], iteration_bounds = array<i64: 2>, scalar_prefetch = 0 : i64, scratch_operands = 1 : i64, tpu.core_type = #tpu.core_type<tc>, window_params = [{transform_indices = @transform_0, window_bounds = array<i64: 1, 4, 256>}, {pipeline_mode = #tpu.pipeline_mode<synchronous>, transform_indices = @transform_1, window_bounds = array<i64: 4, 1>}, {pipeline_mode = #tpu.pipeline_mode<synchronous>, transform_indices = @transform_2, window_bounds = array<i64: 4, 1>}, {pipeline_mode = #tpu.pipeline_mode<synchronous>, transform_indices = @transform_3, window_bounds = array<i64: 3, 3, 4, 4>}, {transform_indices = @transform_4, window_bounds = array<i64: 1, 4, 256>}, {transform_indices = @transform_5, window_bounds = array<i64: 1, 1, 4>}, {transform_indices = @transform_6, window_bounds = array<i64: 1, 1, 4>}]} {
    %c0 = arith.constant 0 : index
    %c0_0 = arith.constant 0 : index
    %c0_1 = arith.constant 0 : index
    %0 = vector.load %arg1[%c0, %c0_0, %c0_1] : memref<1x4x256xbf16, #tpu.memory_space<vmem>>, vector<1x4x256xbf16>
    %1 = vector.shape_cast %0 : vector<1x4x256xbf16> to vector<4x256xbf16>
    %2 = arith.extf %1 : vector<4x256xbf16> to vector<4x256xf32>
    %c0_2 = arith.constant 0 : index
    %c0_3 = arith.constant 0 : index
    %3 = vector.load %arg2[%c0_2, %c0_3] : memref<4x1xf32, #tpu.memory_space<vmem>>, vector<4x1xf32>
    %4 = vector.broadcast %3 : vector<4x1xf32> to vector<4x256xf32>
    %5 = arith.mulf %2, %4 : vector<4x256xf32>
    %c0_4 = arith.constant 0 : index
    %c0_5 = arith.constant 0 : index
    %6 = vector.load %arg3[%c0_4, %c0_5] : memref<4x1xf32, #tpu.memory_space<vmem>>, vector<4x1xf32>
    %7 = vector.broadcast %6 : vector<4x1xf32> to vector<4x256xf32>
    %8 = arith.addf %5, %7 : vector<4x256xf32>
    %cst = arith.constant 0.000000e+00 : f32
    %9 = vector.broadcast %cst : f32 to vector<4x256xf32>
    %10 = arith.maximumf %8, %9 : vector<4x256xf32>
    %11 = tpu.transpose %10, [1, 0] : vector<4x256xf32> -> vector<256x4xf32>
    %12 = vector.shape_cast %11 : vector<256x4xf32> to vector<16x16x4xf32>
    %cst_6 = arith.constant 0.000000e+00 : f32
    %13 = vector.broadcast %cst_6 : f32 to vector<18x18x4xf32>
    %c0_7 = arith.constant 0 : index
    %c0_8 = arith.constant 0 : index
    %c0_9 = arith.constant 0 : index
    %14 = vector.load %arg8[%c0_7, %c0_8, %c0_9] : memref<18x18x4xf32, #tpu.memory_space<vmem>>, vector<18x18x4xf32>
    tpu.vector_store %arg8[%c0_7, %c0_8, %c0_9], %13 {strides = array<i32>} : memref<18x18x4xf32, #tpu.memory_space<vmem>>, vector<18x18x4xf32>,
    %c1 = arith.constant 1 : index
    %c1_10 = arith.constant 1 : index
    %c0_11 = arith.constant 0 : index
    %15 = vector.load %arg8[%c1, %c1_10, %c0_11] : memref<18x18x4xf32, #tpu.memory_space<vmem>>, vector<16x16x4xf32>
    tpu.vector_store %arg8[%c1, %c1_10, %c0_11], %12 {strides = array<i32>} : memref<18x18x4xf32, #tpu.memory_space<vmem>>, vector<16x16x4xf32>,
    %cst_12 = arith.constant 0.000000e+00 : f32
    %16 = vector.broadcast %cst_12 : f32 to vector<256x4xf32>
    %c0_13 = arith.constant 0 : index
    %c0_14 = arith.constant 0 : index
    %c0_15 = arith.constant 0 : index
    %17 = vector.load %arg8[%c0_13, %c0_14, %c0_15] : memref<18x18x4xf32, #tpu.memory_space<vmem>>, vector<16x16x4xf32>
    %18 = vector.shape_cast %17 : vector<16x16x4xf32> to vector<256x4xf32>
    %19 = arith.truncf %18 : vector<256x4xf32> to vector<256x4xbf16>
    %c0_16 = arith.constant 0 : index
    %c0_17 = arith.constant 0 : index
    %c0_18 = arith.constant 0 : index
    %c0_19 = arith.constant 0 : index
    %20 = vector.load %arg4[%c0_16, %c0_17, %c0_18, %c0_19] : memref<3x3x4x4xbf16, #tpu.memory_space<vmem>>, vector<1x1x4x4xbf16>
    %21 = vector.shape_cast %20 : vector<1x1x4x4xbf16> to vector<4x4xbf16>
    %cst_20 = arith.constant dense<0.000000e+00> : vector<256x4xf32>
    %22 = tpu.matmul %19, %21, %cst_20 {dimension_numbers = #tpu.dot_dimension_numbers<[1], [0], [0], [1], [0, 0, 1, 1], [], []>} : vector<256x4xbf16>, vector<4x4xbf16>, vector<256x4xf32> -> vector<256x4xf32>
    %23 = arith.addf %16, %22 : vector<256x4xf32>
    %c0_21 = arith.constant 0 : index
    %c1_22 = arith.constant 1 : index
    %c0_23 = arith.constant 0 : index
    %24 = vector.load %arg8[%c0_21, %c1_22, %c0_23] : memref<18x18x4xf32, #tpu.memory_space<vmem>>, vector<16x16x4xf32>
    %25 = vector.shape_cast %24 : vector<16x16x4xf32> to vector<256x4xf32>
    %26 = arith.truncf %25 : vector<256x4xf32> to vector<256x4xbf16>
    %c0_24 = arith.constant 0 : index
    %c1_25 = arith.constant 1 : index
    %c0_26 = arith.constant 0 : index
    %c0_27 = arith.constant 0 : index
    %27 = vector.load %arg4[%c0_24, %c1_25, %c0_26, %c0_27] : memref<3x3x4x4xbf16, #tpu.memory_space<vmem>>, vector<1x1x4x4xbf16>
    %28 = vector.shape_cast %27 : vector<1x1x4x4xbf16> to vector<4x4xbf16>
    %cst_28 = arith.constant dense<0.000000e+00> : vector<256x4xf32>
    %29 = tpu.matmul %26, %28, %cst_28 {dimension_numbers = #tpu.dot_dimension_numbers<[1], [0], [0], [1], [0, 0, 1, 1], [], []>} : vector<256x4xbf16>, vector<4x4xbf16>, vector<256x4xf32> -> vector<256x4xf32>
    %30 = arith.addf %23, %29 : vector<256x4xf32>
    %c0_29 = arith.constant 0 : index
    %c2 = arith.constant 2 : index
    %c0_30 = arith.constant 0 : index
    %31 = vector.load %arg8[%c0_29, %c2, %c0_30] : memref<18x18x4xf32, #tpu.memory_space<vmem>>, vector<16x16x4xf32>
    %32 = vector.shape_cast %31 : vector<16x16x4xf32> to vector<256x4xf32>
    %33 = arith.truncf %32 : vector<256x4xf32> to vector<256x4xbf16>
    %c0_31 = arith.constant 0 : index
    %c2_32 = arith.constant 2 : index
    %c0_33 = arith.constant 0 : index
    %c0_34 = arith.constant 0 : index
    %34 = vector.load %arg4[%c0_31, %c2_32, %c0_33, %c0_34] : memref<3x3x4x4xbf16, #tpu.memory_space<vmem>>, vector<1x1x4x4xbf16>
    %35 = vector.shape_cast %34 : vector<1x1x4x4xbf16> to vector<4x4xbf16>
    %cst_35 = arith.constant dense<0.000000e+00> : vector<256x4xf32>
    %36 = tpu.matmul %33, %35, %cst_35 {dimension_numbers = #tpu.dot_dimension_numbers<[1], [0], [0], [1], [0, 0, 1, 1], [], []>} : vector<256x4xbf16>, vector<4x4xbf16>, vector<256x4xf32> -> vector<256x4xf32>
    %37 = arith.addf %30, %36 : vector<256x4xf32>
    %c1_36 = arith.constant 1 : index
    %c0_37 = arith.constant 0 : index
    %c0_38 = arith.constant 0 : index
    %38 = vector.load %arg8[%c1_36, %c0_37, %c0_38] : memref<18x18x4xf32, #tpu.memory_space<vmem>>, vector<16x16x4xf32>
    %39 = vector.shape_cast %38 : vector<16x16x4xf32> to vector<256x4xf32>
    %40 = arith.truncf %39 : vector<256x4xf32> to vector<256x4xbf16>
    %c1_39 = arith.constant 1 : index
    %c0_40 = arith.constant 0 : index
    %c0_41 = arith.constant 0 : index
    %c0_42 = arith.constant 0 : index
    %41 = vector.load %arg4[%c1_39, %c0_40, %c0_41, %c0_42] : memref<3x3x4x4xbf16, #tpu.memory_space<vmem>>, vector<1x1x4x4xbf16>
    %42 = vector.shape_cast %41 : vector<1x1x4x4xbf16> to vector<4x4xbf16>
    %cst_43 = arith.constant dense<0.000000e+00> : vector<256x4xf32>
    %43 = tpu.matmul %40, %42, %cst_43 {dimension_numbers = #tpu.dot_dimension_numbers<[1], [0], [0], [1], [0, 0, 1, 1], [], []>} : vector<256x4xbf16>, vector<4x4xbf16>, vector<256x4xf32> -> vector<256x4xf32>
    %44 = arith.addf %37, %43 : vector<256x4xf32>
    %c1_44 = arith.constant 1 : index
    %c1_45 = arith.constant 1 : index
    %c0_46 = arith.constant 0 : index
    %45 = vector.load %arg8[%c1_44, %c1_45, %c0_46] : memref<18x18x4xf32, #tpu.memory_space<vmem>>, vector<16x16x4xf32>
    %46 = vector.shape_cast %45 : vector<16x16x4xf32> to vector<256x4xf32>
    %47 = arith.truncf %46 : vector<256x4xf32> to vector<256x4xbf16>
    %c1_47 = arith.constant 1 : index
    %c1_48 = arith.constant 1 : index
    %c0_49 = arith.constant 0 : index
    %c0_50 = arith.constant 0 : index
    %48 = vector.load %arg4[%c1_47, %c1_48, %c0_49, %c0_50] : memref<3x3x4x4xbf16, #tpu.memory_space<vmem>>, vector<1x1x4x4xbf16>
    %49 = vector.shape_cast %48 : vector<1x1x4x4xbf16> to vector<4x4xbf16>
    %cst_51 = arith.constant dense<0.000000e+00> : vector<256x4xf32>
    %50 = tpu.matmul %47, %49, %cst_51 {dimension_numbers = #tpu.dot_dimension_numbers<[1], [0], [0], [1], [0, 0, 1, 1], [], []>} : vector<256x4xbf16>, vector<4x4xbf16>, vector<256x4xf32> -> vector<256x4xf32>
    %51 = arith.addf %44, %50 : vector<256x4xf32>
    %c1_52 = arith.constant 1 : index
    %c2_53 = arith.constant 2 : index
    %c0_54 = arith.constant 0 : index
    %52 = vector.load %arg8[%c1_52, %c2_53, %c0_54] : memref<18x18x4xf32, #tpu.memory_space<vmem>>, vector<16x16x4xf32>
    %53 = vector.shape_cast %52 : vector<16x16x4xf32> to vector<256x4xf32>
    %54 = arith.truncf %53 : vector<256x4xf32> to vector<256x4xbf16>
    %c1_55 = arith.constant 1 : index
    %c2_56 = arith.constant 2 : index
    %c0_57 = arith.constant 0 : index
    %c0_58 = arith.constant 0 : index
    %55 = vector.load %arg4[%c1_55, %c2_56, %c0_57, %c0_58] : memref<3x3x4x4xbf16, #tpu.memory_space<vmem>>, vector<1x1x4x4xbf16>
    %56 = vector.shape_cast %55 : vector<1x1x4x4xbf16> to vector<4x4xbf16>
    %cst_59 = arith.constant dense<0.000000e+00> : vector<256x4xf32>
    %57 = tpu.matmul %54, %56, %cst_59 {dimension_numbers = #tpu.dot_dimension_numbers<[1], [0], [0], [1], [0, 0, 1, 1], [], []>} : vector<256x4xbf16>, vector<4x4xbf16>, vector<256x4xf32> -> vector<256x4xf32>
    %58 = arith.addf %51, %57 : vector<256x4xf32>
    %c2_60 = arith.constant 2 : index
    %c0_61 = arith.constant 0 : index
    %c0_62 = arith.constant 0 : index
    %59 = vector.load %arg8[%c2_60, %c0_61, %c0_62] : memref<18x18x4xf32, #tpu.memory_space<vmem>>, vector<16x16x4xf32>
    %60 = vector.shape_cast %59 : vector<16x16x4xf32> to vector<256x4xf32>
    %61 = arith.truncf %60 : vector<256x4xf32> to vector<256x4xbf16>
    %c2_63 = arith.constant 2 : index
    %c0_64 = arith.constant 0 : index
    %c0_65 = arith.constant 0 : index
    %c0_66 = arith.constant 0 : index
    %62 = vector.load %arg4[%c2_63, %c0_64, %c0_65, %c0_66] : memref<3x3x4x4xbf16, #tpu.memory_space<vmem>>, vector<1x1x4x4xbf16>
    %63 = vector.shape_cast %62 : vector<1x1x4x4xbf16> to vector<4x4xbf16>
    %cst_67 = arith.constant dense<0.000000e+00> : vector<256x4xf32>
    %64 = tpu.matmul %61, %63, %cst_67 {dimension_numbers = #tpu.dot_dimension_numbers<[1], [0], [0], [1], [0, 0, 1, 1], [], []>} : vector<256x4xbf16>, vector<4x4xbf16>, vector<256x4xf32> -> vector<256x4xf32>
    %65 = arith.addf %58, %64 : vector<256x4xf32>
    %c2_68 = arith.constant 2 : index
    %c1_69 = arith.constant 1 : index
    %c0_70 = arith.constant 0 : index
    %66 = vector.load %arg8[%c2_68, %c1_69, %c0_70] : memref<18x18x4xf32, #tpu.memory_space<vmem>>, vector<16x16x4xf32>
    %67 = vector.shape_cast %66 : vector<16x16x4xf32> to vector<256x4xf32>
    %68 = arith.truncf %67 : vector<256x4xf32> to vector<256x4xbf16>
    %c2_71 = arith.constant 2 : index
    %c1_72 = arith.constant 1 : index
    %c0_73 = arith.constant 0 : index
    %c0_74 = arith.constant 0 : index
    %69 = vector.load %arg4[%c2_71, %c1_72, %c0_73, %c0_74] : memref<3x3x4x4xbf16, #tpu.memory_space<vmem>>, vector<1x1x4x4xbf16>
    %70 = vector.shape_cast %69 : vector<1x1x4x4xbf16> to vector<4x4xbf16>
    %cst_75 = arith.constant dense<0.000000e+00> : vector<256x4xf32>
    %71 = tpu.matmul %68, %70, %cst_75 {dimension_numbers = #tpu.dot_dimension_numbers<[1], [0], [0], [1], [0, 0, 1, 1], [], []>} : vector<256x4xbf16>, vector<4x4xbf16>, vector<256x4xf32> -> vector<256x4xf32>
    %72 = arith.addf %65, %71 : vector<256x4xf32>
    %c2_76 = arith.constant 2 : index
    %c2_77 = arith.constant 2 : index
    %c0_78 = arith.constant 0 : index
    %73 = vector.load %arg8[%c2_76, %c2_77, %c0_78] : memref<18x18x4xf32, #tpu.memory_space<vmem>>, vector<16x16x4xf32>
    %74 = vector.shape_cast %73 : vector<16x16x4xf32> to vector<256x4xf32>
    %75 = arith.truncf %74 : vector<256x4xf32> to vector<256x4xbf16>
    %c2_79 = arith.constant 2 : index
    %c2_80 = arith.constant 2 : index
    %c0_81 = arith.constant 0 : index
    %c0_82 = arith.constant 0 : index
    %76 = vector.load %arg4[%c2_79, %c2_80, %c0_81, %c0_82] : memref<3x3x4x4xbf16, #tpu.memory_space<vmem>>, vector<1x1x4x4xbf16>
    %77 = vector.shape_cast %76 : vector<1x1x4x4xbf16> to vector<4x4xbf16>
    %cst_83 = arith.constant dense<0.000000e+00> : vector<256x4xf32>
    %78 = tpu.matmul %75, %77, %cst_83 {dimension_numbers = #tpu.dot_dimension_numbers<[1], [0], [0], [1], [0, 0, 1, 1], [], []>} : vector<256x4xbf16>, vector<4x4xbf16>, vector<256x4xf32> -> vector<256x4xf32>
    %79 = arith.addf %72, %78 : vector<256x4xf32>
    %80 = tpu.transpose %79, [1, 0] : vector<256x4xf32> -> vector<4x256xf32>
    %81 = arith.truncf %80 : vector<4x256xf32> to vector<4x256xbf16>
    %82 = vector.shape_cast %81 : vector<4x256xbf16> to vector<1x4x256xbf16>
    %c0_84 = arith.constant 0 : index
    %c0_85 = arith.constant 0 : index
    %c0_86 = arith.constant 0 : index
    %83 = vector.load %arg5[%c0_84, %c0_85, %c0_86] : memref<1x4x256xbf16, #tpu.memory_space<vmem>>, vector<1x4x256xbf16>
    tpu.vector_store %arg5[%c0_84, %c0_85, %c0_86], %82 {strides = array<i32>} : memref<1x4x256xbf16, #tpu.memory_space<vmem>>, vector<1x4x256xbf16>,
    %cst_87 = arith.constant dense<0.000000e+00> : vector<4xf32>
    %84 = vector.multi_reduction <add>, %79, %cst_87 [0] : vector<256x4xf32> to vector<4xf32>
    %85 = vector.shape_cast %84 : vector<4xf32> to vector<1x4xf32>
    %86 = vector.shape_cast %85 : vector<1x4xf32> to vector<1x1x4xf32>
    %c0_88 = arith.constant 0 : index
    %c0_89 = arith.constant 0 : index
    %c0_90 = arith.constant 0 : index
    %87 = vector.load %arg6[%c0_88, %c0_89, %c0_90] : memref<1x1x4xf32, #tpu.memory_space<vmem>>, vector<1x1x4xf32>
    tpu.vector_store %arg6[%c0_88, %c0_89, %c0_90], %86 {strides = array<i32>} : memref<1x1x4xf32, #tpu.memory_space<vmem>>, vector<1x1x4xf32>,
    %88 = arith.mulf %79, %79 : vector<256x4xf32>
    %cst_91 = arith.constant dense<0.000000e+00> : vector<4xf32>
    %89 = vector.multi_reduction <add>, %88, %cst_91 [0] : vector<256x4xf32> to vector<4xf32>
    %90 = vector.shape_cast %89 : vector<4xf32> to vector<1x4xf32>
    %91 = vector.shape_cast %90 : vector<1x4xf32> to vector<1x1x4xf32>
    %c0_92 = arith.constant 0 : index
    %c0_93 = arith.constant 0 : index
    %c0_94 = arith.constant 0 : index
    %92 = vector.load %arg7[%c0_92, %c0_93, %c0_94] : memref<1x1x4xf32, #tpu.memory_space<vmem>>, vector<1x1x4xf32>
    tpu.vector_store %arg7[%c0_92, %c0_93, %c0_94], %91 {strides = array<i32>} : memref<1x1x4xf32, #tpu.memory_space<vmem>>, vector<1x1x4xf32>,
    return
  }
  func.func @transform_0(%arg0: i32) -> (i32, i32, i32) {
    %c0_i32 = arith.constant 0 : i32
    %c0_i32_0 = arith.constant 0 : i32
    %c0_i32_1 = arith.constant 0 : i32
    return %arg0, %c0_i32, %c0_i32_0 : i32, i32, i32
  }
  func.func @transform_1(%arg0: i32) -> (i32, i32) {
    %c0_i32 = arith.constant 0 : i32
    %c0_i32_0 = arith.constant 0 : i32
    %c0_i32_1 = arith.constant 0 : i32
    return %c0_i32, %c0_i32_0 : i32, i32
  }
  func.func @transform_2(%arg0: i32) -> (i32, i32) {
    %c0_i32 = arith.constant 0 : i32
    %c0_i32_0 = arith.constant 0 : i32
    %c0_i32_1 = arith.constant 0 : i32
    return %c0_i32, %c0_i32_0 : i32, i32
  }
  func.func @transform_3(%arg0: i32) -> (i32, i32, i32, i32) {
    %c0_i32 = arith.constant 0 : i32
    %c0_i32_0 = arith.constant 0 : i32
    %c0_i32_1 = arith.constant 0 : i32
    %c0_i32_2 = arith.constant 0 : i32
    %c0_i32_3 = arith.constant 0 : i32
    return %c0_i32, %c0_i32_0, %c0_i32_1, %c0_i32_2 : i32, i32, i32, i32
  }
  func.func @transform_4(%arg0: i32) -> (i32, i32, i32) {
    %c0_i32 = arith.constant 0 : i32
    %c0_i32_0 = arith.constant 0 : i32
    %c0_i32_1 = arith.constant 0 : i32
    return %arg0, %c0_i32, %c0_i32_0 : i32, i32, i32
  }
  func.func @transform_5(%arg0: i32) -> (i32, i32, i32) {
    %c0_i32 = arith.constant 0 : i32
    %c0_i32_0 = arith.constant 0 : i32
    %c0_i32_1 = arith.constant 0 : i32
    return %arg0, %c0_i32, %c0_i32_0 : i32, i32, i32
  }
  func.func @transform_6(%arg0: i32) -> (i32, i32, i32) {
    %c0_i32 = arith.constant 0 : i32
    %c0_i32_0 = arith.constant 0 : i32
    %c0_i32_1 = arith.constant 0 : i32
    return %arg0, %c0_i32, %c0_i32_0 : i32, i32, i32
  }
}

module attributes {stable_mosaic.version = 11 : i64} {
  func.func @_bn_add_relu_kernel(%arg0: i32, %arg1: memref<8x256xbf16, #tpu.memory_space<vmem>>, %arg2: memref<8x256xf32, #tpu.memory_space<vmem>>, %arg3: memref<8x1xf32, #tpu.memory_space<vmem>>, %arg4: memref<8x1xf32, #tpu.memory_space<vmem>>, %arg5: memref<8x256xf32, #tpu.memory_space<vmem>>) attributes {dimension_semantics = [#tpu.dimension_semantics<parallel>], iteration_bounds = array<i64: 1>, scalar_prefetch = 0 : i64, scratch_operands = 0 : i64, tpu.core_type = #tpu.core_type<tc>, window_params = [{transform_indices = @transform_0, window_bounds = array<i64: 8, 256>}, {transform_indices = @transform_1, window_bounds = array<i64: 8, 256>}, {transform_indices = @transform_2, window_bounds = array<i64: 8, 1>}, {transform_indices = @transform_3, window_bounds = array<i64: 8, 1>}, {transform_indices = @transform_4, window_bounds = array<i64: 8, 256>}]} {
    %c0 = arith.constant 0 : index
    %c0_0 = arith.constant 0 : index
    %0 = vector.load %arg1[%c0, %c0_0] : memref<8x256xbf16, #tpu.memory_space<vmem>>, vector<8x256xbf16>
    %1 = arith.extf %0 : vector<8x256xbf16> to vector<8x256xf32>
    %c0_1 = arith.constant 0 : index
    %c0_2 = arith.constant 0 : index
    %2 = vector.load %arg3[%c0_1, %c0_2] : memref<8x1xf32, #tpu.memory_space<vmem>>, vector<8x1xf32>
    %3 = vector.broadcast %2 : vector<8x1xf32> to vector<8x256xf32>
    %4 = arith.mulf %1, %3 : vector<8x256xf32>
    %c0_3 = arith.constant 0 : index
    %c0_4 = arith.constant 0 : index
    %5 = vector.load %arg4[%c0_3, %c0_4] : memref<8x1xf32, #tpu.memory_space<vmem>>, vector<8x1xf32>
    %6 = vector.broadcast %5 : vector<8x1xf32> to vector<8x256xf32>
    %7 = arith.addf %4, %6 : vector<8x256xf32>
    %c0_5 = arith.constant 0 : index
    %c0_6 = arith.constant 0 : index
    %8 = vector.load %arg2[%c0_5, %c0_6] : memref<8x256xf32, #tpu.memory_space<vmem>>, vector<8x256xf32>
    %9 = arith.addf %7, %8 : vector<8x256xf32>
    %cst = arith.constant 0.000000e+00 : f32
    %10 = vector.broadcast %cst : f32 to vector<8x256xf32>
    %11 = arith.maximumf %9, %10 : vector<8x256xf32>
    %c0_7 = arith.constant 0 : index
    %c0_8 = arith.constant 0 : index
    %12 = vector.load %arg5[%c0_7, %c0_8] : memref<8x256xf32, #tpu.memory_space<vmem>>, vector<8x256xf32>
    tpu.vector_store %arg5[%c0_7, %c0_8], %11 {strides = array<i32>} : memref<8x256xf32, #tpu.memory_space<vmem>>, vector<8x256xf32>,
    return
  }
  func.func @transform_0(%arg0: i32) -> (i32, i32) {
    %c0_i32 = arith.constant 0 : i32
    %c0_i32_0 = arith.constant 0 : i32
    return %arg0, %c0_i32 : i32, i32
  }
  func.func @transform_1(%arg0: i32) -> (i32, i32) {
    %c0_i32 = arith.constant 0 : i32
    %c0_i32_0 = arith.constant 0 : i32
    return %arg0, %c0_i32 : i32, i32
  }
  func.func @transform_2(%arg0: i32) -> (i32, i32) {
    %c0_i32 = arith.constant 0 : i32
    %c0_i32_0 = arith.constant 0 : i32
    return %arg0, %c0_i32 : i32, i32
  }
  func.func @transform_3(%arg0: i32) -> (i32, i32) {
    %c0_i32 = arith.constant 0 : i32
    %c0_i32_0 = arith.constant 0 : i32
    return %arg0, %c0_i32 : i32, i32
  }
  func.func @transform_4(%arg0: i32) -> (i32, i32) {
    %c0_i32 = arith.constant 0 : i32
    %c0_i32_0 = arith.constant 0 : i32
    return %arg0, %c0_i32 : i32, i32
  }
}

</mosaic_0001>

<bundles_post_ra>
// kernel: tile.18
= control target key start
LH: loop header
LB: loop body
LE: loop exit
PB: predicated region body
PF: predicated region fallthrough
CT: control target
= control target key end

     0   :  { %s22_s0 = inlined_call_operand.vmem [shape: f32[4], index: 0, kind: input, shape index: {}]   ;;  %s23_s1 = inlined_call_operand.vmem [shape: f32[2,4], index: 1, kind: output, shape index: {}]  }
   0x1   :  { %v4_v0 = vld [vmem:[%s22_s0] ss:$0 sm:$0xff] }
   0x2   :  { %5 = vst [vmem:[%s23_s1] sm:$0x3] %v4_v0 }

// kernel: tile.0
= control target key start
LH: loop header
LB: loop body
LE: loop exit
PB: predicated region body
PF: predicated region fallthrough
CT: control target
= control target key end

     0   :  { %s35_s8 = smov 125   ;;  %vm8_vm0 = vcmask 7168   ;;  %s36_s11 = smov 126   ;;  %s62_s0 = inlined_call_operand.vmem [shape: f32[2,4], index: 0, kind: input, shape index: {}]   ;;  %s63_s1 = inlined_call_operand.vmem [shape: f32[8,1], index: 1, kind: output, shape index: {}]  }
   0x1   :  { %v5_v0 = vld [vmem:[%s62_s0] sm:$0x3]  ;;  %s34_s0 = smov 127  }
   0x2   :  { %6 = vst [vmem:[#allocation0] sm:$0x3] %v5_v0 }
   0x9   :  { %v10_v1 = vld [vmem:[#allocation0] sm:$0x3]  }
   0xa   :  { %v22_v2 = vld [vmem:[#allocation0] sm:$0x3]   ;;  %11 = vrot.lane.b32.xlu0 %v10_v1, %s34_s0 }
   0xb   :  { %23 = vrot.lane.b32.xlu1 %v22_v2, %s35_s8  ;;  %v7_v3 = vld [vmem:[#allocation0] sm:$0x3]  }
   0xc   :  { %v16_v4 = vld [vmem:[#allocation0] sm:$0x3]   ;;  %9 = vst.msk [vmem:[%s63_s1] ss:$4 sm:$0x3] %vm8_vm0, %v7_v3  }
   0xe   :  { %17 = vrot.lane.b32.xlu0 %v16_v4, %s36_s11 }
  0x7c   :  { %v12_v5 = vpop.permute.xlu0 %11  }
  0x7d   :  { %v24_v6 = vpop.permute.xlu1 %23   ;;  %28 = vst.msk [vmem:[%s63_s1 + $0x1] ss:$4 sm:$0x3] %vm8_vm0, %v12_v5  }
  0x7e   :  { %30 = vst.msk [vmem:[%s63_s1 + $0x3] ss:$4 sm:$0x3] %vm8_vm0, %v24_v6  }
  0x80   :  { %v18_v7 = vpop.permute.xlu0 %17  }
  0x81   :  { %29 = vst.msk [vmem:[%s63_s1 + $0x2] ss:$4 sm:$0x3] %vm8_vm0, %v18_v7  }

// kernel: basic_block_forward.5
= control target key start
LH: loop header
LB: loop body
LE: loop exit
PB: predicated region body
PF: predicated region fallthrough
CT: control target
= control target key end

     0   :  { %v50_v0 = vmov 0   ;;  %s97_s2 = inlined_call_operand.vmem [shape: f32[8,1], index: 2, kind: input, shape index: {}]   ;;  %s98_s3 = inlined_call_operand.vmem [shape: f32[8,1], index: 3, kind: input, shape index: {}]   ;;  %s99_s0 = inlined_call_operand.vmem [shape: bf16[8,256], index: 0, kind: input, shape index: {}]   ;;  %s100_s1 = inlined_call_operand.vmem [shape: f32[8,256], index: 1, kind: input, shape index: {}]   ;;  %s101_s4 = inlined_call_operand.vmem [shape: f32[8,256], index: 4, kind: output, shape index: {}]  }
   0x1   :  { %49 = vset.pattern.permute.xlu0 %v50_v0  ;;  %v20_v1 = vld [vmem:[%s97_s2] sm:$0xff]  ;;  %v37_v11 = vld [vmem:[%s100_s1 + $0x8] sm:$0xff] }
   0x2   :  { %23 = vperm.xlu0 %49, %v20_v1   ;;  %v28_v2 = vld [vmem:[%s98_s3] sm:$0xff] }
   0x3   :  { %v17_v3 = vld [vmem:[%s99_s0] sm:$0xff] }
   0x4   :  { %v18_v4 = vunpack.c.l.bf16 %v17_v3  ;;  %v19_v5 = vunpack.c.h.bf16 %v17_v3  ;;  %v36_v10 = vld [vmem:[%s100_s1] sm:$0xff] }
   0x6   :  { %31 = vperm.xlu0 %49, %v28_v2  }
  0x7d   :  { %v24_v6 = vpop.permute.xlu0 %23 }
  0x7e   :  { %v26_v7 = vmul.f32 %v24_v6, %v18_v4  ;;  %v27_v8 = vmul.f32 %v24_v6, %v19_v5 }
  0x81   :  { %v32_v9 = vpop.permute.xlu0 %31 }
  0x82   :  { %v34_v12 = vadd.f32 %v32_v9, %v26_v7  ;;  %v35_v13 = vadd.f32 %v32_v9, %v27_v8 }
  0x84   :  { %v38_v14 = vadd.f32 %v36_v10, %v34_v12  ;;  %v39_v15 = vadd.f32 %v37_v11, %v35_v13 }
  0x86   :  { %v40_v16 = vmax.f32 %v38_v14, 0.0  ;;  %v41_v17 = vmax.f32 %v39_v15, 0.0 }
  0x88   :  { %42 = vst [vmem:[%s101_s4] sm:$0xff] %v40_v16  ;;  %43 = vst [vmem:[%s101_s4 + $0x8] sm:$0xff] %v41_v17 }

// kernel: basic_block_forward.3
= control target key start
LH: loop header
LB: loop body
LE: loop exit
PB: predicated region body
PF: predicated region fallthrough
CT: control target
= control target key end

     0   :  { %s4031_s15 = smov 0   ;;  %s5624_s0 = inlined_call_operand.vmem [shape: f32[2,4,256], index: 0, kind: input, shape index: {}]   ;;  %s5625_s1 = inlined_call_operand.vmem [shape: bf16[3,3,4,4], index: 1, kind: input, shape index: {}]   ;;  %s5626_s2 = inlined_call_operand.vmem [shape: bf16[2,4,256], index: 2, kind: output, shape index: {0}]   ;;  %s5627_s3 = inlined_call_operand.vmem [shape: f32[2,1,4], index: 3, kind: output, shape index: {1}]   ;;  %s5628_s4 = inlined_call_operand.vmem [shape: f32[2,1,4], index: 4, kind: output, shape index: {2}]  }
   0x1 LB: > { %s3312_s16 = sadd.s32 4294967295, %s4003_s15   ;;  %p3316_p0 = scmp.ge.s32.totalorder %s4003_s15, 1  ;;  %s4003_s15 = sphi %s4031_s15, %s15_s15  }
   0x2   : > { %p167_p1 = scmp.lt.s32.totalorder %s4003_s15, 3 }
   0x4   : > { %p168_p2 = pnand %p3316_p0, %p167_p1 }
   0x6   : > { %171 = sbr.rel (%p168_p2) target bundleno = 832 (0x340), region = 28 }
   0xb   : > { %p4041_p3 = scmp.lt.s32.totalorder %s3312_s16, 1  ;;  %vm284_vm0 = vcmask 31744   ;;  %v4005_v0 = vmov 0.0   ;;  %vm287_vm1 = vcmask 25600   ;;  %v3321_v2 = vld [vmem:[%s5625_s1 + $0x2] sm:$0x3] }
   0xc   : > { %289 = vst.msk [vmem:[#allocation2 + $0x18] sm:$0xff] %vm284_vm0, %v4005_v0  ;;  %290 = vst.msk [vmem:[#allocation2 + $0x20] sm:$0xff] %vm284_vm0, %v4005_v0  ;;  %vm520_vm2 = vcmask 1041408   ;;  %v3354_v8 = vld [vmem:[%s5625_s1 + $0x4] sm:$0x3]  ;;  %vm3103_vm3 = vcmask 24576  }
   0xd   : > { %285 = vst.msk [vmem:[#allocation2] sm:$0xff] %vm284_vm0, %v4005_v0  ;;  %286 = vst.msk [vmem:[#allocation2 + $0x8] sm:$0xff] %vm284_vm0, %v4005_v0  ;;  %s5851_s16 = smov (!%p4041_p3, %s3312_s16), 1  ;;  %3940 = vmatprep.subr.msk.bf16.mxu0 %vm520_vm2, %v3321_v2  ;;  %v522_v3 = vsel %vm520_vm2, %v3321_v2, 0  ;;  %3941 = vmatprep.subr.msk.bf16.mxu1 %vm520_vm2, %v3321_v2  ;;  %v4123_v9 = vld [vmem:[%s5625_s1] sm:$0x3] }
   0xe   : > { %292 = vst.msk [vmem:[#allocation2 + $0x30] sm:$0xff] %vm284_vm0, %v4005_v0  ;;  %293 = vst.msk [vmem:[#allocation2 + $0x38] sm:$0xff] %vm284_vm0, %v4005_v0  ;;  %s3477_s18 = sshll.u32 %s5851_s16, 3  ;;  %3633 = vmatpush3.bf16.msra.mxu0 %v522_v3  ;;  %3939 = vmatpush3.bf16.msra.mxu1 %v522_v3  ;;  %v996_v17 = vsel %vm520_vm2, %v3354_v8, 0  ;;  %v4137_v18 = vld [vmem:[%s5625_s1 + $0x8] sm:$0x3] }
   0xf   : > { %295 = vst.msk [vmem:[#allocation2 + $0x48] sm:$0xff] %vm284_vm0, %v4005_v0  ;;  %296 = vst.msk [vmem:[#allocation2 + $0x50] sm:$0xff] %vm284_vm0, %v4005_v0  ;;  %s203_s21 = scalar_lea.vmem %s5624_s0, %s3477_s18  ;;  %3943 = vmatprep.subr.msk.bf16.mxu0 %vm520_vm2, %v3354_v8  ;;  %3942 = vmatprep.subr.msk.bf16.mxu1 %vm520_vm2, %v4123_v9  ;;  %v1584_v62 = vsel %vm520_vm2, %v4137_v18, 0  ;;  %s211_s18 = scalar_lea.vmem %s5627_s3, %s5851_s16 }
  0x10   : > { %298 = vst.msk [vmem:[#allocation2 + $0x60] sm:$0xff] %vm284_vm0, %v4005_v0  ;;  %299 = vst.msk [vmem:[#allocation2 + $0x68] sm:$0xff] %vm284_vm0, %v4005_v0  ;;  %v216_v1 = vld [vmem:[%s203_s21] sm:$0xff]  ;;  %s214_s21 = scalar_lea.vmem %s5628_s4, %s5851_s16  ;;  %s3478_s22 = sshll.u32 %s5851_s16, 2 }
  0x11   : > { %301 = vst.msk [vmem:[#allocation2 + $0x78] sm:$0xff] %vm284_vm0, %v4005_v0  ;;  %302 = vst.msk [vmem:[#allocation2 + $0x80] sm:$0xff] %vm284_vm0, %v4005_v0  ;;  %220 = vxpose.xlu0.b32.start.end [1/1] (short) %v216_v1, 128  ;;  %v218_v7 = vcombine.high %v216_v1, %v216_v1  ;;  %s208_s25 = scalar_lea.vmem %s5626_s2, %s3478_s22 }
  0x12   : > { %304 = vst.msk [vmem:[#allocation2 + $0x90] sm:$0xff] %vm284_vm0, %v4005_v0  ;;  %305 = vst.msk [vmem:[#allocation2 + $0x98] sm:$0xff] %vm284_vm0, %v4005_v0 }
  0x13   : > { %307 = vst.msk [vmem:[#allocation2 + $0xa8] sm:$0xff] %vm284_vm0, %v4005_v0  ;;  %308 = vst.msk [vmem:[#allocation2 + $0xb0] sm:$0xff] %vm284_vm0, %v4005_v0 }
  0x14   : > { %310 = vst.msk [vmem:[#allocation2 + $0xc0] sm:$0xff] %vm284_vm0, %v4005_v0  ;;  %311 = vst.msk [vmem:[#allocation2 + $0xc8] sm:$0xff] %vm284_vm0, %v4005_v0  ;;  %v422_v4 = vld [vmem:[#allocation2 + $0x1] sm:$0xff] }
  0x15   : > { %313 = vst.msk [vmem:[#allocation2 + $0xd8] sm:$0xff] %vm284_vm0, %v4005_v0  ;;  %314 = vst.msk [vmem:[#allocation2 + $0xe0] sm:$0xff] %vm284_vm0, %v4005_v0  ;;  %v897_v45 = vld [vmem:[#allocation2 + $0x2] sm:$0xff] }
  0x16   : > { %316 = vst.msk [vmem:[#allocation2 + $0xf0] sm:$0xff] %vm284_vm0, %v4005_v0  ;;  %317 = vst.msk [vmem:[#allocation2 + $0xf8] sm:$0xff] %vm284_vm0, %v4005_v0 }
  0x17   : > { %319 = vst.msk [vmem:[#allocation2 + $0x108] sm:$0xff] %vm284_vm0, %v4005_v0  ;;  %320 = vst.msk [vmem:[#allocation2 + $0x110] sm:$0xff] %vm284_vm0, %v4005_v0 }
  0x18   : > { %322 = vst.msk [vmem:[#allocation2 + $0x120] sm:$0xff] %vm284_vm0, %v4005_v0  ;;  %323 = vst.msk [vmem:[#allocation2 + $0x128] sm:$0xff] %vm284_vm0, %v4005_v0 }
  0x19   : > { %325 = vst.msk [vmem:[#allocation2 + $0x138] sm:$0xff] %vm284_vm0, %v4005_v0  ;;  %326 = vst.msk [vmem:[#allocation2 + $0x140] sm:$0xff] %vm284_vm0, %v4005_v0 }
  0x1a   : > { %328 = vst.msk [vmem:[#allocation2 + $0x150] sm:$0xff] %vm284_vm0, %v4005_v0  ;;  %329 = vst.msk [vmem:[#allocation2 + $0x158] sm:$0xff] %vm284_vm0, %v4005_v0 }
  0x1b   : > { %331 = vst.msk [vmem:[#allocation2 + $0x168] sm:$0xff] %vm284_vm0, %v4005_v0  ;;  %332 = vst.msk [vmem:[#allocation2 + $0x170] sm:$0xff] %vm284_vm0, %v4005_v0 }
  0x1c   : > { %334 = vst.msk [vmem:[#allocation2 + $0x180] sm:$0xff] %vm284_vm0, %v4005_v0  ;;  %335 = vst.msk [vmem:[#allocation2 + $0x188] sm:$0xff] %vm284_vm0, %v4005_v0 }
  0x1d   : > { %337 = vst.msk [vmem:[#allocation2 + $0x198] sm:$0xff] %vm284_vm0, %v4005_v0  ;;  %338 = vst.msk [vmem:[#allocation2 + $0x1a0] sm:$0xff] %vm284_vm0, %v4005_v0 }
  0x1e   : > { %291 = vst.msk [vmem:[#allocation2 + $0x28] sm:$0x3] %vm287_vm1, %v4005_v0  ;;  %288 = vst.msk [vmem:[#allocation2 + $0x10] sm:$0x3] %vm287_vm1, %v4005_v0 }
  0x1f   : > { %294 = vst.msk [vmem:[#allocation2 + $0x40] sm:$0x3] %vm287_vm1, %v4005_v0  ;;  %297 = vst.msk [vmem:[#allocation2 + $0x58] sm:$0x3] %vm287_vm1, %v4005_v0 }
  0x20   : > { %300 = vst.msk [vmem:[#allocation2 + $0x70] sm:$0x3] %vm287_vm1, %v4005_v0  ;;  %303 = vst.msk [vmem:[#allocation2 + $0x88] sm:$0x3] %vm287_vm1, %v4005_v0 }
  0x21   : > { %306 = vst.msk [vmem:[#allocation2 + $0xa0] sm:$0x3] %vm287_vm1, %v4005_v0  ;;  %309 = vst.msk [vmem:[#allocation2 + $0xb8] sm:$0x3] %vm287_vm1, %v4005_v0 }
  0x22   : > { %312 = vst.msk [vmem:[#allocation2 + $0xd0] sm:$0x3] %vm287_vm1, %v4005_v0  ;;  %315 = vst.msk [vmem:[#allocation2 + $0xe8] sm:$0x3] %vm287_vm1, %v4005_v0 }
  0x23   : > { %318 = vst.msk [vmem:[#allocation2 + $0x100] sm:$0x3] %vm287_vm1, %v4005_v0  ;;  %321 = vst.msk [vmem:[#allocation2 + $0x118] sm:$0x3] %vm287_vm1, %v4005_v0 }
  0x24   : > { %324 = vst.msk [vmem:[#allocation2 + $0x130] sm:$0x3] %vm287_vm1, %v4005_v0  ;;  %327 = vst.msk [vmem:[#allocation2 + $0x148] sm:$0x3] %vm287_vm1, %v4005_v0 }
  0x25   : > { %330 = vst.msk [vmem:[#allocation2 + $0x160] sm:$0x3] %vm287_vm1, %v4005_v0  ;;  %333 = vst.msk [vmem:[#allocation2 + $0x178] sm:$0x3] %vm287_vm1, %v4005_v0  ;;  %v423_v5 = vld [vmem:[#allocation2 + $0x9] sm:$0xff] }
  0x26   : > { %336 = vst.msk [vmem:[#allocation2 + $0x190] sm:$0x3] %vm287_vm1, %v4005_v0  ;;  %339 = vst.msk [vmem:[#allocation2 + $0x1a8] sm:$0x3] %vm287_vm1, %v4005_v0  ;;  %v454_v6 = vpack.c.bf16 %v423_v5, %v422_v4  ;;  %v898_v46 = vld [vmem:[#allocation2 + $0xa] sm:$0xff] }
  0x27   : > { %v929_v50 = vpack.c.bf16 %v898_v46, %v897_v45  ;;  %v4193_v0 = vld [vmem:[%s5625_s1 + $0xc] sm:$0x3] }
  0x28   : > { %3634 = vmatprep.mubr.msk.bf16.mxu0 %vm284_vm0, %v454_v6 }
  0x4e   : > { %252 = vxpose.xlu0.b32.start.end [1/1] (short) %v218_v7, 128 }
  0x8d   : > { %v236_v10 = vpop.trf.xlu0 }
  0x8e   : > { %341 = vst.msk [vmem:[#allocation2 + $0x19] sm:$0xff] %vm284_vm0, %v236_v10 }
  0x91   : > { %v237_v11 = vpop.trf.xlu0 }
  0x92   : > { %342 = vst.msk [vmem:[#allocation2 + $0x21] sm:$0xff] %vm284_vm0, %v237_v11 }
  0x95   : > { %v238_v12 = vpop.trf.xlu0  ;;  %v424_v14 = vld [vmem:[#allocation2 + $0x19] sm:$0xff] }
  0x96   : > { %343 = vst.msk [vmem:[#allocation2 + $0x31] sm:$0xff] %vm284_vm0, %v238_v12  ;;  %v734_v12 = vsel %vm520_vm2, %v4123_v9, 0 }
  0x99   : > { %v239_v13 = vpop.trf.xlu0  ;;  %v425_v15 = vld [vmem:[#allocation2 + $0x21] sm:$0xff] }
  0x9a   : > { %344 = vst.msk [vmem:[#allocation2 + $0x39] sm:$0xff] %vm284_vm0, %v239_v13  ;;  %v4131_v16 = vpack.c.bf16 %v425_v15, %v424_v14  ;;  %v899_v53 = vld [vmem:[#allocation2 + $0x1a] sm:$0xff]  ;;  %v900_v54 = vld [vmem:[#allocation2 + $0x22] sm:$0xff] }
  0x9b   : > { %v4184_v61 = vpack.c.bf16 %v900_v54, %v899_v53  ;;  %v4216_v14 = vld [vmem:[%s5625_s1 + $0x6] sm:$0x3] }
  0x9c   : > { %3635 = vmatmul.mubr.msk.bf16.vlgmr.msra.gmra.mxu0 %vm284_vm0, %v4131_v16 }
  0x9d   : > { %v240_v19 = vpop.trf.xlu0  ;;  %3701 = vmatpush3.bf16.msra.mxu0 %v996_v17  ;;  %v426_v21 = vld [vmem:[#allocation2 + $0x31] sm:$0xff] }
  0x9e   : > { %345 = vst.msk [vmem:[#allocation2 + $0x49] sm:$0xff] %vm284_vm0, %v240_v19  ;;  %3945 = vmatprep.subr.msk.bf16.mxu0 %vm520_vm2, %v4137_v18 }
  0xa1   : > { %v241_v20 = vpop.trf.xlu0  ;;  %v427_v22 = vld [vmem:[#allocation2 + $0x39] sm:$0xff] }
  0xa2   : > { %346 = vst.msk [vmem:[#allocation2 + $0x51] sm:$0xff] %vm284_vm0, %v241_v20  ;;  %v4145_v23 = vpack.c.bf16 %v427_v22, %v426_v21  ;;  %v901_v55 = vld [vmem:[#allocation2 + $0x32] sm:$0xff]  ;;  %v902_v56 = vld [vmem:[#allocation2 + $0x3a] sm:$0xff] }
  0xa3   : > { %v4188_v63 = vpack.c.bf16 %v902_v56, %v901_v55 }
  0xa4   : > { %3638 = vmatprep.mubr.msk.bf16.mxu0 %vm284_vm0, %v4145_v23 }
  0xa5   : > { %v242_v24 = vpop.trf.xlu0  ;;  %v428_v26 = vld [vmem:[#allocation2 + $0x49] sm:$0xff] }
  0xa6   : > { %347 = vst.msk [vmem:[#allocation2 + $0x61] sm:$0xff] %vm284_vm0, %v242_v24 }
  0xa9   : > { %v243_v25 = vpop.trf.xlu0  ;;  %v429_v27 = vld [vmem:[#allocation2 + $0x51] sm:$0xff] }
  0xaa   : > { %348 = vst.msk [vmem:[#allocation2 + $0x69] sm:$0xff] %vm284_vm0, %v243_v25  ;;  %v4151_v28 = vpack.c.bf16 %v429_v27, %v428_v26  ;;  %v903_v2 = vld [vmem:[#allocation2 + $0x4a] sm:$0xff]  ;;  %v904_v3 = vld [vmem:[#allocation2 + $0x52] sm:$0xff] }
  0xab   : > { %v4207_v11 = vpack.c.bf16 %v904_v3, %v903_v2 }
  0xac   : > { %3639 = vmatmul.mubr.msk.bf16.gmra.mxu0 %vm284_vm0, %v4151_v28 }
  0xad   : > { %v244_v29 = vpop.trf.xlu0  ;;  %v430_v31 = vld [vmem:[#allocation2 + $0x61] sm:$0xff] }
  0xae   : > { %349 = vst.msk [vmem:[#allocation2 + $0x79] sm:$0xff] %vm284_vm0, %v244_v29 }
  0xb1   : > { %v245_v30 = vpop.trf.xlu0  ;;  %v431_v32 = vld [vmem:[#allocation2 + $0x69] sm:$0xff] }
  0xb2   : > { %350 = vst.msk [vmem:[#allocation2 + $0x81] sm:$0xff] %vm284_vm0, %v245_v30  ;;  %v4157_v33 = vpack.c.bf16 %v431_v32, %v430_v31  ;;  %v905_v4 = vld [vmem:[#allocation2 + $0x62] sm:$0xff]  ;;  %v906_v5 = vld [vmem:[#allocation2 + $0x6a] sm:$0xff] }
  0xb3   : > { %v4211_v13 = vpack.c.bf16 %v906_v5, %v905_v4 }
  0xb4   : > { %3642 = vmatprep.mubr.msk.bf16.mxu0 %vm284_vm0, %v4157_v33 }
  0xb5   : > { %v246_v34 = vpop.trf.xlu0  ;;  %v432_v36 = vld [vmem:[#allocation2 + $0x79] sm:$0xff] }
  0xb6   : > { %351 = vst.msk [vmem:[#allocation2 + $0x91] sm:$0xff] %vm284_vm0, %v246_v34 }
  0xb9   : > { %v247_v35 = vpop.trf.xlu0  ;;  %v433_v37 = vld [vmem:[#allocation2 + $0x81] sm:$0xff] }
  0xba   : > { %352 = vst.msk [vmem:[#allocation2 + $0x99] sm:$0xff] %vm284_vm0, %v247_v35  ;;  %v4163_v38 = vpack.c.bf16 %v433_v37, %v432_v36  ;;  %v907_v9 = vld [vmem:[#allocation2 + $0x7a] sm:$0xff]  ;;  %v908_v17 = vld [vmem:[#allocation2 + $0x82] sm:$0xff] }
  0xbb   : > { %v4230_v25 = vpack.c.bf16 %v908_v17, %v907_v9 }
  0xbc   : > { %3643 = vmatmul.mubr.msk.bf16.gmra.mxu0 %vm284_vm0, %v4163_v38 }
  0xbd   : > { %v248_v39 = vpop.trf.xlu0  ;;  %v434_v41 = vld [vmem:[#allocation2 + $0x91] sm:$0xff] }
  0xbe   : > { %353 = vst.msk [vmem:[#allocation2 + $0xa9] sm:$0xff] %vm284_vm0, %v248_v39 }
  0xc1   : > { %v249_v40 = vpop.trf.xlu0  ;;  %v435_v42 = vld [vmem:[#allocation2 + $0x99] sm:$0xff] }
  0xc2   : > { %354 = vst.msk [vmem:[#allocation2 + $0xb1] sm:$0xff] %vm284_vm0, %v249_v40  ;;  %v4169_v43 = vpack.c.bf16 %v435_v42, %v434_v41  ;;  %v909_v18 = vld [vmem:[#allocation2 + $0x92] sm:$0xff]  ;;  %v910_v19 = vld [vmem:[#allocation2 + $0x9a] sm:$0xff] }
  0xc3   : > { %v4232_v26 = vpack.c.bf16 %v910_v19, %v909_v18 }
  0xc4   : > { %3646 = vmatprep.mubr.msk.bf16.mxu0 %vm284_vm0, %v4169_v43 }
  0xc5   : > { %v250_v44 = vpop.trf.xlu0  ;;  %v436_v48 = vld [vmem:[#allocation2 + $0xa9] sm:$0xff] }
  0xc6   : > { %355 = vst.msk [vmem:[#allocation2 + $0xc1] sm:$0xff] %vm284_vm0, %v250_v44 }
  0xc9   : > { %v251_v47 = vpop.trf.xlu0  ;;  %v437_v49 = vld [vmem:[#allocation2 + $0xb1] sm:$0xff] }
  0xca   : > { %356 = vst.msk [vmem:[#allocation2 + $0xc9] sm:$0xff] %vm284_vm0, %v251_v47  ;;  %v4175_v51 = vpack.c.bf16 %v437_v49, %v436_v48  ;;  %v911_v29 = vld [vmem:[#allocation2 + $0xaa] sm:$0xff]  ;;  %v912_v30 = vld [vmem:[#allocation2 + $0xb2] sm:$0xff] }
  0xcb   : > { %v4244_v39 = vpack.c.bf16 %v912_v30, %v911_v29 }
  0xcc   : > { %3647 = vmatmul.mubr.msk.bf16.gmra.mxu0 %vm284_vm0, %v4175_v51 }
  0xcd   : > { %v268_v52 = vpop.trf.xlu0  ;;  %3702 = vmatprep.mubr.msk.bf16.mxu0 %vm284_vm0, %v929_v50  ;;  %v438_v58 = vld [vmem:[#allocation2 + $0xc1] sm:$0xff] }
  0xce   : > { %357 = vst.msk [vmem:[#allocation2 + $0xd9] sm:$0xff] %vm284_vm0, %v268_v52 }
  0xd1   : > { %v269_v57 = vpop.trf.xlu0  ;;  %v439_v59 = vld [vmem:[#allocation2 + $0xc9] sm:$0xff] }
  0xd2   : > { %358 = vst.msk [vmem:[#allocation2 + $0xe1] sm:$0xff] %vm284_vm0, %v269_v57  ;;  %v4182_v60 = vpack.c.bf16 %v439_v59, %v438_v58  ;;  %v913_v31 = vld [vmem:[#allocation2 + $0xc2] sm:$0xff]  ;;  %v914_v32 = vld [vmem:[#allocation2 + $0xca] sm:$0xff] }
  0xd3   : > { %v4246_v40 = vpack.c.bf16 %v914_v32, %v913_v31 }
  0xd4   : > { %3650 = vmatprep.mubr.msk.bf16.mxu1 %vm284_vm0, %v4182_v60  ;;  %3703 = vmatmul.mubr.msk.bf16.vlgmr.msra.gmra.mxu0 %vm284_vm0, %v4184_v61 }
  0xd5   : > { %3706 = vmatprep.mubr.msk.bf16.mxu0 %vm284_vm0, %v4188_v63  ;;  %v270_v1 = vpop.trf.xlu0  ;;  %3769 = vmatpush3.bf16.msra.mxu0 %v1584_v62  ;;  %v440_v7 = vld [vmem:[#allocation2 + $0xd9] sm:$0xff] }
  0xd6   : > { %359 = vst.msk [vmem:[#allocation2 + $0xf1] sm:$0xff] %vm284_vm0, %v270_v1  ;;  %3947 = vmatprep.subr.msk.bf16.mxu0 %vm520_vm2, %v4193_v0 }
  0xd9   : > { %v271_v6 = vpop.trf.xlu0  ;;  %v441_v8 = vld [vmem:[#allocation2 + $0xe1] sm:$0xff] }
  0xda   : > { %360 = vst.msk [vmem:[#allocation2 + $0xf9] sm:$0xff] %vm284_vm0, %v271_v6  ;;  %v4205_v10 = vpack.c.bf16 %v441_v8, %v440_v7  ;;  %v915_v42 = vld [vmem:[#allocation2 + $0xda] sm:$0xff]  ;;  %v916_v44 = vld [vmem:[#allocation2 + $0xe2] sm:$0xff] }
  0xdb   : > { %v4258_v52 = vpack.c.bf16 %v916_v44, %v915_v42  ;;  %v376_v42 = vld [vmem:[#allocation2 + $0x20] sm:$0xff]  ;;  %v378_v44 = vld [vmem:[#allocation2 + $0x38] sm:$0xff] }
  0xdc   : > { %3651 = vmatmul.mubr.msk.bf16.vlgmr.msra.gmra.mxu1 %vm284_vm0, %v4205_v10  ;;  %3707 = vmatmul.mubr.msk.bf16.gmra.mxu0 %vm284_vm0, %v4207_v11 }
  0xdd   : > { %3710 = vmatprep.mubr.msk.bf16.mxu0 %vm284_vm0, %v4211_v13  ;;  %v272_v15 = vpop.trf.xlu0  ;;  %3667 = vmatpush3.bf16.msra.mxu1 %v734_v12  ;;  %v442_v21 = vld [vmem:[#allocation2 + $0xf1] sm:$0xff] }
  0xde   : > { %361 = vst.msk [vmem:[#allocation2 + $0x109] sm:$0xff] %vm284_vm0, %v272_v15  ;;  %3944 = vmatprep.subr.msk.bf16.mxu1 %vm520_vm2, %v4216_v14 }
  0xe1   : > { %v273_v20 = vpop.trf.xlu0  ;;  %v443_v22 = vld [vmem:[#allocation2 + $0xf9] sm:$0xff] }
  0xe2   : > { %362 = vst.msk [vmem:[#allocation2 + $0x111] sm:$0xff] %vm284_vm0, %v273_v20  ;;  %v4228_v24 = vpack.c.bf16 %v443_v22, %v442_v21  ;;  %v917_v45 = vld [vmem:[#allocation2 + $0xf2] sm:$0xff]  ;;  %v918_v46 = vld [vmem:[#allocation2 + $0xfa] sm:$0xff] }
  0xe3   : > { %v4260_v53 = vpack.c.bf16 %v918_v46, %v917_v45  ;;  %v373_v22 = vld [vmem:[#allocation2] sm:$0xff]  ;;  %v375_v45 = vld [vmem:[#allocation2 + $0x18] sm:$0xff] }
  0xe4   : > { %3654 = vmatprep.mubr.msk.bf16.mxu1 %vm284_vm0, %v4228_v24  ;;  %3711 = vmatmul.mubr.msk.bf16.gmra.mxu0 %vm284_vm0, %v4230_v25  ;;  %v4309_v46 = vpack.c.bf16 %v376_v42, %v375_v45 }
  0xe5   : > { %3714 = vmatprep.mubr.msk.bf16.mxu0 %vm284_vm0, %v4232_v26  ;;  %v274_v27 = vpop.trf.xlu0  ;;  %v444_v35 = vld [vmem:[#allocation2 + $0x109] sm:$0xff] }
  0xe6   : > { %363 = vst.msk [vmem:[#allocation2 + $0x121] sm:$0xff] %vm284_vm0, %v274_v27  ;;  %v374_v27 = vld [vmem:[#allocation2 + $0x8] sm:$0xff] }
  0xe9   : > { %v275_v34 = vpop.trf.xlu0  ;;  %v445_v36 = vld [vmem:[#allocation2 + $0x111] sm:$0xff] }
  0xea   : > { %364 = vst.msk [vmem:[#allocation2 + $0x129] sm:$0xff] %vm284_vm0, %v275_v34  ;;  %v4242_v37 = vpack.c.bf16 %v445_v36, %v444_v35  ;;  %v919_v55 = vld [vmem:[#allocation2 + $0x10a] sm:$0xff]  ;;  %v920_v56 = vld [vmem:[#allocation2 + $0x112] sm:$0xff]  ;;  %v405_v34 = vpack.c.bf16 %v374_v27, %v373_v22 }
  0xeb   : > { %v4272_v3 = vpack.c.bf16 %v920_v56, %v919_v55  ;;  %v379_v55 = vld [vmem:[#allocation2 + $0x48] sm:$0xff] }
  0xec   : > { %3655 = vmatmul.mubr.msk.bf16.gmra.mxu1 %vm284_vm0, %v4242_v37  ;;  %3715 = vmatmul.mubr.msk.bf16.gmra.mxu0 %vm284_vm0, %v4244_v39  ;;  %v395_v27 = vld [vmem:[#allocation2 + $0x108] sm:$0xff] }
  0xed   : > { %3718 = vmatprep.mubr.msk.bf16.mxu0 %vm284_vm0, %v4246_v40  ;;  %v276_v41 = vpop.trf.xlu0  ;;  %v446_v48 = vld [vmem:[#allocation2 + $0x121] sm:$0xff] }
  0xee   : > { %365 = vst.msk [vmem:[#allocation2 + $0x139] sm:$0xff] %vm284_vm0, %v276_v41 }
  0xf1   : > { %v277_v47 = vpop.trf.xlu0  ;;  %v447_v49 = vld [vmem:[#allocation2 + $0x129] sm:$0xff] }
  0xf2   : > { %366 = vst.msk [vmem:[#allocation2 + $0x141] sm:$0xff] %vm284_vm0, %v277_v47  ;;  %v4256_v50 = vpack.c.bf16 %v447_v49, %v446_v48  ;;  %v921_v57 = vld [vmem:[#allocation2 + $0x122] sm:$0xff]  ;;  %v922_v58 = vld [vmem:[#allocation2 + $0x12a] sm:$0xff]  ;;  %v1290_v47 = vsel %vm520_vm2, %v4216_v14, 0 }
  0xf3   : > { %v4274_v4 = vpack.c.bf16 %v922_v58, %v921_v57  ;;  %v377_v48 = vld [vmem:[#allocation2 + $0x30] sm:$0xff]  ;;  %v381_v57 = vld [vmem:[#allocation2 + $0x60] sm:$0xff] }
  0xf4   : > { %3658 = vmatprep.mubr.msk.bf16.mxu1 %vm284_vm0, %v4256_v50  ;;  %3719 = vmatmul.mubr.msk.bf16.gmra.mxu0 %vm284_vm0, %v4258_v52  ;;  %v4313_v49 = vpack.c.bf16 %v378_v44, %v377_v48  ;;  %v4329_v14 = vld [vmem:[%s5625_s1 + $0x10] sm:$0x3] }
  0xf5   : > { %3722 = vmatprep.mubr.msk.bf16.mxu0 %vm284_vm0, %v4260_v53  ;;  %v278_v54 = vpop.trf.xlu0  ;;  %v448_v62 = vld [vmem:[#allocation2 + $0x139] sm:$0xff] }
  0xf6   : > { %367 = vst.msk [vmem:[#allocation2 + $0x151] sm:$0xff] %vm284_vm0, %v278_v54  ;;  %v2173_v54 = vsel %vm520_vm2, %v4193_v0, 0  ;;  %v380_v0 = vld [vmem:[#allocation2 + $0x50] sm:$0xff] }
  0xf7   : > { %v4339_v56 = vpack.c.bf16 %v380_v0, %v379_v55 }
  0xf9   : > { %v279_v59 = vpop.trf.xlu0  ;;  %v449_v1 = vld [vmem:[#allocation2 + $0x141] sm:$0xff] }
  0xfa   : > { %368 = vst.msk [vmem:[#allocation2 + $0x159] sm:$0xff] %vm284_vm0, %v279_v59  ;;  %v4270_v2 = vpack.c.bf16 %v449_v1, %v448_v62  ;;  %v923_v6 = vld [vmem:[#allocation2 + $0x13a] sm:$0xff]  ;;  %v924_v7 = vld [vmem:[#allocation2 + $0x142] sm:$0xff] }
  0xfb   : > { %v4286_v19 = vpack.c.bf16 %v924_v7, %v923_v6  ;;  %v386_v59 = vld [vmem:[#allocation2 + $0x98] sm:$0xff]  ;;  %v387_v7 = vld [vmem:[#allocation2 + $0xa8] sm:$0xff] }
  0xfc   : > { %3659 = vmatmul.mubr.msk.bf16.gmra.mxu1 %vm284_vm0, %v4270_v2  ;;  %3723 = vmatmul.mubr.msk.bf16.gmra.mxu0 %vm284_vm0, %v4272_v3  ;;  %v383_v62 = vld [vmem:[#allocation2 + $0x78] sm:$0xff] }
  0xfd   : > { %3726 = vmatprep.mubr.msk.bf16.mxu0 %vm284_vm0, %v4274_v4  ;;  %v280_v5 = vpop.trf.xlu0  ;;  %v450_v8 = vld [vmem:[#allocation2 + $0x151] sm:$0xff] }
  0xfe   : > { %369 = vst.msk [vmem:[#allocation2 + $0x169] sm:$0xff] %vm284_vm0, %v280_v5  ;;  %v385_v5 = vld [vmem:[#allocation2 + $0x90] sm:$0xff] }
  0xff   : > { %v4353_v6 = vpack.c.bf16 %v386_v59, %v385_v5  ;;  %v2105_v5 = vld [vmem:[#allocation2 + $0x1a0] sm:$0xff] }
 0x101   : > { %v281_v12 = vpop.trf.xlu0  ;;  %v451_v15 = vld [vmem:[#allocation2 + $0x159] sm:$0xff] }
 0x102   : > { %v925_v9 = vld [vmem:[#allocation2 + $0x152] sm:$0xff]  ;;  %v926_v17 = vld [vmem:[#allocation2 + $0x15a] sm:$0xff]  ;;  %370 = vst.msk [vmem:[#allocation2 + $0x171] sm:$0xff] %vm284_vm0, %v281_v12  ;;  %v4284_v18 = vpack.c.bf16 %v451_v15, %v450_v8 }
 0x103   : > { %v4288_v20 = vpack.c.bf16 %v926_v17, %v925_v9  ;;  %v389_v12 = vld [vmem:[#allocation2 + $0xc0] sm:$0xff]  ;;  %v391_v9 = vld [vmem:[#allocation2 + $0xd8] sm:$0xff] }
 0x104   : > { %3662 = vmatprep.mubr.msk.bf16.mxu1 %vm284_vm0, %v4284_v18  ;;  %3727 = vmatmul.mubr.msk.bf16.gmra.mxu0 %vm284_vm0, %v4286_v19 }
 0x105   : > { %3730 = vmatprep.mubr.msk.bf16.mxu0 %vm284_vm0, %v4288_v20  ;;  %v282_v21 = vpop.trf.xlu0  ;;  %v452_v29 = vld [vmem:[#allocation2 + $0x169] sm:$0xff] }
 0x106   : > { %371 = vst.msk [vmem:[#allocation2 + $0x181] sm:$0xff] %vm284_vm0, %v282_v21  ;;  %v393_v21 = vld [vmem:[#allocation2 + $0xf0] sm:$0xff] }
 0x109   : > { %v453_v30 = vld [vmem:[#allocation2 + $0x171] sm:$0xff]  ;;  %v283_v35 = vpop.trf.xlu0 }
 0x10a   : > { %v927_v31 = vld [vmem:[#allocation2 + $0x16a] sm:$0xff]  ;;  %v928_v32 = vld [vmem:[#allocation2 + $0x172] sm:$0xff]  ;;  %v4297_v36 = vpack.c.bf16 %v453_v30, %v452_v29  ;;  %372 = vst.msk [vmem:[#allocation2 + $0x189] sm:$0xff] %vm284_vm0, %v283_v35  ;;  %v397_v30 = vld [vmem:[#allocation2 + $0x120] sm:$0xff] }
 0x10b   : > { %v4299_v41 = vpack.c.bf16 %v928_v32, %v927_v31  ;;  %v402_v32 = vld [vmem:[#allocation2 + $0x158] sm:$0xff]  ;;  %v401_v35 = vld [vmem:[#allocation2 + $0x150] sm:$0xff] }
 0x10c   : > { %3663 = vmatmul.mubr.msk.bf16.gmra.mxu1 %vm284_vm0, %v4297_v36  ;;  %v419_v42 = vpack.c.bf16 %v402_v32, %v401_v35  ;;  %v404_v45 = vld [vmem:[#allocation2 + $0x170] sm:$0xff] }
 0x10d   : > { %3731 = vmatmul.mubr.msk.bf16.gmra.mxu0 %vm284_vm0, %v4299_v41  ;;  %3668 = vmatprep.mubr.msk.bf16.mxu1 %vm284_vm0, %v405_v34  ;;  %v399_v34 = vld [vmem:[#allocation2 + $0x138] sm:$0xff] }
 0x10e   : > { %3770 = vmatprep.mubr.msk.bf16.mxu0 %vm284_vm0, %v4131_v16  ;;  %v4324_v16 = vld [vmem:[%s5625_s1 + $0xa] sm:$0x3] }
 0x111   : > { %v1516_v44 = vld [vmem:[#allocation2 + $0x189] sm:$0xff] }
 0x114   : > { %3669 = vmatmul.mubr.msk.bf16.vlgmr.msra.gmra.mxu1 %vm284_vm0, %v4309_v46 }
 0x115   : > { %3771 = vmatmul.mubr.msk.bf16.vlgmr.msra.gmra.mxu0 %vm284_vm0, %v4145_v23  ;;  %3735 = vmatpush3.bf16.msra.mxu1 %v1290_v47  ;;  %v382_v23 = vld [vmem:[#allocation2 + $0x68] sm:$0xff] }
 0x116   : > { %3672 = vmatprep.mubr.msk.bf16.mxu1 %vm284_vm0, %v4313_v49  ;;  %3774 = vmatprep.mubr.msk.bf16.mxu0 %vm284_vm0, %v4151_v28  ;;  %v4341_v58 = vpack.c.bf16 %v382_v23, %v381_v57  ;;  %v384_v28 = vld [vmem:[#allocation2 + $0x80] sm:$0xff]  ;;  %v403_v47 = vld [vmem:[#allocation2 + $0x168] sm:$0xff] }
 0x117   : > { %3837 = vmatpush3.bf16.msra.mxu0 %v2173_v54  ;;  %3946 = vmatprep.subr.msk.bf16.mxu1 %vm520_vm2, %v4324_v16  ;;  %v4351_v1 = vpack.c.bf16 %v384_v28, %v383_v62  ;;  %v420_v48 = vpack.c.bf16 %v404_v45, %v403_v47  ;;  %v3439_v54 = vld [vmem:[%s5625_s1 + $0xe] sm:$0x3] }
 0x118   : > { %3949 = vmatprep.subr.msk.bf16.mxu0 %vm520_vm2, %v4329_v14  ;;  %v2103_v28 = vld [vmem:[#allocation2 + $0x188] sm:$0xff] }
 0x11c   : > { %3673 = vmatmul.mubr.msk.bf16.gmra.mxu1 %vm284_vm0, %v4339_v56 }
 0x11d   : > { %3775 = vmatmul.mubr.msk.bf16.gmra.mxu0 %vm284_vm0, %v4157_v33  ;;  %3676 = vmatprep.mubr.msk.bf16.mxu1 %vm284_vm0, %v4341_v58  ;;  %v388_v33 = vld [vmem:[#allocation2 + $0xb0] sm:$0xff] }
 0x11e   : > { %3778 = vmatprep.mubr.msk.bf16.mxu0 %vm284_vm0, %v4163_v38  ;;  %v390_v38 = vld [vmem:[#allocation2 + $0xc8] sm:$0xff]  ;;  %v4363_v8 = vpack.c.bf16 %v388_v33, %v387_v7 }
 0x11f   : > { %v4365_v15 = vpack.c.bf16 %v390_v38, %v389_v12 }
 0x124   : > { %3677 = vmatmul.mubr.msk.bf16.gmra.mxu1 %vm284_vm0, %v4351_v1 }
 0x125   : > { %3779 = vmatmul.mubr.msk.bf16.gmra.mxu0 %vm284_vm0, %v4169_v43  ;;  %3680 = vmatprep.mubr.msk.bf16.mxu1 %vm284_vm0, %v4353_v6  ;;  %v392_v43 = vld [vmem:[#allocation2 + $0xe0] sm:$0xff] }
 0x126   : > { %3782 = vmatprep.mubr.msk.bf16.mxu0 %vm284_vm0, %v4175_v51  ;;  %v394_v51 = vld [vmem:[#allocation2 + $0xf8] sm:$0xff]  ;;  %v414_v17 = vpack.c.bf16 %v392_v43, %v391_v9  ;;  %v2467_v43 = vsel %vm520_vm2, %v3439_v54, 0 }
 0x127   : > { %v4375_v22 = vpack.c.bf16 %v394_v51, %v393_v21 }
 0x12c   : > { %3681 = vmatmul.mubr.msk.bf16.gmra.mxu1 %vm284_vm0, %v4363_v8 }
 0x12d   : > { %3783 = vmatmul.mubr.msk.bf16.gmra.mxu0 %vm284_vm0, %v4182_v60  ;;  %3684 = vmatprep.mubr.msk.bf16.mxu1 %vm284_vm0, %v4365_v15  ;;  %v396_v60 = vld [vmem:[#allocation2 + $0x110] sm:$0xff] }
 0x12e   : > { %3786 = vmatprep.mubr.msk.bf16.mxu0 %vm284_vm0, %v4205_v10  ;;  %v398_v10 = vld [vmem:[#allocation2 + $0x128] sm:$0xff]  ;;  %v416_v29 = vpack.c.bf16 %v396_v60, %v395_v27 }
 0x12f   : > { %v417_v31 = vpack.c.bf16 %v398_v10, %v397_v30 }
 0x134   : > { %3685 = vmatmul.mubr.msk.bf16.gmra.mxu1 %vm284_vm0, %v414_v17 }
 0x135   : > { %3787 = vmatmul.mubr.msk.bf16.gmra.mxu0 %vm284_vm0, %v4228_v24  ;;  %3688 = vmatprep.mubr.msk.bf16.mxu1 %vm284_vm0, %v4375_v22  ;;  %v400_v24 = vld [vmem:[#allocation2 + $0x140] sm:$0xff] }
 0x136   : > { %3790 = vmatprep.mubr.msk.bf16.mxu0 %vm284_vm0, %v4242_v37  ;;  %v418_v37 = vpack.c.bf16 %v400_v24, %v399_v34 }
 0x13c   : > { %3689 = vmatmul.mubr.msk.bf16.gmra.mxu1 %vm284_vm0, %v416_v29 }
 0x13d   : > { %3791 = vmatmul.mubr.msk.bf16.gmra.mxu0 %vm284_vm0, %v4256_v50  ;;  %3692 = vmatprep.mubr.msk.bf16.mxu1 %vm284_vm0, %v417_v31  ;;  %v1515_v50 = vld [vmem:[#allocation2 + $0x181] sm:$0xff] }
 0x13e   : > { %3794 = vmatprep.mubr.msk.bf16.mxu0 %vm284_vm0, %v4270_v2  ;;  %v4396_v2 = vpack.c.bf16 %v1516_v44, %v1515_v50 }
 0x144   : > { %3693 = vmatmul.mubr.msk.bf16.gmra.mxu1 %vm284_vm0, %v418_v37 }
 0x145   : > { %3795 = vmatmul.mubr.msk.bf16.gmra.mxu0 %vm284_vm0, %v4284_v18  ;;  %3696 = vmatprep.mubr.msk.bf16.mxu1 %vm284_vm0, %v419_v42  ;;  %v1878_v18 = vsel %vm520_vm2, %v4324_v16, 0 }
 0x146   : > { %3798 = vmatprep.mubr.msk.bf16.mxu0 %vm284_vm0, %v4297_v36  ;;  %v2761_v36 = vsel %vm520_vm2, %v4329_v14, 0 }
 0x14c   : > { %3697 = vmatmul.mubr.msk.bf16.gmra.mxu1 %vm284_vm0, %v420_v48 }
 0x14d   : > { %3799 = vmatmul.mubr.msk.bf16.gmra.mxu0 %vm284_vm0, %v4396_v2  ;;  %3736 = vmatprep.mubr.msk.bf16.mxu1 %vm284_vm0, %v4309_v46 }
 0x14e   : > { %3838 = vmatprep.mubr.msk.bf16.mxu0 %vm284_vm0, %v4313_v49 }
 0x154   : > { %3737 = vmatmul.mubr.msk.bf16.vlgmr.msra.gmra.mxu1 %vm284_vm0, %v4313_v49 }
 0x155   : > { %3839 = vmatmul.mubr.msk.bf16.vlgmr.msra.gmra.mxu0 %vm284_vm0, %v4339_v56  ;;  %3803 = vmatpush3.bf16.msra.mxu1 %v1878_v18  ;;  %v2691_v18 = vld [vmem:[#allocation2 + $0x18a] sm:$0xff] }
 0x156   : > { %3740 = vmatprep.mubr.msk.bf16.mxu1 %vm284_vm0, %v4339_v56  ;;  %3842 = vmatprep.mubr.msk.bf16.mxu0 %vm284_vm0, %v4341_v58 }
 0x157   : > { %3905 = vmatpush3.bf16.msra.mxu0 %v2761_v36  ;;  %3948 = vmatprep.subr.msk.bf16.mxu1 %vm520_vm2, %v3439_v54 }
 0x15c   : > { %3741 = vmatmul.mubr.msk.bf16.gmra.mxu1 %vm284_vm0, %v4341_v58  ;;  %v4429_v46 = vpop.f32.mrf.mxu0  ;;  %v2102_v58 = vld [vmem:[#allocation2 + $0x180] sm:$0xff] }
 0x15d   : > { %3843 = vmatmul.mubr.msk.bf16.gmra.mxu0 %vm284_vm0, %v4351_v1  ;;  %3744 = vmatprep.mubr.msk.bf16.mxu1 %vm284_vm0, %v4351_v1  ;;  %v2120_v59 = vpack.c.bf16 %v2103_v28, %v2102_v58  ;;  %v2104_v1 = vld [vmem:[#allocation2 + $0x198] sm:$0xff]  ;;  %v2693_v28 = vld [vmem:[#allocation2 + $0x1a2] sm:$0xff] }
 0x15e   : > { %3846 = vmatprep.mubr.msk.bf16.mxu0 %vm284_vm0, %v4353_v6  ;;  %v4439_v49 = vpop.f32.mrf.mxu0  ;;  %v2121_v33 = vpack.c.bf16 %v2105_v5, %v2104_v1 }
 0x160   : > { %v4441_v16 = vpop.f32.mrf.mxu0 }
 0x162   : > { %v4449_v14 = vpop.f32.mrf.mxu0 }
 0x164   : > { %3745 = vmatmul.mubr.msk.bf16.gmra.mxu1 %vm284_vm0, %v4353_v6 }
 0x165   : > { %3847 = vmatmul.mubr.msk.bf16.gmra.mxu0 %vm284_vm0, %v4363_v8  ;;  %3748 = vmatprep.mubr.msk.bf16.mxu1 %vm284_vm0, %v4363_v8 }
 0x166   : > { %3850 = vmatprep.mubr.msk.bf16.mxu0 %vm284_vm0, %v4365_v15 }
 0x16c   : > { %3749 = vmatmul.mubr.msk.bf16.gmra.mxu1 %vm284_vm0, %v4365_v15  ;;  %v4451_v0 = vpop.f32.mrf.mxu0 }
 0x16d   : > { %3851 = vmatmul.mubr.msk.bf16.gmra.mxu0 %vm284_vm0, %v414_v17  ;;  %3752 = vmatprep.mubr.msk.bf16.mxu1 %vm284_vm0, %v414_v17 }
 0x16e   : > { %3854 = vmatprep.mubr.msk.bf16.mxu0 %vm284_vm0, %v4375_v22  ;;  %v4453_v23 = vpop.f32.mrf.mxu0 }
 0x170   : > { %v4460_v55 = vpop.f32.mrf.mxu0 }
 0x172   : > { %v4462_v56 = vpop.f32.mrf.mxu0 }
 0x174   : > { %3753 = vmatmul.mubr.msk.bf16.gmra.mxu1 %vm284_vm0, %v4375_v22 }
 0x175   : > { %3855 = vmatmul.mubr.msk.bf16.gmra.mxu0 %vm284_vm0, %v416_v29  ;;  %3756 = vmatprep.mubr.msk.bf16.mxu1 %vm284_vm0, %v416_v29 }
 0x176   : > { %3858 = vmatprep.mubr.msk.bf16.mxu0 %vm284_vm0, %v417_v31 }
 0x17c   : > { %3757 = vmatmul.mubr.msk.bf16.gmra.mxu1 %vm284_vm0, %v417_v31  ;;  %v4468_v57 = vpop.f32.mrf.mxu0 }
 0x17d   : > { %3859 = vmatmul.mubr.msk.bf16.gmra.mxu0 %vm284_vm0, %v418_v37  ;;  %3760 = vmatprep.mubr.msk.bf16.mxu1 %vm284_vm0, %v418_v37 }
 0x17e   : > { %3862 = vmatprep.mubr.msk.bf16.mxu0 %vm284_vm0, %v419_v42  ;;  %v4470_v62 = vpop.f32.mrf.mxu0 }
 0x180   : > { %v4476_v6 = vpop.f32.mrf.mxu0 }
 0x182   : > { %v4478_v38 = vpop.f32.mrf.mxu0 }
 0x184   : > { %3761 = vmatmul.mubr.msk.bf16.gmra.mxu1 %vm284_vm0, %v419_v42 }
 0x185   : > { %3863 = vmatmul.mubr.msk.bf16.gmra.mxu0 %vm284_vm0, %v420_v48  ;;  %3764 = vmatprep.mubr.msk.bf16.mxu1 %vm284_vm0, %v420_v48  ;;  %v2690_v48 = vld [vmem:[#allocation2 + $0x182] sm:$0xff] }
 0x186   : > { %3866 = vmatprep.mubr.msk.bf16.mxu0 %vm284_vm0, %v2120_v59  ;;  %v2708_v54 = vpack.c.bf16 %v2691_v18, %v2690_v48  ;;  %v2368_v18 = vld [vmem:[#allocation2 + $0x31] sm:$0xff] }
 0x18c   : > { %v4480_v7 = vpop.f32.mrf.mxu0  ;;  %3765 = vmatmul.mubr.msk.bf16.gmra.mxu1 %vm284_vm0, %v2120_v59 }
 0x18d   : > { %3867 = vmatmul.mubr.msk.bf16.gmra.mxu0 %vm284_vm0, %v2121_v33  ;;  %3804 = vmatprep.mubr.msk.bf16.mxu1 %vm284_vm0, %v4184_v61  ;;  %v2369_v33 = vld [vmem:[#allocation2 + $0x39] sm:$0xff] }
 0x18e   : > { %3906 = vmatprep.mubr.msk.bf16.mxu0 %vm284_vm0, %v4188_v63  ;;  %v4488_v8 = vpop.f32.mrf.mxu0 }
 0x190   : > { %v4490_v12 = vpop.f32.mrf.mxu0 }
 0x192   : > { %v4492_v15 = vpop.f32.mrf.mxu0 }
 0x194   : > { %v4495_v51 = vpop.f32.mrf.mxu0  ;;  %3805 = vmatmul.mubr.msk.bf16.vlgmr.msra.gmra.mxu1 %vm284_vm0, %v4188_v63 }
 0x195   : > { %3907 = vmatmul.mubr.msk.bf16.vlgmr.msra.gmra.mxu0 %vm284_vm0, %v4207_v11  ;;  %3871 = vmatpush3.bf16.msra.mxu1 %v2467_v43 }
 0x196   : > { %3808 = vmatprep.mubr.msk.bf16.mxu1 %vm284_vm0, %v4207_v11  ;;  %3910 = vmatprep.mubr.msk.bf16.mxu0 %vm284_vm0, %v4211_v13  ;;  %v4505_v61 = vpop.f32.mrf.mxu0 }
 0x198   : > { %v4507_v9 = vpop.f32.mrf.mxu0 }
 0x19a   : > { %v4509_v17 = vpop.f32.mrf.mxu0 }
 0x19c   : > { %v4511_v21 = vpop.f32.mrf.mxu0  ;;  %3809 = vmatmul.mubr.msk.bf16.gmra.mxu1 %vm284_vm0, %v4211_v13  ;;  %v4525_v22 = vpop.f32.mrf.mxu1 }
 0x19d   : > { %3911 = vmatmul.mubr.msk.bf16.gmra.mxu0 %vm284_vm0, %v4230_v25  ;;  %3812 = vmatprep.mubr.msk.bf16.mxu1 %vm284_vm0, %v4230_v25  ;;  %5630 = vst [vmem:[#allocation3_spill] sm:$0xff] %v4525_v22  ;;  %v2391_v22 = vld [vmem:[#allocation2 + $0x141] sm:$0xff] }
 0x19e   : > { %3914 = vmatprep.mubr.msk.bf16.mxu0 %vm284_vm0, %v4232_v26  ;;  %v4521_v63 = vpop.f32.mrf.mxu0  ;;  %v4539_v13 = vpop.f32.mrf.mxu1 }
 0x19f   : > { %5631 = vst [vmem:[#allocation4_spill] sm:$0xff] %v4539_v13 }
 0x1a0   : > { %v4523_v11 = vpop.f32.mrf.mxu0  ;;  %v4545_v29 = vpop.f32.mrf.mxu1 }
 0x1a1   : > { %5632 = vst [vmem:[#allocation5_spill] sm:$0xff] %v4545_v29  ;;  %v2387_v29 = vld [vmem:[#allocation2 + $0x111] sm:$0xff] }
 0x1a2   : > { %v4527_v60 = vpop.f32.mrf.mxu0 }
 0x1a4   : > { %v4529_v10 = vpop.f32.mrf.mxu0  ;;  %3813 = vmatmul.mubr.msk.bf16.gmra.mxu1 %vm284_vm0, %v4232_v26 }
 0x1a5   : > { %3915 = vmatmul.mubr.msk.bf16.gmra.mxu0 %vm284_vm0, %v4244_v39  ;;  %3816 = vmatprep.mubr.msk.bf16.mxu1 %vm284_vm0, %v4244_v39  ;;  %v4559_v39 = vpop.f32.mrf.mxu1 }
 0x1a6   : > { %3918 = vmatprep.mubr.msk.bf16.mxu0 %vm284_vm0, %v4246_v40  ;;  %v4541_v25 = vpop.f32.mrf.mxu0  ;;  %5633 = vst [vmem:[#allocation6_spill] sm:$0xff] %v4559_v39 }
 0x1a8   : > { %v4543_v27 = vpop.f32.mrf.mxu0 }
 0x1aa   : > { %v4547_v30 = vpop.f32.mrf.mxu0 }
 0x1ac   : > { %v4549_v26 = vpop.f32.mrf.mxu0  ;;  %3817 = vmatmul.mubr.msk.bf16.gmra.mxu1 %vm284_vm0, %v4246_v40  ;;  %v4563_v24 = vpop.f32.mrf.mxu1 }
 0x1ad   : > { %3919 = vmatmul.mubr.msk.bf16.gmra.mxu0 %vm284_vm0, %v4258_v52  ;;  %3820 = vmatprep.mubr.msk.bf16.mxu1 %vm284_vm0, %v4258_v52  ;;  %5635 = vst [vmem:[#allocation8_spill] sm:$0xff] %v4563_v24  ;;  %v2383_v24 = vld [vmem:[#allocation2 + $0xe1] sm:$0xff] }
 0x1ae   : > { %3922 = vmatprep.mubr.msk.bf16.mxu0 %vm284_vm0, %v4260_v53  ;;  %v4561_v31 = vpop.f32.mrf.mxu0  ;;  %v4569_v40 = vpop.f32.mrf.mxu1 }
 0x1af   : > { %5634 = vst [vmem:[#allocation7_spill] sm:$0xff] %v4561_v31  ;;  %5638 = vst [vmem:[#allocation11_spill] sm:$0xff] %v4569_v40 }
 0x1b0   : > { %v4565_v32 = vpop.f32.mrf.mxu0  ;;  %v4583_v35 = vpop.f32.mrf.mxu1 }
 0x1b1   : > { %5636 = vst [vmem:[#allocation9_spill] sm:$0xff] %v4565_v32  ;;  %5641 = vst [vmem:[#allocation14_spill] sm:$0xff] %v4583_v35  ;;  %v2379_v35 = vld [vmem:[#allocation2 + $0xb1] sm:$0xff] }
 0x1b2   : > { %v4567_v34 = vpop.f32.mrf.mxu0  ;;  %v4589_v44 = vpop.f32.mrf.mxu1 }
 0x1b3   : > { %5637 = vst [vmem:[#allocation10_spill] sm:$0xff] %v4567_v34  ;;  %5644 = vst [vmem:[#allocation17_spill] sm:$0xff] %v4589_v44 }
 0x1b4   : > { %v4571_v37 = vpop.f32.mrf.mxu0  ;;  %3821 = vmatmul.mubr.msk.bf16.gmra.mxu1 %vm284_vm0, %v4260_v53 }
 0x1b5   : > { %5639 = vst [vmem:[#allocation12_spill] sm:$0xff] %v4571_v37  ;;  %3923 = vmatmul.mubr.msk.bf16.gmra.mxu0 %vm284_vm0, %v4272_v3  ;;  %3824 = vmatprep.mubr.msk.bf16.mxu1 %vm284_vm0, %v4272_v3 }
 0x1b6   : > { %3926 = vmatprep.mubr.msk.bf16.mxu0 %vm284_vm0, %v4274_v4  ;;  %v4581_v52 = vpop.f32.mrf.mxu0 }
 0x1b7   : > { %5640 = vst [vmem:[#allocation13_spill] sm:$0xff] %v4581_v52 }
 0x1b8   : > { %v4585_v42 = vpop.f32.mrf.mxu0 }
 0x1b9   : > { %5642 = vst [vmem:[#allocation15_spill] sm:$0xff] %v4585_v42 }
 0x1ba   : > { %v4587_v50 = vpop.f32.mrf.mxu0 }
 0x1bb   : > { %5643 = vst [vmem:[#allocation16_spill] sm:$0xff] %v4587_v50 }
 0x1bc   : > { %v4591_v53 = vpop.f32.mrf.mxu0  ;;  %3825 = vmatmul.mubr.msk.bf16.gmra.mxu1 %vm284_vm0, %v4274_v4  ;;  %v4601_v3 = vpop.f32.mrf.mxu1 }
 0x1bd   : > { %5645 = vst [vmem:[#allocation18_spill] sm:$0xff] %v4591_v53  ;;  %3927 = vmatmul.mubr.msk.bf16.gmra.mxu0 %vm284_vm0, %v4286_v19  ;;  %3828 = vmatprep.mubr.msk.bf16.mxu1 %vm284_vm0, %v4286_v19  ;;  %5646 = vst [vmem:[#allocation19_spill] sm:$0xff] %v4601_v3  ;;  %v2692_v19 = vld [vmem:[#allocation2 + $0x19a] sm:$0xff] }
 0x1be   : > { %3930 = vmatprep.mubr.msk.bf16.mxu0 %vm284_vm0, %v4288_v20  ;;  %v4603_v45 = vpop.f32.mrf.mxu0  ;;  %v4607_v36 = vpop.f32.mrf.mxu1  ;;  %v2709_v43 = vpack.c.bf16 %v2693_v28, %v2692_v19  ;;  %v2371_v19 = vld [vmem:[#allocation2 + $0x51] sm:$0xff]  ;;  %v2375_v3 = vld [vmem:[#allocation2 + $0x81] sm:$0xff] }
 0x1bf   : > { %5647 = vst [vmem:[#allocation20_spill] sm:$0xff] %v4603_v45  ;;  %5649 = vst [vmem:[#allocation22_spill] sm:$0xff] %v4607_v36  ;;  %v2372_v36 = vld [vmem:[#allocation2 + $0x61] sm:$0xff] }
 0x1c0   : > { %v4605_v47 = vpop.f32.mrf.mxu0  ;;  %v4620_v59 = vpop.f32.mrf.mxu1 }
 0x1c1   : > { %5648 = vst [vmem:[#allocation21_spill] sm:$0xff] %v4605_v47  ;;  %5652 = vst [vmem:[#allocation25_spill] sm:$0xff] %v4620_v59 }
 0x1c2   : > { %v4609_v4 = vpop.f32.mrf.mxu0  ;;  %v4626_v48 = vpop.f32.mrf.mxu1 }
 0x1c3   : > { %5650 = vst [vmem:[#allocation23_spill] sm:$0xff] %v4609_v4 }
 0x1c4   : > { %v4611_v58 = vpop.f32.mrf.mxu0  ;;  %3829 = vmatmul.mubr.msk.bf16.gmra.mxu1 %vm284_vm0, %v4288_v20 }
 0x1c5   : > { %5651 = vst [vmem:[#allocation24_spill] sm:$0xff] %v4611_v58  ;;  %3931 = vmatmul.mubr.msk.bf16.gmra.mxu0 %vm284_vm0, %v4299_v41  ;;  %3832 = vmatprep.mubr.msk.bf16.mxu1 %vm284_vm0, %v4299_v41  ;;  %v2400_v58 = vpack.c.bf16 %v2369_v33, %v2368_v18  ;;  %v2373_v33 = vld [vmem:[#allocation2 + $0x69] sm:$0xff] }
 0x1c6   : > { %3934 = vmatprep.mubr.msk.bf16.mxu0 %vm284_vm0, %v2708_v54  ;;  %v4622_v1 = vpop.f32.mrf.mxu0  ;;  %v2370_v18 = vld [vmem:[#allocation2 + $0x49] sm:$0xff] }
 0x1c7   : > { %5653 = vst [vmem:[#allocation26_spill] sm:$0xff] %v4622_v1 }
 0x1c8   : > { %v4624_v5 = vpop.f32.mrf.mxu0 }
 0x1c9   : > { %5654 = vst [vmem:[#allocation27_spill] sm:$0xff] %v4624_v5 }
 0x1ca   : > { %v4628_v20 = vpop.f32.mrf.mxu0 }
 0x1cb   : > { %5655 = vst [vmem:[#allocation28_spill] sm:$0xff] %v4628_v20 }
 0x1cc   : > { %v4630_v4 = vpop.f32.mrf.mxu1  ;;  %3833 = vmatmul.mubr.msk.bf16.gmra.mxu1 %vm284_vm0, %v2708_v54  ;;  %v2401_v54 = vpack.c.bf16 %v2371_v19, %v2370_v18  ;;  %v2377_v19 = vld [vmem:[#allocation2 + $0x99] sm:$0xff] }
 0x1cd   : > { %v4632_v41 = vpop.f32.mrf.mxu0  ;;  %3935 = vmatmul.mubr.msk.bf16.gmra.mxu0 %vm284_vm0, %v2709_v43  ;;  %3872 = vmatprep.mubr.msk.bf16.mxu1 %vm284_vm0, %v2400_v58  ;;  %v2402_v43 = vpack.c.bf16 %v2373_v33, %v2372_v36  ;;  %v2374_v18 = vld [vmem:[#allocation2 + $0x79] sm:$0xff] }
 0x1ce   : > { %5656 = vst [vmem:[#allocation29_spill] sm:$0xff] %v4632_v41  ;;  %v4637_v1 = vpop.f32.mrf.mxu1 }
 0x1cf   : > { %v4639_v5 = vpop.f32.mrf.mxu0 }
 0x1d0   : > { %5657 = vst [vmem:[#allocation30_spill] sm:$0xff] %v4639_v5  ;;  %v4641_v28 = vpop.f32.mrf.mxu1 }
 0x1d1   : > { %v4643_v20 = vpop.f32.mrf.mxu0 }
 0x1d2   : > { %5658 = vst [vmem:[#allocation31_spill] sm:$0xff] %v4643_v20  ;;  %v4645_v59 = vpop.f32.mrf.mxu1 }
 0x1d3   : > { %v4647_v41 = vpop.f32.mrf.mxu0 }
 0x1d4   : > { %5659 = vst [vmem:[#allocation32_spill] sm:$0xff] %v4647_v41  ;;  %v4649_v47 = vpop.f32.mrf.mxu1  ;;  %3873 = vmatmul.mubr.msk.bf16.vlgmr.msra.gmra.mxu1 %vm284_vm0, %v2401_v54  ;;  %v2376_v41 = vld [vmem:[#allocation2 + $0x91] sm:$0xff] }
 0x1d5   : > { %v4651_v58 = vpop.f32.mrf.mxu0  ;;  %3876 = vmatprep.mubr.msk.bf16.mxu1 %vm284_vm0, %v2402_v43  ;;  %v2404_v54 = vpack.c.bf16 %v2377_v19, %v2376_v41 }
 0x1d6   : > { %5660 = vst [vmem:[#allocation33_spill] sm:$0xff] %v4651_v58  ;;  %v4655_v5 = vpop.f32.mrf.mxu1  ;;  %v2403_v58 = vpack.c.bf16 %v2375_v3, %v2374_v18  ;;  %v2381_v3 = vld [vmem:[#allocation2 + $0xc9] sm:$0xff] }
 0x1d7   : > { %v4657_v20 = vpop.f32.mrf.mxu0  ;;  %v2378_v18 = vld [vmem:[#allocation2 + $0xa9] sm:$0xff] }
 0x1d8   : > { %5661 = vst [vmem:[#allocation34_spill] sm:$0xff] %v4657_v20  ;;  %v4659_v45 = vpop.f32.mrf.mxu1 }
 0x1d9   : > { %v4661_v44 = vpop.f32.mrf.mxu0 }
 0x1da   : > { %5662 = vst [vmem:[#allocation35_spill] sm:$0xff] %v4661_v44  ;;  %v4663_v36 = vpop.f32.mrf.mxu1 }
 0x1db   : > { %v4665_v33 = vpop.f32.mrf.mxu0 }
 0x1dc   : > { %5663 = vst [vmem:[#allocation36_spill] sm:$0xff] %v4665_v33  ;;  %v4667_v53 = vpop.f32.mrf.mxu1  ;;  %3877 = vmatmul.mubr.msk.bf16.gmra.mxu1 %vm284_vm0, %v2403_v58  ;;  %v2405_v33 = vpack.c.bf16 %v2379_v35, %v2378_v18  ;;  %v2385_v35 = vld [vmem:[#allocation2 + $0xf9] sm:$0xff] }
 0x1dd   : > { %v4669_v43 = vpop.f32.mrf.mxu0  ;;  %3880 = vmatprep.mubr.msk.bf16.mxu1 %vm284_vm0, %v2404_v54  ;;  %v2382_v18 = vld [vmem:[#allocation2 + $0xd9] sm:$0xff] }
 0x1de   : > { %5664 = vst [vmem:[#allocation37_spill] sm:$0xff] %v4669_v43  ;;  %v4673_v20 = vpop.f32.mrf.mxu1  ;;  %v2380_v43 = vld [vmem:[#allocation2 + $0xc1] sm:$0xff] }
 0x1df   : > { %v4675_v44 = vpop.f32.mrf.mxu0  ;;  %v2406_v58 = vpack.c.bf16 %v2381_v3, %v2380_v43 }
 0x1e0   : > { %5665 = vst [vmem:[#allocation38_spill] sm:$0xff] %v4675_v44  ;;  %v4677_v50 = vpop.f32.mrf.mxu1 }
 0x1e1   : > { %v4679_v40 = vpop.f32.mrf.mxu0 }
 0x1e2   : > { %5666 = vst [vmem:[#allocation39_spill] sm:$0xff] %v4679_v40  ;;  %v4681_v41 = vpop.f32.mrf.mxu1 }
 0x1e3   : > { %v4683_v19 = vpop.f32.mrf.mxu0 }
 0x1e4   : > { %5667 = vst [vmem:[#allocation40_spill] sm:$0xff] %v4683_v19  ;;  %v4685_v42 = vpop.f32.mrf.mxu1  ;;  %3881 = vmatmul.mubr.msk.bf16.gmra.mxu1 %vm284_vm0, %v2405_v33  ;;  %v2407_v19 = vpack.c.bf16 %v2383_v24, %v2382_v18  ;;  %v2389_v24 = vld [vmem:[#allocation2 + $0x129] sm:$0xff] }
 0x1e5   : > { %v4687_v54 = vpop.f32.mrf.mxu0  ;;  %3884 = vmatprep.mubr.msk.bf16.mxu1 %vm284_vm0, %v2406_v58  ;;  %v2386_v18 = vld [vmem:[#allocation2 + $0x109] sm:$0xff] }
 0x1e6   : > { %5668 = vst [vmem:[#allocation41_spill] sm:$0xff] %v4687_v54  ;;  %v4691_v44 = vpop.f32.mrf.mxu1  ;;  %v2384_v54 = vld [vmem:[#allocation2 + $0xf1] sm:$0xff] }
 0x1e7   : > { %v4693_v40 = vpop.f32.mrf.mxu0  ;;  %v2408_v33 = vpack.c.bf16 %v2385_v35, %v2384_v54 }
 0x1e8   : > { %5669 = vst [vmem:[#allocation42_spill] sm:$0xff] %v4693_v40  ;;  %v4695_v52 = vpop.f32.mrf.mxu1 }
 0x1e9   : > { %v4697_v39 = vpop.f32.mrf.mxu0 }
 0x1ea   : > { %5670 = vst [vmem:[#allocation43_spill] sm:$0xff] %v4697_v39  ;;  %v4699_v43 = vpop.f32.mrf.mxu1 }
 0x1eb   : > { %v4701_v3 = vpop.f32.mrf.mxu0 }
 0x1ec   : > { %5671 = vst [vmem:[#allocation44_spill] sm:$0xff] %v4701_v3  ;;  %v4703_v37 = vpop.f32.mrf.mxu1  ;;  %3885 = vmatmul.mubr.msk.bf16.gmra.mxu1 %vm284_vm0, %v2407_v19  ;;  %v2409_v3 = vpack.c.bf16 %v2387_v29, %v2386_v18  ;;  %v2393_v29 = vld [vmem:[#allocation2 + $0x159] sm:$0xff] }
 0x1ed   : > { %v4705_v58 = vpop.f32.mrf.mxu0  ;;  %3888 = vmatprep.mubr.msk.bf16.mxu1 %vm284_vm0, %v2408_v33  ;;  %v2390_v18 = vld [vmem:[#allocation2 + $0x139] sm:$0xff] }
 0x1ee   : > { %5672 = vst [vmem:[#allocation45_spill] sm:$0xff] %v4705_v58  ;;  %v4709_v40 = vpop.f32.mrf.mxu1  ;;  %v2388_v58 = vld [vmem:[#allocation2 + $0x121] sm:$0xff] }
 0x1ef   : > { %v4711_v39 = vpop.f32.mrf.mxu0  ;;  %v2410_v19 = vpack.c.bf16 %v2389_v24, %v2388_v58 }
 0x1f0   : > { %5673 = vst [vmem:[#allocation46_spill] sm:$0xff] %v4711_v39  ;;  %v4713_v34 = vpop.f32.mrf.mxu1 }
 0x1f1   : > { %v4715_v13 = vpop.f32.mrf.mxu0 }
 0x1f2   : > { %5674 = vst [vmem:[#allocation47_spill] sm:$0xff] %v4715_v13  ;;  %v4717_v54 = vpop.f32.mrf.mxu1 }
 0x1f3   : > { %5675 = vst [vmem:[#allocation48_spill] sm:$0xff] %v4717_v54  ;;  %v4719_v35 = vpop.f32.mrf.mxu0 }
 0x1f4   : > { %5676 = vst [vmem:[#allocation49_spill] sm:$0xff] %v4719_v35  ;;  %v4721_v32 = vpop.f32.mrf.mxu1  ;;  %3889 = vmatmul.mubr.msk.bf16.gmra.mxu1 %vm284_vm0, %v2409_v3  ;;  %v2411_v35 = vpack.c.bf16 %v2391_v22, %v2390_v18  ;;  %v2394_v22 = vld [vmem:[#allocation2 + $0x169] sm:$0xff] }
 0x1f5   : > { %5677 = vst [vmem:[#allocation50_spill] sm:$0xff] %v4721_v32  ;;  %v4723_v33 = vpop.f32.mrf.mxu0  ;;  %3892 = vmatprep.mubr.msk.bf16.mxu1 %vm284_vm0, %v2410_v19 }
 0x1f6   : > { %5678 = vst [vmem:[#allocation51_spill] sm:$0xff] %v4723_v33  ;;  %v4727_v39 = vpop.f32.mrf.mxu1  ;;  %v2392_v33 = vld [vmem:[#allocation2 + $0x151] sm:$0xff] }
 0x1f7   : > { %5679 = vst [vmem:[#allocation52_spill] sm:$0xff] %v4727_v39  ;;  %v4729_v13 = vpop.f32.mrf.mxu0  ;;  %v2412_v3 = vpack.c.bf16 %v2393_v29, %v2392_v33 }
 0x1f8   : > { %5680 = vst [vmem:[#allocation53_spill] sm:$0xff] %v4729_v13  ;;  %v4731_v31 = vpop.f32.mrf.mxu1 }
 0x1f9   : > { %5681 = vst [vmem:[#allocation54_spill] sm:$0xff] %v4731_v31  ;;  %v4733_v54 = vpop.f32.mrf.mxu0  ;;  %v2395_v31 = vld [vmem:[#allocation2 + $0x171] sm:$0xff] }
 0x1fa   : > { %5682 = vst [vmem:[#allocation55_spill] sm:$0xff] %v4733_v54  ;;  %v4735_v58 = vpop.f32.mrf.mxu1  ;;  %v2413_v29 = vpack.c.bf16 %v2395_v31, %v2394_v22 }
 0x1fb   : > { %5683 = vst [vmem:[#allocation56_spill] sm:$0xff] %v4735_v58  ;;  %v4737_v24 = vpop.f32.mrf.mxu0 }
 0x1fc   : > { %5684 = vst [vmem:[#allocation57_spill] sm:$0xff] %v4737_v24  ;;  %v4739_v32 = vpop.f32.mrf.mxu1  ;;  %3893 = vmatmul.mubr.msk.bf16.gmra.mxu1 %vm284_vm0, %v2411_v35 }
 0x1fd   : > { %v4741_v19 = vpop.f32.mrf.mxu0  ;;  %3896 = vmatprep.mubr.msk.bf16.mxu1 %vm284_vm0, %v2412_v3  ;;  %v2398_v3 = vld [vmem:[#allocation2 + $0x199] sm:$0xff] }
 0x1fe   : > { %5685 = vst [vmem:[#allocation58_spill] sm:$0xff] %v4741_v19  ;;  %v4745_v13 = vpop.f32.mrf.mxu1 }
 0x1ff   : > { %v4747_v54 = vpop.f32.mrf.mxu0 }
 0x200   : > { %5686 = vst [vmem:[#allocation59_spill] sm:$0xff] %v4747_v54  ;;  %v4749_v39 = vpop.f32.mrf.mxu1  ;;  %v2399_v54 = vld [vmem:[#allocation2 + $0x1a1] sm:$0xff] }
 0x201   : > { %5687 = vst [vmem:[#allocation60_spill] sm:$0xff] %v4749_v39  ;;  %v4751_v58 = vpop.f32.mrf.mxu0  ;;  %v2415_v31 = vpack.c.bf16 %v2399_v54, %v2398_v3  ;;  %v779_v54 = vadd.f32 %v4649_v47, %v4429_v46 }
 0x202   : > { %5688 = vst [vmem:[#allocation61_spill] sm:$0xff] %v4751_v58  ;;  %v4753_v18 = vpop.f32.mrf.mxu1 }
 0x203   : > { %5689 = vst [vmem:[#allocation62_spill] sm:$0xff] %v4753_v18  ;;  %v4755_v33 = vpop.f32.mrf.mxu0  ;;  %v1161_v47 = vadd.f32 %v4495_v51, %v779_v54 }
 0x204   : > { %5690 = vst [vmem:[#allocation63_spill] sm:$0xff] %v4755_v33  ;;  %v4757_v24 = vpop.f32.mrf.mxu1  ;;  %3897 = vmatmul.mubr.msk.bf16.gmra.mxu1 %vm284_vm0, %v2413_v29 }
 0x205   : > { %5691 = vst [vmem:[#allocation64_spill] sm:$0xff] %v4757_v24  ;;  %v4759_v35 = vpop.f32.mrf.mxu0  ;;  %3900 = vmatprep.mubr.msk.bf16.mxu1 %vm284_vm0, %v4396_v2 }
 0x206   : > { %5692 = vst [vmem:[#allocation65_spill] sm:$0xff] %v4759_v35  ;;  %v4764_v19 = vpop.f32.mrf.mxu1 }
 0x207   : > { %5693 = vst [vmem:[#allocation66_spill] sm:$0xff] %v4764_v19  ;;  %v4766_v58 = vpop.f32.mrf.mxu0 }
 0x208   : > { %5694 = vst [vmem:[#allocation67_spill] sm:$0xff] %v4766_v58  ;;  %v4768_v39 = vpop.f32.mrf.mxu1 }
 0x209   : > { %v4770_v18 = vpop.f32.mrf.mxu0 }
 0x20a   : > { %v869_v22 = vpop.f32.mrf.mxu1 }
 0x20b   : > { %v4772_v33 = vpop.f32.mrf.mxu0  ;;  %v4775_v35 = vadd.f32 %v869_v22, %v4626_v48  ;;  %v771_v22 = vadd.f32 %v4655_v5, %v4439_v49  ;;  %v774_v49 = vadd.f32 %v4663_v36, %v4449_v14  ;;  %v787_v14 = vadd.f32 %v4673_v20, %v4453_v23 }
 0x20c   : > { %5695 = vst [vmem:[#allocation68_spill] sm:$0xff] %v4772_v33  ;;  %v3698_v29 = vpop.f32.mrf.mxu1  ;;  %3901 = vmatmul.mubr.msk.bf16.gmra.mxu1 %vm284_vm0, %v2415_v31  ;;  %v790_v23 = vadd.f32 %v4681_v41, %v4462_v56  ;;  %v803_v56 = vadd.f32 %v4691_v44, %v4470_v62  ;;  %v806_v62 = vadd.f32 %v4699_v43, %v4478_v38 }
 0x20d   : > { %v4777_v24 = vpop.f32.mrf.mxu0  ;;  %v4781_v2 = vadd.f32 %v3698_v29, %v4630_v4  ;;  %v819_v38 = vadd.f32 %v4709_v40, %v4488_v8 }
 0x20e   : > { %v882_v58 = vpop.f32.mrf.mxu1 }
 0x20f   : > { %v4783_v19 = vpop.f32.mrf.mxu0  ;;  %v4788_v3 = vadd.f32 %v882_v58, %v4637_v1 }
 0x210   : > { %5696 = vst [vmem:[#allocation69_spill] sm:$0xff] %v4783_v19  ;;  %v3699_v33 = vpop.f32.mrf.mxu1  ;;  %v782_v19 = vadd.f32 %v4659_v45, %v4441_v16  ;;  %v795_v16 = vadd.f32 %v4667_v53, %v4451_v0  ;;  %v798_v0 = vadd.f32 %v4677_v50, %v4460_v55  ;;  %v811_v55 = vadd.f32 %v4685_v42, %v4468_v57 }
 0x211   : > { %v4790_v48 = vpop.f32.mrf.mxu0  ;;  %v4795_v31 = vadd.f32 %v3699_v33, %v4641_v28  ;;  %v1159_v28 = vadd.f32 %v4505_v61, %v771_v22  ;;  %v1160_v61 = vadd.f32 %v4509_v17, %v774_v49  ;;  %v1163_v17 = vadd.f32 %v4521_v63, %v787_v14 }
 0x212   : > { %v885_v4 = vpop.f32.mrf.mxu1  ;;  %v1162_v51 = vadd.f32 %v4507_v9, %v782_v19  ;;  %v1165_v9 = vadd.f32 %v4511_v21, %v795_v16  ;;  %v1166_v21 = vadd.f32 %v4523_v11, %v798_v0  ;;  %v1164_v63 = vadd.f32 %v4527_v60, %v790_v23 }
 0x213   : > { %v4797_v29 = vpop.f32.mrf.mxu0  ;;  %v4802_v46 = vadd.f32 %v885_v4, %v4645_v59  ;;  %v814_v57 = vadd.f32 %v4695_v52, %v4476_v6  ;;  %v1169_v11 = vadd.f32 %v4529_v10, %v811_v55  ;;  %v1167_v60 = vadd.f32 %v4541_v25, %v803_v56  ;;  %v5700_v55 = vld [vmem:[#allocation48_spill] sm:$0xff] }
 0x214   : > { %5697 = vst [vmem:[#allocation70_spill] sm:$0xff] %v4797_v29  ;;  %v3738_v1 = vpop.f32.mrf.mxu1  ;;  %v827_v6 = vadd.f32 %v4703_v37, %v4480_v7  ;;  %v1168_v25 = vadd.f32 %v4547_v30, %v806_v62  ;;  %v830_v7 = vadd.f32 %v4713_v34, %v4490_v12  ;;  %v822_v8 = vadd.f32 %v5700_v55, %v4492_v15  ;;  %v5707_v62 = vld [vmem:[#allocation4_spill] sm:$0xff] }
 0x215   : > { %v4805_v58 = vpop.f32.mrf.mxu0  ;;  %v4809_v5 = vadd.f32 %v3738_v1, %v1161_v47  ;;  %v1170_v10 = vadd.f32 %v4543_v27, %v814_v57  ;;  %v5705_v57 = vld [vmem:[#allocation9_spill] sm:$0xff]  ;;  %v5713_v55 = vld [vmem:[#allocation12_spill] sm:$0xff] }
 0x216   : > { %v1326_v33 = vpop.f32.mrf.mxu1  ;;  %v1173_v27 = vadd.f32 %v4549_v26, %v827_v6  ;;  %v1174_v26 = vadd.f32 %v5705_v57, %v830_v7  ;;  %v5709_v6 = vld [vmem:[#allocation10_spill] sm:$0xff] }
 0x217   : > { %v4812_v29 = vpop.f32.mrf.mxu0  ;;  %v4816_v45 = vadd.f32 %v1326_v33, %v1159_v28 }
 0x218   : > { %v3739_v59 = vpop.f32.mrf.mxu1 }
 0x219   : > { %v4819_v54 = vpop.f32.mrf.mxu0  ;;  %v4823_v36 = vadd.f32 %v3739_v59, %v1162_v51 }
 0x21a   : > { %v1329_v22 = vpop.f32.mrf.mxu1 }
 0x21b   : > { %v4826_v4 = vpop.f32.mrf.mxu0  ;;  %v4830_v53 = vadd.f32 %v1329_v22, %v1160_v61 }
 0x21c   : > { %v3742_v19 = vpop.f32.mrf.mxu1 }
 0x21d   : > { %v4833_v47 = vpop.f32.mrf.mxu0  ;;  %v4837_v20 = vadd.f32 %v3742_v19, %v1165_v9 }
 0x21e   : > { %v1342_v1 = vpop.f32.mrf.mxu1 }
 0x21f   : > { %v4840_v49 = vpop.f32.mrf.mxu0  ;;  %v4844_v50 = vadd.f32 %v1342_v1, %v1163_v17 }
 0x220   : > { %v3743_v28 = vpop.f32.mrf.mxu1 }
 0x221   : > { %v4847_v33 = vpop.f32.mrf.mxu0  ;;  %v4851_v41 = vadd.f32 %v3743_v28, %v1166_v21  ;;  %v5701_v21 = vld [vmem:[#allocation7_spill] sm:$0xff] }
 0x222   : > { %v1345_v16 = vpop.f32.mrf.mxu1  ;;  %v1171_v30 = vadd.f32 %v5701_v21, %v819_v38 }
 0x223   : > { %v4854_v51 = vpop.f32.mrf.mxu0  ;;  %v4858_v42 = vadd.f32 %v1345_v16, %v1164_v63  ;;  %v5703_v63 = vld [vmem:[#allocation3_spill] sm:$0xff]  ;;  %v5704_v16 = vld [vmem:[#allocation50_spill] sm:$0xff] }
 0x224   : > { %v3746_v59 = vpop.f32.mrf.mxu1  ;;  %v843_v12 = vadd.f32 %v5704_v16, %v5703_v63  ;;  %v5716_v63 = vld [vmem:[#allocation56_spill] sm:$0xff] }
 0x225   : > { %v4861_v14 = vpop.f32.mrf.mxu0  ;;  %v4865_v44 = vadd.f32 %v3746_v59, %v1169_v11 }
 0x226   : > { %v1358_v61 = vpop.f32.mrf.mxu1  ;;  %v1177_v7 = vadd.f32 %v5713_v55, %v843_v12  ;;  %v5722_v55 = vld [vmem:[#allocation11_spill] sm:$0xff] }
 0x227   : > { %v4868_v22 = vpop.f32.mrf.mxu0  ;;  %v4872_v52 = vadd.f32 %v1358_v61, %v1167_v60  ;;  %v5708_v60 = vld [vmem:[#allocation52_spill] sm:$0xff] }
 0x228   : > { %v3747_v0 = vpop.f32.mrf.mxu1  ;;  %v835_v15 = vadd.f32 %v5708_v60, %v5707_v62  ;;  %v5719_v60 = vld [vmem:[#allocation8_spill] sm:$0xff] }
 0x229   : > { %v4875_v9 = vpop.f32.mrf.mxu0  ;;  %v4879_v43 = vadd.f32 %v3747_v0, %v1170_v10  ;;  %v1172_v10 = vadd.f32 %v5709_v6, %v822_v8  ;;  %v859_v6 = vadd.f32 %v4739_v32, %v5719_v60 }
 0x22a   : > { %v1361_v19 = vpop.f32.mrf.mxu1 }
 0x22b   : > { %v4882_v23 = vpop.f32.mrf.mxu0  ;;  %v4886_v37 = vadd.f32 %v1361_v19, %v1168_v25  ;;  %v5711_v25 = vld [vmem:[#allocation5_spill] sm:$0xff]  ;;  %v5712_v19 = vld [vmem:[#allocation54_spill] sm:$0xff] }
 0x22c   : > { %5698 = vst [vmem:[#allocation71_spill] sm:$0xff] %v4882_v23  ;;  %v3750_v17 = vpop.f32.mrf.mxu1 }
 0x22d   : > { %v4889_v1 = vpop.f32.mrf.mxu0  ;;  %v4893_v40 = vadd.f32 %v3750_v17, %v1173_v27  ;;  %v846_v27 = vadd.f32 %v5712_v19, %v5711_v25 }
 0x22e   : > { %5699 = vst [vmem:[#allocation72_spill] sm:$0xff] %v4889_v1  ;;  %v1374_v28 = vpop.f32.mrf.mxu1 }
 0x22f   : > { %v4896_v56 = vpop.f32.mrf.mxu0  ;;  %v4900_v34 = vadd.f32 %v1374_v28, %v1171_v30  ;;  %v5715_v28 = vld [vmem:[#allocation6_spill] sm:$0xff] }
 0x230   : > { %5702 = vst [vmem:[#allocation48_spill] sm:$0xff] %v4896_v56  ;;  %v3751_v11 = vpop.f32.mrf.mxu1  ;;  %v838_v16 = vadd.f32 %v5716_v63, %v5715_v28  ;;  %v851_v28 = vadd.f32 %v4745_v13, %v5722_v55  ;;  %v5738_v56 = vld [vmem:[#allocation66_spill] sm:$0xff] }
 0x231   : > { %v4903_v59 = vpop.f32.mrf.mxu0  ;;  %v4907_v61 = vadd.f32 %v3751_v11, %v1174_v26  ;;  %v5717_v26 = vld [vmem:[#allocation13_spill] sm:$0xff] }
 0x232   : > { %5706 = vst [vmem:[#allocation7_spill] sm:$0xff] %v4903_v59  ;;  %v1377_v0 = vpop.f32.mrf.mxu1  ;;  %v1175_v8 = vadd.f32 %v5717_v26, %v835_v15  ;;  %v5734_v59 = vld [vmem:[#allocation64_spill] sm:$0xff] }
 0x233   : > { %v4910_v38 = vpop.f32.mrf.mxu0  ;;  %v4914_v17 = vadd.f32 %v1377_v0, %v1172_v10  ;;  %v5720_v0 = vld [vmem:[#allocation15_spill] sm:$0xff] }
 0x234   : > { %5710 = vst [vmem:[#allocation3_spill] sm:$0xff] %v4910_v38  ;;  %v3754_v21 = vpop.f32.mrf.mxu1  ;;  %v1178_v12 = vadd.f32 %v5720_v0, %v846_v27  ;;  %v5730_v38 = vld [vmem:[#allocation62_spill] sm:$0xff] }
 0x235   : > { %v4917_v30 = vpop.f32.mrf.mxu0  ;;  %v4921_v57 = vadd.f32 %v3754_v21, %v1177_v7  ;;  %v5723_v21 = vld [vmem:[#allocation16_spill] sm:$0xff] }
 0x236   : > { %5714 = vst [vmem:[#allocation50_spill] sm:$0xff] %v4917_v30  ;;  %v1390_v11 = vpop.f32.mrf.mxu1  ;;  %v1176_v15 = vadd.f32 %v5723_v21, %v838_v16  ;;  %v5726_v30 = vld [vmem:[#allocation60_spill] sm:$0xff] }
 0x237   : > { %v4924_v62 = vpop.f32.mrf.mxu0  ;;  %v4928_v10 = vadd.f32 %v1390_v11, %v1175_v8  ;;  %v5727_v11 = vld [vmem:[#allocation18_spill] sm:$0xff] }
 0x238   : > { %5718 = vst [vmem:[#allocation9_spill] sm:$0xff] %v4924_v62  ;;  %v3755_v25 = vpop.f32.mrf.mxu1  ;;  %v5725_v62 = vld [vmem:[#allocation14_spill] sm:$0xff]  ;;  %v1181_v27 = vadd.f32 %v5727_v11, %v859_v6 }
 0x239   : > { %v4931_v19 = vpop.f32.mrf.mxu0  ;;  %v4935_v7 = vadd.f32 %v3755_v25, %v1178_v12  ;;  %v862_v32 = vadd.f32 %v5726_v30, %v5725_v62  ;;  %v5731_v25 = vld [vmem:[#allocation20_spill] sm:$0xff] }
 0x23a   : > { %5721 = vst [vmem:[#allocation4_spill] sm:$0xff] %v4931_v19  ;;  %v1393_v63 = vpop.f32.mrf.mxu1  ;;  %v5729_v19 = vld [vmem:[#allocation17_spill] sm:$0xff]  ;;  %v1179_v16 = vadd.f32 %v5731_v25, %v851_v28 }
 0x23b   : > { %v4938_v26 = vpop.f32.mrf.mxu0  ;;  %v4942_v8 = vadd.f32 %v1393_v63, %v1176_v15  ;;  %v854_v13 = vadd.f32 %v5730_v38, %v5729_v19  ;;  %v5735_v15 = vld [vmem:[#allocation21_spill] sm:$0xff] }
 0x23c   : > { %5724 = vst [vmem:[#allocation52_spill] sm:$0xff] %v4938_v26  ;;  %v3758_v60 = vpop.f32.mrf.mxu1  ;;  %v5733_v26 = vld [vmem:[#allocation19_spill] sm:$0xff]  ;;  %v1182_v6 = vadd.f32 %v5735_v15, %v862_v32 }
 0x23d   : > { %v4945_v0 = vpop.f32.mrf.mxu0  ;;  %v4949_v12 = vadd.f32 %v3758_v60, %v1181_v27  ;;  %v875_v30 = vadd.f32 %v5734_v59, %v5733_v26  ;;  %v5739_v27 = vld [vmem:[#allocation23_spill] sm:$0xff] }
 0x23e   : > { %5728 = vst [vmem:[#allocation10_spill] sm:$0xff] %v4945_v0  ;;  %v1406_v55 = vpop.f32.mrf.mxu1  ;;  %v5737_v0 = vld [vmem:[#allocation22_spill] sm:$0xff]  ;;  %v1180_v28 = vadd.f32 %v5739_v27, %v854_v13  ;;  %v5746_v27 = vld [vmem:[#allocation27_spill] sm:$0xff] }
 0x23f   : > { %v4952_v21 = vpop.f32.mrf.mxu0  ;;  %v4956_v62 = vadd.f32 %v1406_v55, %v1179_v16  ;;  %v867_v38 = vadd.f32 %v5738_v56, %v5737_v0  ;;  %v5742_v16 = vld [vmem:[#allocation24_spill] sm:$0xff]  ;;  %v5744_v56 = vld [vmem:[#allocation26_spill] sm:$0xff] }
 0x240   : > { %5732 = vst [vmem:[#allocation5_spill] sm:$0xff] %v4952_v21  ;;  %v3759_v63 = vpop.f32.mrf.mxu1  ;;  %v5741_v21 = vld [vmem:[#allocation25_spill] sm:$0xff]  ;;  %v1185_v32 = vadd.f32 %v5742_v16, %v875_v30  ;;  %v5748_v30 = vld [vmem:[#allocation28_spill] sm:$0xff] }
 0x241   : > { %v4959_v11 = vpop.f32.mrf.mxu0  ;;  %v4963_v19 = vadd.f32 %v3759_v63, %v1182_v6  ;;  %v878_v59 = vadd.f32 %v4768_v39, %v5741_v21  ;;  %v1183_v0 = vadd.f32 %v5744_v56, %v867_v38  ;;  %v5750_v38 = vld [vmem:[#allocation29_spill] sm:$0xff] }
 0x242   : > { %5736 = vst [vmem:[#allocation54_spill] sm:$0xff] %v4959_v11  ;;  %v1409_v60 = vpop.f32.mrf.mxu1 }
 0x243   : > { %v4966_v25 = vpop.f32.mrf.mxu0  ;;  %v4970_v26 = vadd.f32 %v1409_v60, %v1180_v28  ;;  %v1184_v28 = vadd.f32 %v5748_v30, %v4775_v35  ;;  %v5754_v30 = vld [vmem:[#allocation31_spill] sm:$0xff] }
 0x244   : > { %5740 = vst [vmem:[#allocation12_spill] sm:$0xff] %v4966_v25  ;;  %v3762_v55 = vpop.f32.mrf.mxu1  ;;  %v1186_v25 = vadd.f32 %v5746_v27, %v878_v59 }
 0x245   : > { %v4973_v15 = vpop.f32.mrf.mxu0  ;;  %v4975_v11 = vadd.f32 %v3762_v55, %v1185_v32  ;;  %v1189_v55 = vadd.f32 %v5750_v38, %v4781_v2  ;;  %v5756_v38 = vld [vmem:[#allocation32_spill] sm:$0xff] }
 0x246   : > { %5743 = vst [vmem:[#allocation6_spill] sm:$0xff] %v4973_v15  ;;  %v1422_v6 = vpop.f32.mrf.mxu1 }
 0x247   : > { %v4978_v63 = vpop.f32.mrf.mxu0  ;;  %v4980_v13 = vadd.f32 %v1422_v6, %v1183_v0  ;;  %v5752_v6 = vld [vmem:[#allocation30_spill] sm:$0xff] }
 0x248   : > { %5745 = vst [vmem:[#allocation56_spill] sm:$0xff] %v4978_v63  ;;  %v3763_v1 = vpop.f32.mrf.mxu1  ;;  %v5768_v63 = vld [vmem:[#allocation43_spill] sm:$0xff] }
 0x249   : > { %v4983_v39 = vpop.f32.mrf.mxu0  ;;  %v4985_v21 = vadd.f32 %v3763_v1, %v1186_v25  ;;  %v1187_v1 = vadd.f32 %v5752_v6, %v4788_v3  ;;  %v5757_v3 = vld [vmem:[#allocation33_spill] sm:$0xff] }
 0x24a   : > { %5747 = vst [vmem:[#allocation13_spill] sm:$0xff] %v4983_v39  ;;  %v1425_v60 = vpop.f32.mrf.mxu1  ;;  %v1749_v6 = vadd.f32 %v5757_v3, %v4809_v5 }
 0x24b   : > { %v4989_v16 = vpop.f32.mrf.mxu0  ;;  %v4991_v32 = vadd.f32 %v1425_v60, %v1184_v28  ;;  %v1190_v28 = vadd.f32 %v5754_v30, %v4795_v31  ;;  %v5759_v31 = vld [vmem:[#allocation34_spill] sm:$0xff] }
 0x24c   : > { %5749 = vst [vmem:[#allocation8_spill] sm:$0xff] %v4989_v16  ;;  %v3766_v56 = vpop.f32.mrf.mxu1  ;;  %v1747_v30 = vadd.f32 %v5759_v31, %v4816_v45 }
 0x24d   : > { %v4995_v0 = vpop.f32.mrf.mxu0  ;;  %v4997_v59 = vadd.f32 %v3766_v56, %v1189_v55  ;;  %v1188_v55 = vadd.f32 %v5756_v38, %v4802_v46 }
 0x24e   : > { %5751 = vst [vmem:[#allocation15_spill] sm:$0xff] %v4995_v0  ;;  %v1438_v25 = vpop.f32.mrf.mxu1 }
 0x24f   : > { %v5001_v27 = vpop.f32.mrf.mxu0  ;;  %v5003_v35 = vadd.f32 %v1438_v25, %v1187_v1 }
 0x250   : > { %5753 = vst [vmem:[#allocation11_spill] sm:$0xff] %v5001_v27  ;;  %v3767_v60 = vpop.f32.mrf.mxu1 }
 0x251   : > { %v5007_v16 = vadd.f32 %v3767_v60, %v1190_v28  ;;  %v5009_v2 = vpop.f32.mrf.mxu0 }
 0x252   : > { %5755 = vst [vmem:[#allocation16_spill] sm:$0xff] %v5009_v2  ;;  %v1441_v56 = vpop.f32.mrf.mxu1  ;;  %v5760_v2 = vld [vmem:[#allocation35_spill] sm:$0xff] }
 0x253   : > { %v5013_v0 = vadd.f32 %v1441_v56, %v1188_v55  ;;  %v5017_v1 = vpop.f32.mrf.mxu0  ;;  %v1750_v39 = vadd.f32 %v5760_v2, %v4823_v36  ;;  %v5764_v36 = vld [vmem:[#allocation39_spill] sm:$0xff] }
 0x254   : > { %v3806_v27 = vpop.f32.mrf.mxu1  ;;  %5758 = vst [vmem:[#allocation14_spill] sm:$0xff] %v5017_v1  ;;  %v1754_v2 = vadd.f32 %v5764_v36, %v4851_v41  ;;  %v1758_v41 = vadd.f32 %v5768_v63, %v4879_v43 }
 0x255   : > { %v5019_v25 = vadd.f32 %v3806_v27, %v1749_v6  ;;  %v5025_v38 = vpop.f32.mrf.mxu0  ;;  %v5762_v27 = vld [vmem:[#allocation37_spill] sm:$0xff] }
 0x256   : > { %v1914_v28 = vpop.f32.mrf.mxu1  ;;  %5761 = vst [vmem:[#allocation60_spill] sm:$0xff] %v5025_v38  ;;  %v1753_v3 = vadd.f32 %v5762_v27, %v4837_v20 }
 0x257   : > { %v2041_v60 = vadd.f32 %v1914_v28, %v1747_v30  ;;  %v5036_v45 = vpop.f32.mrf.mxu0 }
 0x258   : > { %v3807_v46 = vpop.f32.mrf.mxu1  ;;  %5763 = vst [vmem:[#allocation18_spill] sm:$0xff] %v5036_v45 }
 0x259   : > { %v5027_v55 = vadd.f32 %v3807_v46, %v1750_v39  ;;  %v5030_v5 = vadd.f32 %v4812_v29, %v2041_v60  ;;  %v5044_v28 = vpop.f32.mrf.mxu0  ;;  %v5766_v46 = vld [vmem:[#allocation41_spill] sm:$0xff] }
 0x25a   : > { %v5032_v56 = vpop.f32.mrf.mxu1  ;;  %5765 = vst [vmem:[#allocation17_spill] sm:$0xff] %v5044_v28  ;;  %v1757_v20 = vadd.f32 %v5766_v46, %v4865_v44  ;;  %v5770_v28 = vld [vmem:[#allocation45_spill] sm:$0xff] }
 0x25b   : > { %v5052_v1 = vpop.f32.mrf.mxu0  ;;  %v1761_v44 = vadd.f32 %v5770_v28, %v4893_v40 }
 0x25c   : > { %v3810_v6 = vpop.f32.mrf.mxu1  ;;  %5767 = vst [vmem:[#allocation62_spill] sm:$0xff] %v5052_v1  ;;  %v5773_v1 = vld [vmem:[#allocation47_spill] sm:$0xff] }
 0x25d   : > { %v5038_v31 = vadd.f32 %v3810_v6, %v1753_v3  ;;  %v5060_v15 = vpop.f32.mrf.mxu0  ;;  %v1762_v43 = vadd.f32 %v5773_v1, %v4907_v61 }
 0x25e   : > { %v5040_v30 = vpop.f32.mrf.mxu1  ;;  %5769 = vst [vmem:[#allocation20_spill] sm:$0xff] %v5060_v15  ;;  %v5776_v15 = vld [vmem:[#allocation51_spill] sm:$0xff] }
 0x25f   : > { %v5068_v38 = vpop.f32.mrf.mxu0  ;;  %v1765_v40 = vadd.f32 %v5776_v15, %v4921_v57 }
 0x260   : > { %v3811_v39 = vpop.f32.mrf.mxu1  ;;  %5771 = vst [vmem:[#allocation19_spill] sm:$0xff] %v5068_v38  ;;  %v5779_v38 = vld [vmem:[#allocation55_spill] sm:$0xff] }
 0x261   : > { %v5046_v29 = vadd.f32 %v3811_v39, %v1754_v2  ;;  %v5076_v23 = vpop.f32.mrf.mxu0  ;;  %v1766_v61 = vadd.f32 %v5779_v38, %v4935_v7 }
 0x262   : > { %v5048_v60 = vpop.f32.mrf.mxu1  ;;  %5774 = vst [vmem:[#allocation21_spill] sm:$0xff] %v5076_v23  ;;  %v5782_v23 = vld [vmem:[#allocation58_spill] sm:$0xff] }
 0x263   : > { %v5084_v45 = vpop.f32.mrf.mxu0  ;;  %v1769_v57 = vadd.f32 %v5782_v23, %v4949_v12 }
 0x264   : > { %v3814_v27 = vpop.f32.mrf.mxu1  ;;  %5777 = vst [vmem:[#allocation66_spill] sm:$0xff] %v5084_v45  ;;  %v5784_v45 = vld [vmem:[#allocation61_spill] sm:$0xff] }
 0x265   : > { %v5054_v3 = vadd.f32 %v3814_v27, %v1757_v20  ;;  %v1770_v7 = vadd.f32 %v5784_v45, %v4963_v19  ;;  %v1774_v19 = vadd.f32 %v4770_v18, %v4985_v21  ;;  %v1778_v18 = vadd.f32 %v4790_v48, %v5007_v16  ;;  %v5793_v21 = vld [vmem:[#allocation36_spill] sm:$0xff] }
 0x266   : > { %v5056_v6 = vpop.f32.mrf.mxu1 }
 0x268   : > { %v3815_v36 = vpop.f32.mrf.mxu1 }
 0x269   : > { %v5062_v2 = vadd.f32 %v3815_v36, %v1758_v41 }
 0x26a   : > { %v5064_v39 = vpop.f32.mrf.mxu1 }
 0x26c   : > { %v3818_v46 = vpop.f32.mrf.mxu1 }
 0x26d   : > { %v5070_v20 = vadd.f32 %v3818_v46, %v1761_v44 }
 0x26e   : > { %v5072_v27 = vpop.f32.mrf.mxu1 }
 0x26f   : > { %5772 = vst [vmem:[#allocation64_spill] sm:$0xff] %v5070_v20  ;;  %v5092_v20 = vpop.f32.mrf.mxu0 }
 0x270   : > { %v3819_v63 = vpop.f32.mrf.mxu1  ;;  %5780 = vst [vmem:[#allocation25_spill] sm:$0xff] %v5092_v20  ;;  %v5786_v20 = vld [vmem:[#allocation65_spill] sm:$0xff] }
 0x271   : > { %v5078_v41 = vadd.f32 %v3819_v63, %v1762_v43  ;;  %v1773_v23 = vadd.f32 %v5786_v20, %v4975_v11  ;;  %v1777_v11 = vadd.f32 %v4777_v24, %v4997_v59  ;;  %v5796_v59 = vld [vmem:[#allocation42_spill] sm:$0xff] }
 0x272   : > { %v5080_v36 = vpop.f32.mrf.mxu1 }
 0x273   : > { %5775 = vst [vmem:[#allocation22_spill] sm:$0xff] %v5078_v41  ;;  %v5100_v41 = vpop.f32.mrf.mxu0 }
 0x274   : > { %v3822_v28 = vpop.f32.mrf.mxu1  ;;  %5783 = vst [vmem:[#allocation26_spill] sm:$0xff] %v5100_v41 }
 0x275   : > { %v5086_v44 = vadd.f32 %v3822_v28, %v1765_v40 }
 0x276   : > { %v5088_v46 = vpop.f32.mrf.mxu1 }
 0x277   : > { %5778 = vst [vmem:[#allocation23_spill] sm:$0xff] %v5086_v44  ;;  %v5108_v44 = vpop.f32.mrf.mxu0 }
 0x278   : > { %v3823_v1 = vpop.f32.mrf.mxu1  ;;  %5785 = vst [vmem:[#allocation27_spill] sm:$0xff] %v5108_v44 }
 0x279   : > { %v5094_v43 = vadd.f32 %v3823_v1, %v1766_v61 }
 0x27a   : > { %v5096_v63 = vpop.f32.mrf.mxu1 }
 0x27b   : > { %5781 = vst [vmem:[#allocation24_spill] sm:$0xff] %v5094_v43  ;;  %v5116_v43 = vpop.f32.mrf.mxu0 }
 0x27c   : > { %v3826_v15 = vpop.f32.mrf.mxu1  ;;  %5787 = vst [vmem:[#allocation28_spill] sm:$0xff] %v5116_v43 }
 0x27d   : > { %v5102_v40 = vadd.f32 %v3826_v15, %v1769_v57  ;;  %v5124_v41 = vpop.f32.mrf.mxu0 }
 0x27e   : > { %v5104_v28 = vpop.f32.mrf.mxu1  ;;  %5788 = vst [vmem:[#allocation29_spill] sm:$0xff] %v5124_v41  ;;  %v1748_v41 = vadd.f32 %v5793_v21, %v4830_v53  ;;  %v5799_v21 = vld [vmem:[#allocation49_spill] sm:$0xff] }
 0x27f   : > { %v5132_v44 = vpop.f32.mrf.mxu0 }
 0x280   : > { %v3827_v38 = vpop.f32.mrf.mxu1  ;;  %5790 = vst [vmem:[#allocation31_spill] sm:$0xff] %v5132_v44  ;;  %v1755_v44 = vadd.f32 %v5796_v59, %v4872_v52  ;;  %v2042_v48 = vadd.f32 %v5032_v56, %v1748_v41  ;;  %v5800_v52 = vld [vmem:[#allocation53_spill] sm:$0xff]  ;;  %v5803_v56 = vld [vmem:[#allocation63_spill] sm:$0xff] }
 0x281   : > { %v5110_v61 = vadd.f32 %v3827_v38, %v1770_v7 }
 0x282   : > { %v5112_v1 = vpop.f32.mrf.mxu1 }
 0x284   : > { %v3830_v12 = vpop.f32.mrf.mxu1 }
 0x285   : > { %v5118_v57 = vadd.f32 %v3830_v12, %v1773_v23 }
 0x286   : > { %v5120_v15 = vpop.f32.mrf.mxu1 }
 0x288   : > { %v3831_v45 = vpop.f32.mrf.mxu1 }
 0x289   : > { %v5126_v7 = vadd.f32 %v3831_v45, %v1774_v19  ;;  %v5794_v19 = vld [vmem:[#allocation38_spill] sm:$0xff] }
 0x28a   : > { %v5128_v38 = vpop.f32.mrf.mxu1  ;;  %v1751_v45 = vadd.f32 %v5794_v19, %v4844_v50  ;;  %v5798_v50 = vld [vmem:[#allocation46_spill] sm:$0xff]  ;;  %v1763_v19 = vadd.f32 %v5800_v52, %v4928_v10  ;;  %v5806_v10 = vld [vmem:[#allocation69_spill] sm:$0xff] }
 0x28b   : > { %5789 = vst [vmem:[#allocation30_spill] sm:$0xff] %v5126_v7  ;;  %v5795_v7 = vld [vmem:[#allocation40_spill] sm:$0xff]  ;;  %v1759_v16 = vadd.f32 %v5798_v50, %v4900_v34  ;;  %v5804_v34 = vld [vmem:[#allocation67_spill] sm:$0xff]  ;;  %v5179_v50 = vadd.f32 %v5806_v10, %v5003_v35  ;;  %v2337_v35 = vadd.f32 %v4826_v4, %v2042_v48 }
 0x28c   : > { %v3834_v20 = vpop.f32.mrf.mxu1  ;;  %v1752_v24 = vadd.f32 %v5795_v7, %v4858_v42  ;;  %v2045_v53 = vadd.f32 %v5040_v30, %v1751_v45  ;;  %v1760_v42 = vadd.f32 %v5799_v21, %v4914_v17  ;;  %v1768_v30 = vadd.f32 %v5803_v56, %v4970_v26  ;;  %v5805_v17 = vld [vmem:[#allocation68_spill] sm:$0xff]  ;;  %v5807_v26 = vld [vmem:[#allocation70_spill] sm:$0xff] }
 0x28d   : > { %v5134_v23 = vadd.f32 %v3834_v20, %v1777_v11  ;;  %v5797_v11 = vld [vmem:[#allocation44_spill] sm:$0xff]  ;;  %v1771_v45 = vadd.f32 %v5804_v34, %v4980_v13  ;;  %v2049_v21 = vadd.f32 %v5056_v6, %v1755_v44  ;;  %v5186_v52 = vadd.f32 %v5807_v26, %v5013_v0  ;;  %v5818_v34 = vld [vmem:[#allocation50_spill] sm:$0xff] }
 0x28e   : > { %v5136_v12 = vpop.f32.mrf.mxu1  ;;  %v1756_v20 = vadd.f32 %v5797_v11, %v4886_v37  ;;  %v5801_v37 = vld [vmem:[#allocation57_spill] sm:$0xff]  ;;  %v2046_v41 = vadd.f32 %v5048_v60, %v1752_v24  ;;  %v5175_v11 = vadd.f32 %v5805_v17, %v4991_v32  ;;  %v2338_v13 = vadd.f32 %v4805_v58, %v5019_v25 }
 0x28f   : > { %5791 = vst [vmem:[#allocation32_spill] sm:$0xff] %v5134_v23  ;;  %5792 = vst [vmem:[#allocation33_spill] sm:$0xff] %v5136_v12  ;;  %v5150_v23 = vpop.f32.mrf.mxu0  ;;  %v1764_v59 = vadd.f32 %v5801_v37, %v4942_v8  ;;  %v2339_v32 = vadd.f32 %v4819_v54, %v5027_v55  ;;  %v2342_v6 = vadd.f32 %v4833_v47, %v5038_v31 }
 0x290   : > { %v3835_v43 = vpop.f32.mrf.mxu1  ;;  %v2050_v60 = vadd.f32 %v5064_v39, %v1756_v20  ;;  %v2340_v44 = vadd.f32 %v4840_v49, %v2045_v53  ;;  %v2053_v37 = vadd.f32 %v5072_v27, %v1759_v16  ;;  %v2054_v0 = vadd.f32 %v5080_v36, %v1760_v42  ;;  %v5811_v20 = vld [vmem:[#allocation72_spill] sm:$0xff]  ;;  %v5813_v53 = vld [vmem:[#allocation22_spill] sm:$0xff]  ;;  %v5815_v16 = vld [vmem:[#allocation3_spill] sm:$0xff] }
 0x291   : > { %v5152_v12 = vadd.f32 %v3835_v43, %v1778_v18  ;;  %v5802_v43 = vld [vmem:[#allocation59_spill] sm:$0xff]  ;;  %v2343_v58 = vadd.f32 %v4847_v33, %v5046_v29  ;;  %v2057_v54 = vadd.f32 %v5088_v46, %v1763_v19  ;;  %v2341_v4 = vadd.f32 %v4854_v51, %v2046_v41  ;;  %v5808_v29 = vld [vmem:[#allocation18_spill] sm:$0xff]  ;;  %v5810_v46 = vld [vmem:[#allocation64_spill] sm:$0xff] }
 0x292   : > { %v5160_v7 = vpop.f32.mrf.mxu1  ;;  %v1767_v18 = vadd.f32 %v5802_v43, %v4956_v62  ;;  %v5182_v62 = vpop.f32.mrf.mxu0  ;;  %v5206_v47 = vadd.f32 %v4861_v14, %v5054_v3  ;;  %v2058_v31 = vadd.f32 %v5096_v63, %v1764_v59  ;;  %v5217_v33 = vadd.f32 %v4875_v9, %v5062_v2  ;;  %v5809_v14 = vld [vmem:[#allocation71_spill] sm:$0xff]  ;;  %v5816_v19 = vld [vmem:[#allocation60_spill] sm:$0xff] }
 0x293   : > { %v5223_v3 = vadd.f32 %v5809_v14, %v2050_v60  ;;  %v5227_v63 = vadd.f32 %v5811_v20, %v5810_v46  ;;  %v5814_v9 = vld [vmem:[#allocation7_spill] sm:$0xff]  ;;  %v5238_v42 = vadd.f32 %v5815_v16, %v2054_v0  ;;  %v5823_v60 = vld [vmem:[#allocation10_spill] sm:$0xff] }
 0x294   : > { %v3874_v8 = vpop.f32.mrf.mxu1  ;;  %v5208_v49 = vpop.f32.mrf.mxu0  ;;  %v2061_v39 = vadd.f32 %v5104_v28, %v1767_v18  ;;  %v2062_v28 = vadd.f32 %v5112_v1, %v1768_v30  ;;  %v5235_v2 = vadd.f32 %v5814_v9, %v5813_v53  ;;  %v5817_v41 = vld [vmem:[#allocation23_spill] sm:$0xff]  ;;  %v5819_v1 = vld [vmem:[#allocation9_spill] sm:$0xff] }
 0x295   : > { %v2632_v25 = vadd.f32 %v3874_v8, %v2338_v13  ;;  %v5245_v17 = vadd.f32 %v5818_v34, %v5817_v41  ;;  %v5248_v30 = vadd.f32 %v5819_v1, %v2057_v54  ;;  %v5820_v8 = vld [vmem:[#allocation24_spill] sm:$0xff] }
 0x296   : > { %v2503_v24 = vpop.f32.mrf.mxu1  ;;  %v5250_v10 = vpop.f32.mrf.mxu0  ;;  %v5822_v13 = vld [vmem:[#allocation52_spill] sm:$0xff] }
 0x297   : > { %v2630_v43 = vadd.f32 %v2503_v24, %v5030_v5  ;;  %v5213_v5 = vadd.f32 %v4868_v22, %v2049_v21  ;;  %v5812_v22 = vld [vmem:[#allocation48_spill] sm:$0xff]  ;;  %v5241_v59 = vadd.f32 %v5816_v19, %v2632_v25  ;;  %v5261_v24 = vadd.f32 %v5823_v60, %v5102_v40  ;;  %v5826_v25 = vld [vmem:[#allocation62_spill] sm:$0xff] }
 0x298   : > { %v3875_v55 = vpop.f32.mrf.mxu1  ;;  %v5231_v48 = vadd.f32 %v5812_v22, %v2053_v37  ;;  %v5821_v21 = vld [vmem:[#allocation4_spill] sm:$0xff]  ;;  %v2065_v40 = vadd.f32 %v5120_v15, %v1771_v45  ;;  %v5290_v16 = vpop.f32.mrf.mxu0 }
 0x299   : > { %v5220_v27 = vadd.f32 %v5808_v29, %v2630_v43  ;;  %v2633_v51 = vadd.f32 %v3875_v55, %v2339_v32  ;;  %v5254_v26 = vadd.f32 %v5821_v21, %v5820_v8  ;;  %v5257_v32 = vadd.f32 %v5822_v13, %v2058_v31  ;;  %v5825_v43 = vld [vmem:[#allocation17_spill] sm:$0xff]  ;;  %v5827_v31 = vld [vmem:[#allocation54_spill] sm:$0xff]  ;;  %v5831_v13 = vld [vmem:[#allocation20_spill] sm:$0xff] }
 0x29a   : > { %v2506_v36 = vpop.f32.mrf.mxu1  ;;  %v3107_v22 = vmul.f32 %v5241_v59, %v5241_v59  ;;  %v3037_v15 = vsel %vm284_vm0, %v5241_v59, 0.0 }
 0x29b   : > { %v2631_v18 = vadd.f32 %v2506_v36, %v2337_v35  ;;  %v5824_v35 = vld [vmem:[#allocation5_spill] sm:$0xff]  ;;  %v3105_v0 = vmul.f32 %v5220_v27, %v5220_v27  ;;  %v5269_v54 = vadd.f32 %v5825_v43, %v2633_v51  ;;  %v5276_v36 = vadd.f32 %v5827_v31, %v5110_v61 }
 0x29c   : > { %v3878_v56 = vpop.f32.mrf.mxu1  ;;  %v5264_v37 = vadd.f32 %v5824_v35, %v2061_v39  ;;  %v5828_v39 = vld [vmem:[#allocation12_spill] sm:$0xff]  ;;  %v3034_v51 = vsel %vm284_vm0, %v5220_v27, 0.0 }
 0x29d   : > { %v5272_v55 = vadd.f32 %v5826_v25, %v2631_v18  ;;  %v2636_v14 = vadd.f32 %v3878_v56, %v2342_v6  ;;  %v5280_v20 = vadd.f32 %v5828_v39, %v2062_v28  ;;  %v5829_v6 = vld [vmem:[#allocation19_spill] sm:$0xff]  ;;  %v5830_v28 = vld [vmem:[#allocation6_spill] sm:$0xff]  ;;  %v3137_v18 = vsel %vm284_vm0, %v3105_v0, 0.0  ;;  %v5832_v35 = vld [vmem:[#allocation56_spill] sm:$0xff] }
 0x29e   : > { %v2519_v29 = vpop.f32.mrf.mxu1  ;;  %v5299_v19 = vadd.f32 %v5830_v28, %v5118_v57  ;;  %v3108_v56 = vmul.f32 %v5269_v54, %v5269_v54  ;;  %v5309_v43 = vadd.f32 %v5832_v35, %v2065_v40  ;;  %v3140_v57 = vsel %vm284_vm0, %v3107_v22, 0.0  ;;  %v5834_v40 = vld [vmem:[#allocation13_spill] sm:$0xff] }
 0x29f   : > { %v2634_v46 = vadd.f32 %v2519_v29, %v2340_v44  ;;  %v3035_v53 = vsel %vm284_vm0, %v5272_v55, 0.0  ;;  %v3106_v61 = vmul.f32 %v5272_v55, %v5272_v55  ;;  %v5306_v60 = vadd.f32 %v5831_v13, %v2636_v14 }
 0x2a0   : > { %v3879_v9 = vpop.f32.mrf.mxu1  ;;  %v3036_v45 = vadd.f32 %v3035_v53, %v3034_v51  ;;  %v3039_v0 = vsel %vm284_vm0, %v5269_v54, 0.0  ;;  %v5833_v51 = vld [vmem:[#allocation30_spill] sm:$0xff]  ;;  %v3142_v22 = vsel %vm284_vm0, %v3108_v56, 0.0 }
 0x2a1   : > { %v5295_v44 = vadd.f32 %v5829_v6, %v2634_v46  ;;  %v3138_v41 = vsel %vm284_vm0, %v3106_v61, 0.0  ;;  %v2637_v34 = vadd.f32 %v3879_v9, %v2343_v58  ;;  %v5316_v58 = vpop.f32.mrf.mxu0  ;;  %v2066_v46 = vadd.f32 %v5128_v38, %v5175_v11  ;;  %v5835_v9 = vld [vmem:[#allocation21_spill] sm:$0xff] }
 0x2a2   : > { %v2522_v1 = vpop.f32.mrf.mxu1  ;;  %v3038_v8 = vadd.f32 %v3037_v15, %v3036_v45  ;;  %v3139_v21 = vadd.f32 %v3138_v41, %v3137_v18  ;;  %v5322_v53 = vadd.f32 %v5834_v40, %v5833_v51  ;;  %v3111_v38 = vmul.f32 %v5306_v60, %v5306_v60 }
 0x2a3   : > { %v3109_v25 = vmul.f32 %v5295_v44, %v5295_v44  ;;  %v2635_v29 = vadd.f32 %v2522_v1, %v2341_v4  ;;  %v3041_v61 = vsel %vm284_vm0, %v5295_v44, 0.0  ;;  %v5328_v15 = vadd.f32 %v5835_v9, %v2637_v34  ;;  %v5836_v4 = vld [vmem:[#allocation66_spill] sm:$0xff]  ;;  %v5839_v9 = vld [vmem:[#allocation25_spill] sm:$0xff] }
 0x2a4   : > { %v3882_v31 = vpop.f32.mrf.mxu1  ;;  %v3141_v14 = vadd.f32 %v3140_v57, %v3139_v21  ;;  %v3040_v39 = vadd.f32 %v3039_v0, %v3038_v8  ;;  %v5342_v21 = vpop.f32.mrf.mxu0  ;;  %v3045_v13 = vsel %vm284_vm0, %v5306_v60, 0.0  ;;  %v5837_v0 = vld [vmem:[#allocation8_spill] sm:$0xff]  ;;  %v3148_v51 = vsel %vm284_vm0, %v3111_v38, 0.0  ;;  %v5841_v38 = vld [vmem:[#allocation33_spill] sm:$0xff] }
 0x2a5   : > { %v5331_v45 = vadd.f32 %v5836_v4, %v2635_v29  ;;  %v3144_v41 = vsel %vm284_vm0, %v3109_v25, 0.0  ;;  %v2640_v1 = vadd.f32 %v3882_v31, %v5206_v47  ;;  %v3112_v25 = vmul.f32 %v5328_v15, %v5328_v15 }
 0x2a6   : > { %v2535_v6 = vpop.f32.mrf.mxu1  ;;  %v3042_v11 = vadd.f32 %v3041_v61, %v3040_v39  ;;  %v3143_v28 = vadd.f32 %v3142_v22, %v3141_v14  ;;  %v5838_v14 = vld [vmem:[#allocation26_spill] sm:$0xff] }
 0x2a7   : > { %v2638_v18 = vadd.f32 %v2535_v6, %v5213_v5  ;;  %v3043_v56 = vsel %vm284_vm0, %v5331_v45, 0.0  ;;  %v3110_v34 = vmul.f32 %v5331_v45, %v5331_v45  ;;  %v5347_v5 = vadd.f32 %v5837_v0, %v2066_v46  ;;  %v5843_v0 = vld [vmem:[#allocation32_spill] sm:$0xff] }
 0x2a8   : > { %v3883_v8 = vpop.f32.mrf.mxu1  ;;  %v3145_v35 = vadd.f32 %v3144_v41, %v3143_v28  ;;  %v3044_v57 = vadd.f32 %v3043_v56, %v3042_v11  ;;  %v3047_v46 = vsel %vm284_vm0, %v5328_v15, 0.0  ;;  %v5361_v4 = vadd.f32 %v5839_v9, %v2640_v1  ;;  %v5840_v11 = vld [vmem:[#allocation27_spill] sm:$0xff] }
 0x2a9   : > { %v3146_v29 = vsel %vm284_vm0, %v3110_v34, 0.0  ;;  %v5353_v39 = vadd.f32 %v5838_v14, %v2638_v18  ;;  %v2641_v47 = vadd.f32 %v3883_v8, %v5217_v33  ;;  %v5368_v18 = vpop.f32.mrf.mxu0  ;;  %v2069_v41 = vadd.f32 %v5841_v38, %v5179_v50  ;;  %v5842_v34 = vld [vmem:[#allocation28_spill] sm:$0xff] }
 0x2aa   : > { %v2538_v31 = vpop.f32.mrf.mxu1  ;;  %v3046_v40 = vadd.f32 %v3045_v13, %v3044_v57  ;;  %v3147_v22 = vadd.f32 %v3146_v29, %v3145_v35  ;;  %v3150_v1 = vsel %vm284_vm0, %v3112_v25, 0.0  ;;  %v5844_v29 = vld [vmem:[#allocation15_spill] sm:$0xff]  ;;  %v3115_v25 = vmul.f32 %v5361_v4, %v5361_v4 }
 0x2ab   : > { %v2639_v61 = vadd.f32 %v2538_v31, %v5223_v3  ;;  %v3113_v6 = vmul.f32 %v5353_v39, %v5353_v39  ;;  %v5366_v28 = vadd.f32 %v5840_v11, %v2641_v47  ;;  %v3049_v13 = vsel %vm284_vm0, %v5353_v39, 0.0 }
 0x2ac   : > { %v3886_v33 = vpop.f32.mrf.mxu1  ;;  %v3149_v56 = vadd.f32 %v3148_v51, %v3147_v22  ;;  %v3048_v3 = vadd.f32 %v3047_v46, %v3046_v40  ;;  %v5381_v14 = vadd.f32 %v5844_v29, %v5843_v0  ;;  %v5393_v46 = vpop.f32.mrf.mxu0 }
 0x2ad   : > { %v5373_v8 = vadd.f32 %v5842_v34, %v2639_v61  ;;  %v2644_v35 = vadd.f32 %v3886_v33, %v5227_v63  ;;  %v3152_v40 = vsel %vm284_vm0, %v3113_v6, 0.0  ;;  %v3116_v63 = vmul.f32 %v5366_v28, %v5366_v28  ;;  %v5846_v6 = vld [vmem:[#allocation31_spill] sm:$0xff] }
 0x2ae   : > { %v2551_v57 = vpop.f32.mrf.mxu1  ;;  %v3050_v47 = vadd.f32 %v3049_v13, %v3048_v3  ;;  %v3151_v31 = vadd.f32 %v3150_v1, %v3149_v56  ;;  %v3053_v56 = vsel %vm284_vm0, %v5361_v4, 0.0  ;;  %v5845_v3 = vld [vmem:[#allocation29_spill] sm:$0xff] }
 0x2af   : > { %v3051_v50 = vsel %vm284_vm0, %v5373_v8, 0.0  ;;  %v3114_v51 = vmul.f32 %v5373_v8, %v5373_v8  ;;  %v2642_v22 = vadd.f32 %v2551_v57, %v5231_v48  ;;  %v5400_v34 = vadd.f32 %v5845_v3, %v2644_v35  ;;  %v5847_v48 = vld [vmem:[#allocation11_spill] sm:$0xff] }
 0x2b0   : > { %v3887_v61 = vpop.f32.mrf.mxu1  ;;  %v3153_v9 = vadd.f32 %v3152_v40, %v3151_v31  ;;  %v3052_v11 = vadd.f32 %v3051_v50, %v3050_v47  ;;  %v5406_v57 = vadd.f32 %v5847_v48, %v2069_v41  ;;  %v5414_v31 = vadd.f32 %v5160_v7, %v5186_v52  ;;  %v5421_v40 = vpop.f32.mrf.mxu0 }
 0x2b1   : > { %v3154_v33 = vsel %vm284_vm0, %v3114_v51, 0.0  ;;  %v2645_v38 = vadd.f32 %v3887_v61, %v5235_v2  ;;  %v5403_v1 = vadd.f32 %v5846_v6, %v2642_v22  ;;  %v3156_v35 = vsel %vm284_vm0, %v3115_v25, 0.0 }
 0x2b2   : > { %v2554_v13 = vpop.f32.mrf.mxu1  ;;  %v3054_v0 = vadd.f32 %v3053_v56, %v3052_v11  ;;  %v3155_v29 = vadd.f32 %v3154_v33, %v3153_v9  ;;  %v3055_v50 = vsel %vm284_vm0, %v5366_v28, 0.0  ;;  %v3119_v7 = vmul.f32 %v5400_v34, %v5400_v34  ;;  %v5447_v48 = vpop.f32.mrf.mxu0 }
 0x2b3   : > { %v5409_v47 = vadd.f32 %v5150_v23, %v2645_v38  ;;  %v2643_v2 = vadd.f32 %v2554_v13, %v5238_v42  ;;  %v3117_v41 = vmul.f32 %v5403_v1, %v5403_v1  ;;  %v3158_v23 = vsel %vm284_vm0, %v3116_v63, 0.0  ;;  %v5848_v42 = vld [vmem:[#allocation16_spill] sm:$0xff] }
 0x2b4   : > { %v3890_v51 = vpop.f32.mrf.mxu1  ;;  %v3157_v22 = vadd.f32 %v3156_v35, %v3155_v29  ;;  %v3056_v61 = vadd.f32 %v3055_v50, %v3054_v0  ;;  %v5426_v9 = vadd.f32 %v5848_v42, %v5152_v12  ;;  %v3057_v52 = vsel %vm284_vm0, %v5403_v1, 0.0 }
 0x2b5   : > { %v5433_v25 = vadd.f32 %v5182_v62, %v2643_v2  ;;  %v2648_v11 = vadd.f32 %v3890_v51, %v5245_v17  ;;  %v3120_v56 = vmul.f32 %v5409_v47, %v5409_v47  ;;  %v3160_v3 = vsel %vm284_vm0, %v3117_v41, 0.0 }
 0x2b6   : > { %v2567_v33 = vpop.f32.mrf.mxu1  ;;  %v3058_v38 = vadd.f32 %v3057_v52, %v3056_v61  ;;  %v3159_v63 = vadd.f32 %v3158_v23, %v3157_v22  ;;  %v3061_v35 = vsel %vm284_vm0, %v5400_v34, 0.0  ;;  %v3164_v50 = vsel %vm284_vm0, %v3119_v7, 0.0 }
 0x2b7   : > { %v2646_v12 = vadd.f32 %v2567_v33, %v5248_v30  ;;  %v3059_v6 = vsel %vm284_vm0, %v5433_v25, 0.0  ;;  %v3118_v13 = vmul.f32 %v5433_v25, %v5433_v25  ;;  %v5445_v62 = vadd.f32 %v5208_v49, %v2648_v11  ;;  %v5465_v33 = vpop.f32.mrf.mxu0 }
 0x2b8   : > { %v3891_v17 = vpop.f32.mrf.mxu1  ;;  %v3161_v0 = vadd.f32 %v3160_v3, %v3159_v63  ;;  %v3060_v29 = vadd.f32 %v3059_v6, %v3058_v38  ;;  %v3063_v23 = vsel %vm284_vm0, %v5409_v47, 0.0 }
 0x2b9   : > { %v2940_v2 = vadd.f32 %v5250_v10, %v2646_v12  ;;  %v2649_v30 = vadd.f32 %v3891_v17, %v5254_v26  ;;  %v3162_v41 = vsel %vm284_vm0, %v3118_v13, 0.0  ;;  %v3963_v49 = vpack.i.bf16 %v5445_v62, %v5241_v59 }
 0x2ba   : > { %v2570_v51 = vpop.f32.mrf.mxu1  ;;  %v3062_v22 = vadd.f32 %v3061_v35, %v3060_v29  ;;  %v3163_v61 = vadd.f32 %v3162_v41, %v3161_v0  ;;  %v3166_v10 = vsel %vm284_vm0, %v3120_v56, 0.0  ;;  %v3123_v59 = vmul.f32 %v5445_v62, %v5445_v62  ;;  %v3933_v35 = vpop.f32.mrf.mxu0 }
 0x2bb   : > { %v3121_v42 = vmul.f32 %v2940_v2, %v2940_v2  ;;  %v5461_v26 = vadd.f32 %v5290_v16, %v2649_v30  ;;  %v2647_v52 = vadd.f32 %v2570_v51, %v5257_v32  ;;  %v3959_v11 = vpack.i.bf16 %v2940_v2, %v5220_v27 }
 0x2bc   : > { %v3894_v7 = vpop.f32.mrf.mxu1  ;;  %v3165_v38 = vadd.f32 %v3164_v50, %v3163_v61  ;;  %v3064_v63 = vadd.f32 %v3063_v23, %v3062_v22  ;;  %v3065_v3 = vsel %vm284_vm0, %v2940_v2, 0.0  ;;  %v3172_v50 = vsel %vm284_vm0, %v3123_v59, 0.0 }
 0x2bd   : > { %v2652_v12 = vadd.f32 %v3894_v7, %v5261_v24  ;;  %v3168_v56 = vsel %vm284_vm0, %v3121_v42, 0.0  ;;  %v2941_v16 = vadd.f32 %v5316_v58, %v2647_v52  ;;  %3960 = vxpose.xlu1.b32.start [1/16] (narrow) %v3959_v11, 8  ;;  %v3965_v27 = vpack.i.bf16 %v5461_v26, %v5269_v54 }
 0x2be   : > { %v2583_v32 = vpop.f32.mrf.mxu1  ;;  %v3066_v6 = vadd.f32 %v3065_v3, %v3064_v63  ;;  %v3167_v13 = vadd.f32 %v3166_v10, %v3165_v38  ;;  %v3124_v24 = vmul.f32 %v5461_v26, %v5461_v26  ;;  %v3069_v54 = vsel %vm284_vm0, %v5445_v62, 0.0  ;;  %v2896_v38 = vpop.f32.mrf.mxu0 }
 0x2bf   : > { %v5476_v17 = vadd.f32 %v5342_v21, %v2652_v12  ;;  %v2650_v0 = vadd.f32 %v2583_v32, %v5264_v37  ;;  %v3067_v29 = vsel %vm284_vm0, %v2941_v16, 0.0  ;;  %v3122_v2 = vmul.f32 %v2941_v16, %v2941_v16 }
 0x2c0   : > { %v3895_v30 = vpop.f32.mrf.mxu1  ;;  %v3961_v58 = vpack.i.bf16 %v2941_v16, %v5272_v55  ;;  %v3169_v41 = vadd.f32 %v3168_v56, %v3167_v13  ;;  %v3068_v21 = vadd.f32 %v3067_v29, %v3066_v6  ;;  %v3071_v55 = vsel %vm284_vm0, %v5461_v26, 0.0  ;;  %v3936_v6 = vpop.f32.mrf.mxu0 }
 0x2c1   : > { %v3170_v51 = vsel %vm284_vm0, %v3122_v2, 0.0  ;;  %v2944_v37 = vadd.f32 %v5368_v18, %v2650_v0  ;;  %v2653_v23 = vadd.f32 %v3895_v30, %v5276_v36  ;;  %v3971_v61 = vpack.i.bf16 %v5476_v17, %v5306_v60 }
 0x2c2   : > { %3962 = vxpose.xlu1.b32.cont [2/16] (narrow) %v3961_v58, 8  ;;  %v2586_v22 = vpop.f32.mrf.mxu1  ;;  %v3070_v42 = vadd.f32 %v3069_v54, %v3068_v21  ;;  %v3171_v62 = vadd.f32 %v3170_v51, %v3169_v41  ;;  %v3174_v52 = vsel %vm284_vm0, %v3124_v24, 0.0 }
 0x2c3   : > { %v2651_v10 = vadd.f32 %v2586_v22, %v5280_v20  ;;  %v3125_v7 = vmul.f32 %v2944_v37, %v2944_v37  ;;  %v5496_v11 = vadd.f32 %v5393_v46, %v2653_v23  ;;  %v3967_v36 = vpack.i.bf16 %v2944_v37, %v5295_v44  ;;  %v2909_v22 = vpop.f32.mrf.mxu0 }
 0x2c4   : > { %v3898_v18 = vpop.f32.mrf.mxu1  ;;  %v3173_v59 = vadd.f32 %v3172_v50, %v3171_v62  ;;  %v3072_v63 = vadd.f32 %v3071_v55, %v3070_v42  ;;  %v3127_v20 = vmul.f32 %v5476_v17, %v5476_v17  ;;  %v3073_v3 = vsel %vm284_vm0, %v2944_v37, 0.0 }
 0x2c5   : > { %v5500_v12 = vadd.f32 %v5421_v40, %v2651_v10  ;;  %v2656_v26 = vadd.f32 %v3898_v18, %v5299_v19  ;;  %v3176_v56 = vsel %vm284_vm0, %v3125_v7, 0.0  ;;  %v3973_v44 = vpack.i.bf16 %v5496_v11, %v5328_v15 }
 0x2c6   : > { %3964 = vxpose.xlu1.b32.cont [3/16] (narrow) %v3963_v49, 8  ;;  %v2599_v46 = vpop.f32.mrf.mxu1  ;;  %v3074_v16 = vadd.f32 %v3073_v3, %v3072_v63  ;;  %v3175_v32 = vadd.f32 %v3174_v52, %v3173_v59  ;;  %v3128_v13 = vmul.f32 %v5496_v11, %v5496_v11  ;;  %v3077_v50 = vsel %vm284_vm0, %v5476_v17, 0.0 }
 0x2c7   : > { %v3075_v40 = vsel %vm284_vm0, %v5500_v12, 0.0  ;;  %v3126_v19 = vmul.f32 %v5500_v12, %v5500_v12  ;;  %v5516_v0 = vadd.f32 %v5447_v48, %v2656_v26  ;;  %v2654_v49 = vadd.f32 %v2599_v46, %v5309_v43  ;;  %v5849_v43 = vld [vmem:[#allocation14_spill] sm:$0xff] }
 0x2c8   : > { %v3899_v24 = vpop.f32.mrf.mxu1  ;;  %v3969_v29 = vpack.i.bf16 %v5500_v12, %v5331_v45  ;;  %v3177_v2 = vadd.f32 %v3176_v56, %v3175_v32  ;;  %v3076_v30 = vadd.f32 %v3075_v40, %v3074_v16  ;;  %v2365_v21 = vadd.f32 %v5849_v43, %v5414_v31  ;;  %v3937_v56 = vpop.f32.mrf.mxu0 }
 0x2c9   : > { %v3178_v58 = vsel %vm284_vm0, %v3126_v19, 0.0  ;;  %v2657_v54 = vadd.f32 %v3899_v24, %v5322_v53  ;;  %v5526_v41 = vadd.f32 %v5465_v33, %v2654_v49  ;;  %v3979_v45 = vpack.i.bf16 %v5516_v0, %v5361_v4 }
 0x2ca   : > { %3966 = vxpose.xlu1.b32.cont [4/16] (narrow) %v3965_v27, 8  ;;  %v2602_v48 = vpop.f32.mrf.mxu1  ;;  %v3078_v51 = vadd.f32 %v3077_v50, %v3076_v30  ;;  %v3179_v37 = vadd.f32 %v3178_v58, %v3177_v2  ;;  %v3180_v55 = vsel %vm284_vm0, %v3127_v20, 0.0  ;;  %v3079_v33 = vsel %vm284_vm0, %v5496_v11, 0.0 }
 0x2cb   : > { %v5532_v23 = vadd.f32 %v3933_v35, %v2657_v54  ;;  %v2655_v53 = vadd.f32 %v2602_v48, %v5347_v5  ;;  %v3129_v27 = vmul.f32 %v5526_v41, %v5526_v41  ;;  %v3975_v31 = vpack.i.bf16 %v5526_v41, %v5353_v39  ;;  %v2912_v54 = vpop.f32.mrf.mxu0 }
 0x2cc   : > { %v3902_v42 = vpop.f32.mrf.mxu1  ;;  %v3182_v62 = vsel %vm284_vm0, %v3128_v13, 0.0  ;;  %v3181_v10 = vadd.f32 %v3180_v55, %v3179_v37  ;;  %v3131_v35 = vmul.f32 %v5516_v0, %v5516_v0  ;;  %v3080_v5 = vadd.f32 %v3079_v33, %v3078_v51 }
 0x2cd   : > { %v3081_v52 = vsel %vm284_vm0, %v5526_v41, 0.0  ;;  %v5547_v7 = vadd.f32 %v2896_v38, %v2655_v53  ;;  %v2660_v18 = vadd.f32 %v3902_v42, %v5381_v14  ;;  %v3981_v63 = vpack.i.bf16 %v5532_v23, %v5366_v28 }
 0x2ce   : > { %3968 = vxpose.xlu1.b32.cont [5/16] (narrow) %v3967_v36, 8  ;;  %v2615_v59 = vpop.f32.mrf.mxu1  ;;  %v3082_v12 = vadd.f32 %v3081_v52, %v3080_v5  ;;  %v3183_v26 = vadd.f32 %v3182_v62, %v3181_v10  ;;  %v3184_v20 = vsel %vm284_vm0, %v3129_v27, 0.0  ;;  %v3132_v49 = vmul.f32 %v5532_v23, %v5532_v23 }
 0x2cf   : > { %v2658_v3 = vadd.f32 %v2615_v59, %v5406_v57  ;;  %v3083_v46 = vsel %vm284_vm0, %v5547_v7, 0.0  ;;  %v3130_v38 = vmul.f32 %v5547_v7, %v5547_v7  ;;  %v5558_v16 = vadd.f32 %v3936_v6, %v2660_v18 }
 0x2d0   : > { %v3903_v14 = vpop.f32.mrf.mxu1  ;;  %v3977_v36 = vpack.i.bf16 %v5547_v7, %v5373_v8  ;;  %v3185_v32 = vadd.f32 %v3184_v20, %v3183_v26  ;;  %v3084_v40 = vadd.f32 %v3083_v46, %v3082_v12  ;;  %v3085_v57 = vsel %vm284_vm0, %v5516_v0, 0.0 }
 0x2d1   : > { %v2661_v19 = vadd.f32 %v3903_v14, %v5426_v9  ;;  %v5563_v13 = vadd.f32 %v2909_v22, %v2658_v3  ;;  %v3186_v24 = vsel %vm284_vm0, %v3130_v38, 0.0  ;;  %v3987_v2 = vpack.i.bf16 %v5558_v16, %v5400_v34 }
 0x2d2   : > { %3970 = vxpose.xlu1.b32.cont [6/16] (narrow) %v3969_v29, 8  ;;  %v2618_v6 = vpop.f32.mrf.mxu1  ;;  %v3188_v8 = vsel %vm284_vm0, %v3131_v35, 0.0  ;;  %v3087_v9 = vsel %vm284_vm0, %v5532_v23, 0.0  ;;  %v3187_v30 = vadd.f32 %v3186_v24, %v3185_v32  ;;  %v3086_v58 = vadd.f32 %v3085_v57, %v3084_v40 }
 0x2d3   : > { %v3133_v50 = vmul.f32 %v5563_v13, %v5563_v13  ;;  %v2659_v48 = vadd.f32 %v2618_v6, %v2365_v21  ;;  %v2955_v43 = vadd.f32 %v3937_v56, %v2661_v19  ;;  %v3983_v29 = vpack.i.bf16 %v5563_v13, %v5403_v1 }
 0x2d4   : > { %v3088_v51 = vadd.f32 %v3087_v9, %v3086_v58  ;;  %v3189_v37 = vadd.f32 %v3188_v8, %v3187_v30  ;;  %v3190_v34 = vsel %vm284_vm0, %v3132_v49, 0.0  ;;  %v3089_v53 = vsel %vm284_vm0, %v5563_v13, 0.0 }
 0x2d5   : > { %v2953_v22 = vadd.f32 %v2912_v54, %v2659_v48  ;;  %v3989_v55 = vpack.i.bf16 %v2955_v43, %v5409_v47  ;;  %v3135_v21 = vmul.f32 %v5558_v16, %v5558_v16  ;;  %v3192_v1 = vsel %vm284_vm0, %v3133_v50, 0.0 }
 0x2d6   : > { %3972 = vxpose.xlu1.b32.cont [7/16] (narrow) %v3971_v61, 8  ;;  %v3090_v33 = vadd.f32 %v3089_v53, %v3088_v51  ;;  %v3191_v27 = vadd.f32 %v3190_v34, %v3189_v37  ;;  %v3093_v60 = vsel %vm284_vm0, %v5558_v16, 0.0  ;;  %v3136_v17 = vmul.f32 %v2955_v43, %v2955_v43 }
 0x2d7   : > { %v3091_v42 = vsel %vm284_vm0, %v2953_v22, 0.0  ;;  %v3134_v62 = vmul.f32 %v2953_v22, %v2953_v22  ;;  %v3985_v10 = vpack.i.bf16 %v2953_v22, %v5433_v25  ;;  %v3196_v7 = vsel %vm284_vm0, %v3135_v21, 0.0 }
 0x2d8   : > { %v3193_v35 = vadd.f32 %v3192_v1, %v3191_v27  ;;  %v3092_v5 = vadd.f32 %v3091_v42, %v3090_v33  ;;  %v3095_v18 = vsel %vm284_vm0, %v2955_v43, 0.0  ;;  %v3198_v12 = vsel %vm284_vm0, %v3136_v17, 0.0 }
 0x2d9   : > { %v3194_v47 = vsel %vm284_vm0, %v3134_v62, 0.0 }
 0x2da   : > { %3974 = vxpose.xlu1.b32.cont [8/16] (narrow) %v3973_v44, 8  ;;  %v3094_v61 = vadd.f32 %v3093_v60, %v3092_v5  ;;  %v3195_v52 = vadd.f32 %v3194_v47, %v3193_v35 }
 0x2dc   : > { %v3096_v59 = vadd.f32 %v3095_v18, %v3094_v61  ;;  %v3197_v25 = vadd.f32 %v3196_v7, %v3195_v52 }
 0x2de   : > { %3976 = vxpose.xlu1.b32.cont [9/16] (narrow) %v3975_v31, 8  ;;  %v3097_v26 = vrot.slane %v3096_v59, 4  ;;  %v3199_v20 = vadd.f32 %v3198_v12, %v3197_v25 }
 0x2e0   : > { %v3098_v15 = vadd.f32 %v3097_v26, %v3096_v59  ;;  %v3200_v11 = vrot.slane %v3199_v20, 4 }
 0x2e2   : > { %3978 = vxpose.xlu1.b32.cont [10/16] (narrow) %v3977_v36, 8  ;;  %v3099_v44 = vrot.slane %v3098_v15, 2  ;;  %v3201_v3 = vadd.f32 %v3200_v11, %v3199_v20 }
 0x2e4   : > { %v3100_v56 = vadd.f32 %v3099_v44, %v3098_v15  ;;  %v3202_v46 = vrot.slane %v3201_v3, 2 }
 0x2e6   : > { %3980 = vxpose.xlu1.b32.cont [11/16] (narrow) %v3979_v45, 8  ;;  %v3101_v38 = vrot.slane %v3100_v56, 1  ;;  %v3203_v16 = vadd.f32 %v3202_v46, %v3201_v3 }
 0x2e8   : > { %v3102_v39 = vadd.f32 %v3101_v38, %v3100_v56  ;;  %v3204_v41 = vrot.slane %v3203_v16, 1 }
 0x2ea   : > { %3982 = vxpose.xlu1.b32.cont [12/16] (narrow) %v3981_v63, 8  ;;  %3104 = vst.msk [vmem:[%s211_s18] sm:$0x1] %vm3103_vm3, %v3102_v39  ;;  %v3205_v4 = vadd.f32 %v3204_v41, %v3203_v16 }
 0x2ec   : > { %3206 = vst.msk [vmem:[%s214_s21] sm:$0x1] %vm3103_vm3, %v3205_v4 }
 0x2ee   : > { %3984 = vxpose.xlu1.b32.cont [13/16] (narrow) %v3983_v29, 8 }
 0x2f2   : > { %3986 = vxpose.xlu1.b32.cont [14/16] (narrow) %v3985_v10, 8 }
 0x2f6   : > { %3988 = vxpose.xlu1.b32.cont [15/16] (narrow) %v3987_v2, 8 }
 0x2fa   : > { %3990 = vxpose.xlu1.b32.end [16/16] (narrow) %v3989_v55, 8 }
 0x33a   : > { %v3991_v0 = vpop.trf.xlu1 }
 0x33b   : > { %v3995_v45 = vunpack.i.h.bf16 %v3991_v0  ;;  %v3992_v31 = vunpack.i.l.bf16 %v3991_v0 }
 0x33d   : > { %v3473_v14 = vpack.c.bf16 %v3995_v45, %v3992_v31 }
 0x33f   : > { %3474 = vst.sshfl [vmem:[%s208_s25] sm:$0x33 pattern:$0x76325410] %v3473_v14 }
 0x340 PF: > { %s15_s15 = sadd.s32 1, %s4003_s15  }
 0x341   : > { %p12_p4 = scmp.ge.s32.totalorder %s15_s15, 4  }
 0x343   :  { %14 = sbr.rel (!%p12_p4) target bundleno = 1 (0x1), region = 92 }

// kernel: basic_block_forward.4
= control target key start
LH: loop header
LB: loop body
LE: loop exit
PB: predicated region body
PF: predicated region fallthrough
CT: control target
= control target key end

     0   :  { %s4129_s21 = smov 0   ;;  %s5749_s0 = inlined_call_operand.vmem [shape: bf16[2,4,256], index: 0, kind: input, shape index: {}]   ;;  %s5750_s1 = inlined_call_operand.vmem [shape: f32[4,1], index: 1, kind: input, shape index: {}]   ;;  %s5751_s2 = inlined_call_operand.vmem [shape: f32[4,1], index: 2, kind: input, shape index: {}]   ;;  %s5752_s3 = inlined_call_operand.vmem [shape: bf16[3,3,4,4], index: 3, kind: input, shape index: {}]   ;;  %s5753_s4 = inlined_call_operand.vmem [shape: bf16[2,4,256], index: 4, kind: output, shape index: {0}]   ;;  %s5754_s5 = inlined_call_operand.vmem [shape: f32[2,1,4], index: 5, kind: output, shape index: {1}]   ;;  %s5755_s6 = inlined_call_operand.vmem [shape: f32[2,1,4], index: 6, kind: output, shape index: {2}]  }
   0x1 LB: > { %s3396_s22 = sadd.s32 4294967295, %s4089_s21   ;;  %p3400_p0 = scmp.ge.s32.totalorder %s4089_s21, 1  ;;  %s4089_s21 = sphi %s4129_s21, %s17_s21  }
   0x2   : > { %p217_p1 = scmp.lt.s32.totalorder %s4089_s21, 3 }
   0x4   : > { %p218_p2 = pnand %p3400_p0, %p217_p1 }
   0x6   : > { %221 = sbr.rel (%p218_p2) target bundleno = 961 (0x3c1), region = 36 }
   0xb   : > { %v272_v0 = vld [vmem:[%s5750_s1] sm:$0xf]  ;;  %v4091_v1 = vmov 0   ;;  %vm368_vm0 = vcmask 31744   ;;  %v4092_v3 = vmov 0.0   ;;  %p253_p3 = scmp.lt.s32.totalorder %s3396_s22, 1  ;;  %v280_v6 = vlaneseq }
   0xc   : > { %4045 = vset.pattern.permute.xlu0 %v4091_v1  ;;  %v286_v2 = vld [vmem:[%s5751_s2] sm:$0xf]  ;;  %373 = vst.msk [vmem:[#allocation2 + $0x18] sm:$0xff] %vm368_vm0, %v4092_v3  ;;  %374 = vst.msk [vmem:[#allocation2 + $0x20] sm:$0xff] %vm368_vm0, %v4092_v3  ;;  %v4093_v4 = vmov 839922192  }
   0xd   : > { %275 = vperm.xlu0 %4045, %v272_v0   ;;  %369 = vst.msk [vmem:[#allocation2] sm:$0xff] %vm368_vm0, %v4092_v3  ;;  %370 = vst.msk [vmem:[#allocation2 + $0x8] sm:$0xff] %vm368_vm0, %v4092_v3  ;;  %s5955_s22 = smov (!%p253_p3, %s3396_s22), 1  ;;  %v278_v5 = vunpack.c.l.s4 %v4093_v4  ;;  %v281_v8 = vshrl.u32 %v280_v6, 7  ;;  %vm371_vm1 = vcmask 25600   ;;  %vm604_vm2 = vcmask 1041408  }
   0xe   : > { %376 = vst.msk [vmem:[#allocation2 + $0x30] sm:$0xff] %vm368_vm0, %v4092_v3  ;;  %377 = vst.msk [vmem:[#allocation2 + $0x38] sm:$0xff] %vm368_vm0, %v4092_v3  ;;  %s3561_s27 = sshll.u32 %s5955_s22, 2  ;;  %v3405_v19 = vld [vmem:[%s5752_s3 + $0x2] sm:$0x3]  ;;  %vm3187_vm3 = vcmask 24576   ;;  %s268_s9 = scalar_lea.vmem %s5755_s6, %s5955_s22 }
   0xf   : > { %379 = vst.msk [vmem:[#allocation2 + $0x48] sm:$0xff] %vm368_vm0, %v4092_v3  ;;  %380 = vst.msk [vmem:[#allocation2 + $0x50] sm:$0xff] %vm368_vm0, %v4092_v3  ;;  %v279_v7 = vunpack.c.0.s8 %v278_v5  ;;  %s257_s30 = scalar_lea.vmem %s5749_s0, %s3561_s27  ;;  %4024 = vmatprep.subr.msk.bf16.mxu0 %vm604_vm2, %v3405_v19  ;;  %v606_v20 = vsel %vm604_vm2, %v3405_v19, 0  ;;  %4025 = vmatprep.subr.msk.bf16.mxu1 %vm604_vm2, %v3405_v19  ;;  %v3438_v25 = vld [vmem:[%s5752_s3 + $0x4] sm:$0x3]  ;;  %s262_s12 = scalar_lea.vmem %s5753_s4, %s3561_s27 }
  0x10   : > { %382 = vst.msk [vmem:[#allocation2 + $0x60] sm:$0xff] %vm368_vm0, %v4092_v3  ;;  %383 = vst.msk [vmem:[#allocation2 + $0x68] sm:$0xff] %vm368_vm0, %v4092_v3  ;;  %v270_v10 = vld [vmem:[%s257_s30] sm:$0xf]  ;;  %3717 = vmatpush3.bf16.msra.mxu0 %v606_v20  ;;  %4023 = vmatpush3.bf16.msra.mxu1 %v606_v20  ;;  %v1080_v34 = vsel %vm604_vm2, %v3438_v25, 0  ;;  %s265_s30 = scalar_lea.vmem %s5754_s5, %s5955_s22 }
  0x11   : > { %289 = vperm.xlu0 %4045, %v286_v2   ;;  %385 = vst.msk [vmem:[#allocation2 + $0x78] sm:$0xff] %vm368_vm0, %v4092_v3  ;;  %386 = vst.msk [vmem:[#allocation2 + $0x80] sm:$0xff] %vm368_vm0, %v4092_v3  ;;  %v282_v9 = vsub.s32 %v279_v7, %v281_v8  ;;  %v271_v12 = vunpack.c.l.bf16 %v270_v10  ;;  %4027 = vmatprep.subr.msk.bf16.mxu0 %vm604_vm2, %v3438_v25  ;;  %v4277_v26 = vld [vmem:[%s5752_s3] sm:$0x3]  ;;  %v4291_v35 = vld [vmem:[%s5752_s3 + $0x8] sm:$0x3] }
  0x12   : > { %388 = vst.msk [vmem:[#allocation2 + $0x90] sm:$0xff] %vm368_vm0, %v4092_v3  ;;  %389 = vst.msk [vmem:[#allocation2 + $0x98] sm:$0xff] %vm368_vm0, %v4092_v3  ;;  %4026 = vmatprep.subr.msk.bf16.mxu1 %vm604_vm2, %v4277_v26 }
  0x13   : > { %391 = vst.msk [vmem:[#allocation2 + $0xa8] sm:$0xff] %vm368_vm0, %v4092_v3  ;;  %392 = vst.msk [vmem:[#allocation2 + $0xb0] sm:$0xff] %vm368_vm0, %v4092_v3 }
  0x14   : > { %394 = vst.msk [vmem:[#allocation2 + $0xc0] sm:$0xff] %vm368_vm0, %v4092_v3  ;;  %395 = vst.msk [vmem:[#allocation2 + $0xc8] sm:$0xff] %vm368_vm0, %v4092_v3  ;;  %v506_v21 = vld [vmem:[#allocation2 + $0x1] sm:$0xff] }
  0x15   : > { %397 = vst.msk [vmem:[#allocation2 + $0xd8] sm:$0xff] %vm368_vm0, %v4092_v3  ;;  %398 = vst.msk [vmem:[#allocation2 + $0xe0] sm:$0xff] %vm368_vm0, %v4092_v3  ;;  %v981_v62 = vld [vmem:[#allocation2 + $0x2] sm:$0xff] }
  0x16   : > { %400 = vst.msk [vmem:[#allocation2 + $0xf0] sm:$0xff] %vm368_vm0, %v4092_v3  ;;  %401 = vst.msk [vmem:[#allocation2 + $0xf8] sm:$0xff] %vm368_vm0, %v4092_v3 }
  0x17   : > { %403 = vst.msk [vmem:[#allocation2 + $0x108] sm:$0xff] %vm368_vm0, %v4092_v3  ;;  %404 = vst.msk [vmem:[#allocation2 + $0x110] sm:$0xff] %vm368_vm0, %v4092_v3 }
  0x18   : > { %406 = vst.msk [vmem:[#allocation2 + $0x120] sm:$0xff] %vm368_vm0, %v4092_v3  ;;  %407 = vst.msk [vmem:[#allocation2 + $0x128] sm:$0xff] %vm368_vm0, %v4092_v3 }
  0x19   : > { %409 = vst.msk [vmem:[#allocation2 + $0x138] sm:$0xff] %vm368_vm0, %v4092_v3  ;;  %410 = vst.msk [vmem:[#allocation2 + $0x140] sm:$0xff] %vm368_vm0, %v4092_v3 }
  0x1a   : > { %412 = vst.msk [vmem:[#allocation2 + $0x150] sm:$0xff] %vm368_vm0, %v4092_v3  ;;  %413 = vst.msk [vmem:[#allocation2 + $0x158] sm:$0xff] %vm368_vm0, %v4092_v3 }
  0x1b   : > { %415 = vst.msk [vmem:[#allocation2 + $0x168] sm:$0xff] %vm368_vm0, %v4092_v3  ;;  %416 = vst.msk [vmem:[#allocation2 + $0x170] sm:$0xff] %vm368_vm0, %v4092_v3 }
  0x1c   : > { %418 = vst.msk [vmem:[#allocation2 + $0x180] sm:$0xff] %vm368_vm0, %v4092_v3  ;;  %419 = vst.msk [vmem:[#allocation2 + $0x188] sm:$0xff] %vm368_vm0, %v4092_v3 }
  0x1d   : > { %421 = vst.msk [vmem:[#allocation2 + $0x198] sm:$0xff] %vm368_vm0, %v4092_v3  ;;  %422 = vst.msk [vmem:[#allocation2 + $0x1a0] sm:$0xff] %vm368_vm0, %v4092_v3 }
  0x1e   : > { %375 = vst.msk [vmem:[#allocation2 + $0x28] sm:$0x3] %vm371_vm1, %v4092_v3  ;;  %372 = vst.msk [vmem:[#allocation2 + $0x10] sm:$0x3] %vm371_vm1, %v4092_v3 }
  0x1f   : > { %378 = vst.msk [vmem:[#allocation2 + $0x40] sm:$0x3] %vm371_vm1, %v4092_v3  ;;  %381 = vst.msk [vmem:[#allocation2 + $0x58] sm:$0x3] %vm371_vm1, %v4092_v3 }
  0x20   : > { %384 = vst.msk [vmem:[#allocation2 + $0x70] sm:$0x3] %vm371_vm1, %v4092_v3  ;;  %387 = vst.msk [vmem:[#allocation2 + $0x88] sm:$0x3] %vm371_vm1, %v4092_v3 }
  0x21   : > { %390 = vst.msk [vmem:[#allocation2 + $0xa0] sm:$0x3] %vm371_vm1, %v4092_v3  ;;  %393 = vst.msk [vmem:[#allocation2 + $0xb8] sm:$0x3] %vm371_vm1, %v4092_v3 }
  0x22   : > { %396 = vst.msk [vmem:[#allocation2 + $0xd0] sm:$0x3] %vm371_vm1, %v4092_v3  ;;  %399 = vst.msk [vmem:[#allocation2 + $0xe8] sm:$0x3] %vm371_vm1, %v4092_v3 }
  0x23   : > { %402 = vst.msk [vmem:[#allocation2 + $0x100] sm:$0x3] %vm371_vm1, %v4092_v3  ;;  %405 = vst.msk [vmem:[#allocation2 + $0x118] sm:$0x3] %vm371_vm1, %v4092_v3 }
  0x24   : > { %408 = vst.msk [vmem:[#allocation2 + $0x130] sm:$0x3] %vm371_vm1, %v4092_v3  ;;  %411 = vst.msk [vmem:[#allocation2 + $0x148] sm:$0x3] %vm371_vm1, %v4092_v3 }
  0x25   : > { %414 = vst.msk [vmem:[#allocation2 + $0x160] sm:$0x3] %vm371_vm1, %v4092_v3  ;;  %417 = vst.msk [vmem:[#allocation2 + $0x178] sm:$0x3] %vm371_vm1, %v4092_v3  ;;  %v507_v22 = vld [vmem:[#allocation2 + $0x9] sm:$0xff] }
  0x26   : > { %420 = vst.msk [vmem:[#allocation2 + $0x190] sm:$0x3] %vm371_vm1, %v4092_v3  ;;  %423 = vst.msk [vmem:[#allocation2 + $0x1a8] sm:$0x3] %vm371_vm1, %v4092_v3  ;;  %v538_v23 = vpack.c.bf16 %v507_v22, %v506_v21  ;;  %v982_v63 = vld [vmem:[#allocation2 + $0xa] sm:$0xff] }
  0x27   : > { %v1013_v3 = vpack.c.bf16 %v982_v63, %v981_v62 }
  0x28   : > { %3718 = vmatprep.mubr.msk.bf16.mxu0 %vm368_vm0, %v538_v23 }
  0x88   : > { %v276_v11 = vpop.permute.xlu0 %275 }
  0x89   : > { %v283_v13 = vrot.slane %v276_v11, %v282_v9 }
  0x8b   : > { %v285_v15 = vmul.f32 %v283_v13, %v271_v12 }
  0x8c   : > { %v290_v14 = vpop.permute.xlu0 %289 }
  0x8d   : > { %v297_v16 = vrot.slane %v290_v14, %v282_v9 }
  0x8f   : > { %v299_v17 = vadd.f32 %v297_v16, %v285_v15  ;;  %v1668_v15 = vsel %vm604_vm2, %v4291_v35, 0 }
  0x91   : > { %v300_v18 = vmax.f32 %v299_v17, 0.0  ;;  %v4347_v17 = vld [vmem:[%s5752_s3 + $0xc] sm:$0x3] }
  0x93   : > { %304 = vxpose.xlu1.b32.start.end [1/1] (short) %v300_v18, 128  ;;  %v302_v24 = vcombine.high %v300_v18, %v300_v18 }
  0xd0   : > { %336 = vxpose.xlu1.b32.start.end [1/1] (short) %v302_v24, 128 }
 0x10f   : > { %v320_v27 = vpop.trf.xlu1 }
 0x110   : > { %425 = vst.msk [vmem:[#allocation2 + $0x19] sm:$0xff] %vm368_vm0, %v320_v27 }
 0x113   : > { %v321_v28 = vpop.trf.xlu1 }
 0x114   : > { %426 = vst.msk [vmem:[#allocation2 + $0x21] sm:$0xff] %vm368_vm0, %v321_v28 }
 0x117   : > { %v322_v29 = vpop.trf.xlu1  ;;  %v508_v31 = vld [vmem:[#allocation2 + $0x19] sm:$0xff] }
 0x118   : > { %427 = vst.msk [vmem:[#allocation2 + $0x31] sm:$0xff] %vm368_vm0, %v322_v29  ;;  %v818_v29 = vsel %vm604_vm2, %v4277_v26, 0 }
 0x11b   : > { %v323_v30 = vpop.trf.xlu1  ;;  %v509_v32 = vld [vmem:[#allocation2 + $0x21] sm:$0xff] }
 0x11c   : > { %428 = vst.msk [vmem:[#allocation2 + $0x39] sm:$0xff] %vm368_vm0, %v323_v30  ;;  %v4285_v33 = vpack.c.bf16 %v509_v32, %v508_v31  ;;  %v983_v6 = vld [vmem:[#allocation2 + $0x1a] sm:$0xff]  ;;  %v984_v7 = vld [vmem:[#allocation2 + $0x22] sm:$0xff] }
 0x11d   : > { %v4338_v14 = vpack.c.bf16 %v984_v7, %v983_v6  ;;  %v4370_v31 = vld [vmem:[%s5752_s3 + $0x6] sm:$0x3] }
 0x11e   : > { %3719 = vmatmul.mubr.msk.bf16.vlgmr.msra.gmra.mxu0 %vm368_vm0, %v4285_v33 }
 0x11f   : > { %v324_v36 = vpop.trf.xlu1  ;;  %3785 = vmatpush3.bf16.msra.mxu0 %v1080_v34  ;;  %v510_v38 = vld [vmem:[#allocation2 + $0x31] sm:$0xff] }
 0x120   : > { %429 = vst.msk [vmem:[#allocation2 + $0x49] sm:$0xff] %vm368_vm0, %v324_v36  ;;  %4029 = vmatprep.subr.msk.bf16.mxu0 %vm604_vm2, %v4291_v35 }
 0x123   : > { %v325_v37 = vpop.trf.xlu1  ;;  %v511_v39 = vld [vmem:[#allocation2 + $0x39] sm:$0xff] }
 0x124   : > { %430 = vst.msk [vmem:[#allocation2 + $0x51] sm:$0xff] %vm368_vm0, %v325_v37  ;;  %v4299_v40 = vpack.c.bf16 %v511_v39, %v510_v38  ;;  %v985_v8 = vld [vmem:[#allocation2 + $0x32] sm:$0xff]  ;;  %v986_v9 = vld [vmem:[#allocation2 + $0x3a] sm:$0xff] }
 0x125   : > { %v4342_v16 = vpack.c.bf16 %v986_v9, %v985_v8 }
 0x126   : > { %3722 = vmatprep.mubr.msk.bf16.mxu0 %vm368_vm0, %v4299_v40 }
 0x127   : > { %v326_v41 = vpop.trf.xlu1  ;;  %v512_v43 = vld [vmem:[#allocation2 + $0x49] sm:$0xff] }
 0x128   : > { %431 = vst.msk [vmem:[#allocation2 + $0x61] sm:$0xff] %vm368_vm0, %v326_v41 }
 0x12b   : > { %v327_v42 = vpop.trf.xlu1  ;;  %v513_v44 = vld [vmem:[#allocation2 + $0x51] sm:$0xff] }
 0x12c   : > { %432 = vst.msk [vmem:[#allocation2 + $0x69] sm:$0xff] %vm368_vm0, %v327_v42  ;;  %v4305_v45 = vpack.c.bf16 %v513_v44, %v512_v43  ;;  %v987_v19 = vld [vmem:[#allocation2 + $0x4a] sm:$0xff]  ;;  %v988_v20 = vld [vmem:[#allocation2 + $0x52] sm:$0xff] }
 0x12d   : > { %v4361_v28 = vpack.c.bf16 %v988_v20, %v987_v19 }
 0x12e   : > { %3723 = vmatmul.mubr.msk.bf16.gmra.mxu0 %vm368_vm0, %v4305_v45 }
 0x12f   : > { %v328_v46 = vpop.trf.xlu1  ;;  %v514_v48 = vld [vmem:[#allocation2 + $0x61] sm:$0xff] }
 0x130   : > { %433 = vst.msk [vmem:[#allocation2 + $0x79] sm:$0xff] %vm368_vm0, %v328_v46 }
 0x133   : > { %v329_v47 = vpop.trf.xlu1  ;;  %v515_v49 = vld [vmem:[#allocation2 + $0x69] sm:$0xff] }
 0x134   : > { %434 = vst.msk [vmem:[#allocation2 + $0x81] sm:$0xff] %vm368_vm0, %v329_v47  ;;  %v4311_v50 = vpack.c.bf16 %v515_v49, %v514_v48  ;;  %v989_v21 = vld [vmem:[#allocation2 + $0x62] sm:$0xff]  ;;  %v990_v22 = vld [vmem:[#allocation2 + $0x6a] sm:$0xff] }
 0x135   : > { %v4365_v30 = vpack.c.bf16 %v990_v22, %v989_v21 }
 0x136   : > { %3726 = vmatprep.mubr.msk.bf16.mxu0 %vm368_vm0, %v4311_v50 }
 0x137   : > { %v330_v51 = vpop.trf.xlu1  ;;  %v516_v53 = vld [vmem:[#allocation2 + $0x79] sm:$0xff] }
 0x138   : > { %435 = vst.msk [vmem:[#allocation2 + $0x91] sm:$0xff] %vm368_vm0, %v330_v51 }
 0x13b   : > { %v331_v52 = vpop.trf.xlu1  ;;  %v517_v54 = vld [vmem:[#allocation2 + $0x81] sm:$0xff] }
 0x13c   : > { %436 = vst.msk [vmem:[#allocation2 + $0x99] sm:$0xff] %vm368_vm0, %v331_v52  ;;  %v4317_v55 = vpack.c.bf16 %v517_v54, %v516_v53  ;;  %v991_v26 = vld [vmem:[#allocation2 + $0x7a] sm:$0xff]  ;;  %v992_v34 = vld [vmem:[#allocation2 + $0x82] sm:$0xff] }
 0x13d   : > { %v4384_v42 = vpack.c.bf16 %v992_v34, %v991_v26 }
 0x13e   : > { %3727 = vmatmul.mubr.msk.bf16.gmra.mxu0 %vm368_vm0, %v4317_v55 }
 0x13f   : > { %v332_v56 = vpop.trf.xlu1  ;;  %v518_v58 = vld [vmem:[#allocation2 + $0x91] sm:$0xff] }
 0x140   : > { %437 = vst.msk [vmem:[#allocation2 + $0xa9] sm:$0xff] %vm368_vm0, %v332_v56 }
 0x143   : > { %v333_v57 = vpop.trf.xlu1  ;;  %v519_v59 = vld [vmem:[#allocation2 + $0x99] sm:$0xff] }
 0x144   : > { %438 = vst.msk [vmem:[#allocation2 + $0xb1] sm:$0xff] %vm368_vm0, %v333_v57  ;;  %v4323_v60 = vpack.c.bf16 %v519_v59, %v518_v58  ;;  %v993_v35 = vld [vmem:[#allocation2 + $0x92] sm:$0xff]  ;;  %v994_v36 = vld [vmem:[#allocation2 + $0x9a] sm:$0xff] }
 0x145   : > { %v4386_v43 = vpack.c.bf16 %v994_v36, %v993_v35 }
 0x146   : > { %3730 = vmatprep.mubr.msk.bf16.mxu0 %vm368_vm0, %v4323_v60 }
 0x147   : > { %v334_v61 = vpop.trf.xlu1  ;;  %v520_v1 = vld [vmem:[#allocation2 + $0xa9] sm:$0xff] }
 0x148   : > { %439 = vst.msk [vmem:[#allocation2 + $0xc1] sm:$0xff] %vm368_vm0, %v334_v61 }
 0x14b   : > { %v335_v0 = vpop.trf.xlu1  ;;  %v521_v2 = vld [vmem:[#allocation2 + $0xb1] sm:$0xff] }
 0x14c   : > { %440 = vst.msk [vmem:[#allocation2 + $0xc9] sm:$0xff] %vm368_vm0, %v335_v0  ;;  %v4329_v4 = vpack.c.bf16 %v521_v2, %v520_v1  ;;  %v995_v46 = vld [vmem:[#allocation2 + $0xaa] sm:$0xff]  ;;  %v996_v47 = vld [vmem:[#allocation2 + $0xb2] sm:$0xff] }
 0x14d   : > { %v4398_v56 = vpack.c.bf16 %v996_v47, %v995_v46 }
 0x14e   : > { %3731 = vmatmul.mubr.msk.bf16.gmra.mxu0 %vm368_vm0, %v4329_v4 }
 0x14f   : > { %v352_v5 = vpop.trf.xlu1  ;;  %3786 = vmatprep.mubr.msk.bf16.mxu0 %vm368_vm0, %v1013_v3  ;;  %v522_v11 = vld [vmem:[#allocation2 + $0xc1] sm:$0xff] }
 0x150   : > { %441 = vst.msk [vmem:[#allocation2 + $0xd9] sm:$0xff] %vm368_vm0, %v352_v5 }
 0x153   : > { %v353_v10 = vpop.trf.xlu1  ;;  %v523_v12 = vld [vmem:[#allocation2 + $0xc9] sm:$0xff] }
 0x154   : > { %442 = vst.msk [vmem:[#allocation2 + $0xe1] sm:$0xff] %vm368_vm0, %v353_v10  ;;  %v4336_v13 = vpack.c.bf16 %v523_v12, %v522_v11  ;;  %v997_v48 = vld [vmem:[#allocation2 + $0xc2] sm:$0xff]  ;;  %v998_v49 = vld [vmem:[#allocation2 + $0xca] sm:$0xff] }
 0x155   : > { %v4400_v57 = vpack.c.bf16 %v998_v49, %v997_v48 }
 0x156   : > { %3734 = vmatprep.mubr.msk.bf16.mxu1 %vm368_vm0, %v4336_v13  ;;  %3787 = vmatmul.mubr.msk.bf16.vlgmr.msra.gmra.mxu0 %vm368_vm0, %v4338_v14 }
 0x157   : > { %3790 = vmatprep.mubr.msk.bf16.mxu0 %vm368_vm0, %v4342_v16  ;;  %v354_v18 = vpop.trf.xlu1  ;;  %3853 = vmatpush3.bf16.msra.mxu0 %v1668_v15  ;;  %v524_v24 = vld [vmem:[#allocation2 + $0xd9] sm:$0xff] }
 0x158   : > { %443 = vst.msk [vmem:[#allocation2 + $0xf1] sm:$0xff] %vm368_vm0, %v354_v18  ;;  %4031 = vmatprep.subr.msk.bf16.mxu0 %vm604_vm2, %v4347_v17 }
 0x15b   : > { %v355_v23 = vpop.trf.xlu1  ;;  %v525_v25 = vld [vmem:[#allocation2 + $0xe1] sm:$0xff] }
 0x15c   : > { %444 = vst.msk [vmem:[#allocation2 + $0xf9] sm:$0xff] %vm368_vm0, %v355_v23  ;;  %v4359_v27 = vpack.c.bf16 %v525_v25, %v524_v24  ;;  %v999_v59 = vld [vmem:[#allocation2 + $0xda] sm:$0xff]  ;;  %v1000_v61 = vld [vmem:[#allocation2 + $0xe2] sm:$0xff] }
 0x15d   : > { %v4412_v5 = vpack.c.bf16 %v1000_v61, %v999_v59  ;;  %v460_v59 = vld [vmem:[#allocation2 + $0x20] sm:$0xff]  ;;  %v462_v61 = vld [vmem:[#allocation2 + $0x38] sm:$0xff] }
 0x15e   : > { %3735 = vmatmul.mubr.msk.bf16.vlgmr.msra.gmra.mxu1 %vm368_vm0, %v4359_v27  ;;  %3791 = vmatmul.mubr.msk.bf16.gmra.mxu0 %vm368_vm0, %v4361_v28 }
 0x15f   : > { %3794 = vmatprep.mubr.msk.bf16.mxu0 %vm368_vm0, %v4365_v30  ;;  %v356_v32 = vpop.trf.xlu1  ;;  %3751 = vmatpush3.bf16.msra.mxu1 %v818_v29  ;;  %v526_v38 = vld [vmem:[#allocation2 + $0xf1] sm:$0xff] }
 0x160   : > { %445 = vst.msk [vmem:[#allocation2 + $0x109] sm:$0xff] %vm368_vm0, %v356_v32  ;;  %4028 = vmatprep.subr.msk.bf16.mxu1 %vm604_vm2, %v4370_v31 }
 0x163   : > { %v357_v37 = vpop.trf.xlu1  ;;  %v527_v39 = vld [vmem:[#allocation2 + $0xf9] sm:$0xff] }
 0x164   : > { %446 = vst.msk [vmem:[#allocation2 + $0x111] sm:$0xff] %vm368_vm0, %v357_v37  ;;  %v4382_v41 = vpack.c.bf16 %v527_v39, %v526_v38  ;;  %v1001_v62 = vld [vmem:[#allocation2 + $0xf2] sm:$0xff]  ;;  %v1002_v63 = vld [vmem:[#allocation2 + $0xfa] sm:$0xff] }
 0x165   : > { %v4414_v6 = vpack.c.bf16 %v1002_v63, %v1001_v62  ;;  %v457_v39 = vld [vmem:[#allocation2] sm:$0xff]  ;;  %v459_v62 = vld [vmem:[#allocation2 + $0x18] sm:$0xff] }
 0x166   : > { %3738 = vmatprep.mubr.msk.bf16.mxu1 %vm368_vm0, %v4382_v41  ;;  %3795 = vmatmul.mubr.msk.bf16.gmra.mxu0 %vm368_vm0, %v4384_v42  ;;  %v4463_v63 = vpack.c.bf16 %v460_v59, %v459_v62 }
 0x167   : > { %3798 = vmatprep.mubr.msk.bf16.mxu0 %vm368_vm0, %v4386_v43  ;;  %v358_v44 = vpop.trf.xlu1  ;;  %v528_v52 = vld [vmem:[#allocation2 + $0x109] sm:$0xff] }
 0x168   : > { %447 = vst.msk [vmem:[#allocation2 + $0x121] sm:$0xff] %vm368_vm0, %v358_v44  ;;  %v458_v44 = vld [vmem:[#allocation2 + $0x8] sm:$0xff] }
 0x16b   : > { %v359_v51 = vpop.trf.xlu1  ;;  %v529_v53 = vld [vmem:[#allocation2 + $0x111] sm:$0xff] }
 0x16c   : > { %448 = vst.msk [vmem:[#allocation2 + $0x129] sm:$0xff] %vm368_vm0, %v359_v51  ;;  %v4396_v54 = vpack.c.bf16 %v529_v53, %v528_v52  ;;  %v1003_v8 = vld [vmem:[#allocation2 + $0x10a] sm:$0xff]  ;;  %v1004_v9 = vld [vmem:[#allocation2 + $0x112] sm:$0xff]  ;;  %v489_v51 = vpack.c.bf16 %v458_v44, %v457_v39 }
 0x16d   : > { %v4426_v20 = vpack.c.bf16 %v1004_v9, %v1003_v8  ;;  %v463_v8 = vld [vmem:[#allocation2 + $0x48] sm:$0xff] }
 0x16e   : > { %3739 = vmatmul.mubr.msk.bf16.gmra.mxu1 %vm368_vm0, %v4396_v54  ;;  %3799 = vmatmul.mubr.msk.bf16.gmra.mxu0 %vm368_vm0, %v4398_v56  ;;  %v479_v44 = vld [vmem:[#allocation2 + $0x108] sm:$0xff] }
 0x16f   : > { %3802 = vmatprep.mubr.msk.bf16.mxu0 %vm368_vm0, %v4400_v57  ;;  %v360_v58 = vpop.trf.xlu1  ;;  %v530_v1 = vld [vmem:[#allocation2 + $0x121] sm:$0xff] }
 0x170   : > { %449 = vst.msk [vmem:[#allocation2 + $0x139] sm:$0xff] %vm368_vm0, %v360_v58 }
 0x173   : > { %v361_v0 = vpop.trf.xlu1  ;;  %v531_v2 = vld [vmem:[#allocation2 + $0x129] sm:$0xff] }
 0x174   : > { %450 = vst.msk [vmem:[#allocation2 + $0x141] sm:$0xff] %vm368_vm0, %v361_v0  ;;  %v4410_v3 = vpack.c.bf16 %v531_v2, %v530_v1  ;;  %v1005_v10 = vld [vmem:[#allocation2 + $0x122] sm:$0xff]  ;;  %v1006_v11 = vld [vmem:[#allocation2 + $0x12a] sm:$0xff]  ;;  %v1374_v0 = vsel %vm604_vm2, %v4370_v31, 0 }
 0x175   : > { %v4428_v21 = vpack.c.bf16 %v1006_v11, %v1005_v10  ;;  %v461_v1 = vld [vmem:[#allocation2 + $0x30] sm:$0xff]  ;;  %v465_v10 = vld [vmem:[#allocation2 + $0x60] sm:$0xff] }
 0x176   : > { %3742 = vmatprep.mubr.msk.bf16.mxu1 %vm368_vm0, %v4410_v3  ;;  %3803 = vmatmul.mubr.msk.bf16.gmra.mxu0 %vm368_vm0, %v4412_v5  ;;  %v4467_v2 = vpack.c.bf16 %v462_v61, %v461_v1  ;;  %v4483_v31 = vld [vmem:[%s5752_s3 + $0x10] sm:$0x3] }
 0x177   : > { %3806 = vmatprep.mubr.msk.bf16.mxu0 %vm368_vm0, %v4414_v6  ;;  %v362_v7 = vpop.trf.xlu1  ;;  %v532_v15 = vld [vmem:[#allocation2 + $0x139] sm:$0xff] }
 0x178   : > { %451 = vst.msk [vmem:[#allocation2 + $0x151] sm:$0xff] %vm368_vm0, %v362_v7  ;;  %v2257_v7 = vsel %vm604_vm2, %v4347_v17, 0  ;;  %v464_v17 = vld [vmem:[#allocation2 + $0x50] sm:$0xff] }
 0x179   : > { %v4493_v9 = vpack.c.bf16 %v464_v17, %v463_v8 }
 0x17b   : > { %v363_v12 = vpop.trf.xlu1  ;;  %v533_v18 = vld [vmem:[#allocation2 + $0x141] sm:$0xff] }
 0x17c   : > { %452 = vst.msk [vmem:[#allocation2 + $0x159] sm:$0xff] %vm368_vm0, %v363_v12  ;;  %v4424_v19 = vpack.c.bf16 %v533_v18, %v532_v15  ;;  %v1007_v23 = vld [vmem:[#allocation2 + $0x13a] sm:$0xff]  ;;  %v1008_v24 = vld [vmem:[#allocation2 + $0x142] sm:$0xff] }
 0x17d   : > { %v4440_v36 = vpack.c.bf16 %v1008_v24, %v1007_v23  ;;  %v470_v12 = vld [vmem:[#allocation2 + $0x98] sm:$0xff]  ;;  %v471_v24 = vld [vmem:[#allocation2 + $0xa8] sm:$0xff] }
 0x17e   : > { %3743 = vmatmul.mubr.msk.bf16.gmra.mxu1 %vm368_vm0, %v4424_v19  ;;  %3807 = vmatmul.mubr.msk.bf16.gmra.mxu0 %vm368_vm0, %v4426_v20  ;;  %v467_v15 = vld [vmem:[#allocation2 + $0x78] sm:$0xff] }
 0x17f   : > { %3810 = vmatprep.mubr.msk.bf16.mxu0 %vm368_vm0, %v4428_v21  ;;  %v364_v22 = vpop.trf.xlu1  ;;  %v534_v25 = vld [vmem:[#allocation2 + $0x151] sm:$0xff] }
 0x180   : > { %453 = vst.msk [vmem:[#allocation2 + $0x169] sm:$0xff] %vm368_vm0, %v364_v22  ;;  %v469_v22 = vld [vmem:[#allocation2 + $0x90] sm:$0xff] }
 0x181   : > { %v4507_v23 = vpack.c.bf16 %v470_v12, %v469_v22  ;;  %v2189_v22 = vld [vmem:[#allocation2 + $0x1a0] sm:$0xff] }
 0x183   : > { %v365_v29 = vpop.trf.xlu1  ;;  %v535_v32 = vld [vmem:[#allocation2 + $0x159] sm:$0xff] }
 0x184   : > { %v1009_v26 = vld [vmem:[#allocation2 + $0x152] sm:$0xff]  ;;  %v1010_v34 = vld [vmem:[#allocation2 + $0x15a] sm:$0xff]  ;;  %454 = vst.msk [vmem:[#allocation2 + $0x171] sm:$0xff] %vm368_vm0, %v365_v29  ;;  %v4438_v35 = vpack.c.bf16 %v535_v32, %v534_v25 }
 0x185   : > { %v4442_v37 = vpack.c.bf16 %v1010_v34, %v1009_v26  ;;  %v473_v29 = vld [vmem:[#allocation2 + $0xc0] sm:$0xff]  ;;  %v475_v26 = vld [vmem:[#allocation2 + $0xd8] sm:$0xff] }
 0x186   : > { %3746 = vmatprep.mubr.msk.bf16.mxu1 %vm368_vm0, %v4438_v35  ;;  %3811 = vmatmul.mubr.msk.bf16.gmra.mxu0 %vm368_vm0, %v4440_v36 }
 0x187   : > { %3814 = vmatprep.mubr.msk.bf16.mxu0 %vm368_vm0, %v4442_v37  ;;  %v366_v38 = vpop.trf.xlu1  ;;  %v536_v46 = vld [vmem:[#allocation2 + $0x169] sm:$0xff] }
 0x188   : > { %455 = vst.msk [vmem:[#allocation2 + $0x181] sm:$0xff] %vm368_vm0, %v366_v38  ;;  %v477_v38 = vld [vmem:[#allocation2 + $0xf0] sm:$0xff] }
 0x18b   : > { %v537_v47 = vld [vmem:[#allocation2 + $0x171] sm:$0xff]  ;;  %v367_v52 = vpop.trf.xlu1 }
 0x18c   : > { %v1011_v48 = vld [vmem:[#allocation2 + $0x16a] sm:$0xff]  ;;  %v1012_v49 = vld [vmem:[#allocation2 + $0x172] sm:$0xff]  ;;  %v4451_v53 = vpack.c.bf16 %v537_v47, %v536_v46  ;;  %456 = vst.msk [vmem:[#allocation2 + $0x189] sm:$0xff] %vm368_vm0, %v367_v52  ;;  %v481_v47 = vld [vmem:[#allocation2 + $0x120] sm:$0xff] }
 0x18d   : > { %v4453_v58 = vpack.c.bf16 %v1012_v49, %v1011_v48  ;;  %v486_v49 = vld [vmem:[#allocation2 + $0x158] sm:$0xff]  ;;  %v485_v52 = vld [vmem:[#allocation2 + $0x150] sm:$0xff] }
 0x18e   : > { %3747 = vmatmul.mubr.msk.bf16.gmra.mxu1 %vm368_vm0, %v4451_v53  ;;  %v503_v59 = vpack.c.bf16 %v486_v49, %v485_v52  ;;  %v488_v62 = vld [vmem:[#allocation2 + $0x170] sm:$0xff] }
 0x18f   : > { %3815 = vmatmul.mubr.msk.bf16.gmra.mxu0 %vm368_vm0, %v4453_v58  ;;  %3752 = vmatprep.mubr.msk.bf16.mxu1 %vm368_vm0, %v489_v51  ;;  %v483_v51 = vld [vmem:[#allocation2 + $0x138] sm:$0xff] }
 0x190   : > { %3854 = vmatprep.mubr.msk.bf16.mxu0 %vm368_vm0, %v4285_v33  ;;  %v4478_v33 = vld [vmem:[%s5752_s3 + $0xa] sm:$0x3] }
 0x193   : > { %v1600_v61 = vld [vmem:[#allocation2 + $0x189] sm:$0xff] }
 0x196   : > { %3753 = vmatmul.mubr.msk.bf16.vlgmr.msra.gmra.mxu1 %vm368_vm0, %v4463_v63 }
 0x197   : > { %3855 = vmatmul.mubr.msk.bf16.vlgmr.msra.gmra.mxu0 %vm368_vm0, %v4299_v40  ;;  %3819 = vmatpush3.bf16.msra.mxu1 %v1374_v0  ;;  %v466_v40 = vld [vmem:[#allocation2 + $0x68] sm:$0xff] }
 0x198   : > { %3756 = vmatprep.mubr.msk.bf16.mxu1 %vm368_vm0, %v4467_v2  ;;  %3858 = vmatprep.mubr.msk.bf16.mxu0 %vm368_vm0, %v4305_v45  ;;  %v4495_v11 = vpack.c.bf16 %v466_v40, %v465_v10  ;;  %v468_v45 = vld [vmem:[#allocation2 + $0x80] sm:$0xff]  ;;  %v487_v0 = vld [vmem:[#allocation2 + $0x168] sm:$0xff] }
 0x199   : > { %3921 = vmatpush3.bf16.msra.mxu0 %v2257_v7  ;;  %4030 = vmatprep.subr.msk.bf16.mxu1 %vm604_vm2, %v4478_v33  ;;  %v4505_v18 = vpack.c.bf16 %v468_v45, %v467_v15  ;;  %v504_v1 = vpack.c.bf16 %v488_v62, %v487_v0  ;;  %v3523_v7 = vld [vmem:[%s5752_s3 + $0xe] sm:$0x3] }
 0x19a   : > { %4033 = vmatprep.subr.msk.bf16.mxu0 %vm604_vm2, %v4483_v31  ;;  %v2187_v45 = vld [vmem:[#allocation2 + $0x188] sm:$0xff] }
 0x19e   : > { %3757 = vmatmul.mubr.msk.bf16.gmra.mxu1 %vm368_vm0, %v4493_v9 }
 0x19f   : > { %3859 = vmatmul.mubr.msk.bf16.gmra.mxu0 %vm368_vm0, %v4311_v50  ;;  %3760 = vmatprep.mubr.msk.bf16.mxu1 %vm368_vm0, %v4495_v11  ;;  %v472_v50 = vld [vmem:[#allocation2 + $0xb0] sm:$0xff] }
 0x1a0   : > { %3862 = vmatprep.mubr.msk.bf16.mxu0 %vm368_vm0, %v4317_v55  ;;  %v474_v55 = vld [vmem:[#allocation2 + $0xc8] sm:$0xff]  ;;  %v4517_v25 = vpack.c.bf16 %v472_v50, %v471_v24 }
 0x1a1   : > { %v4519_v32 = vpack.c.bf16 %v474_v55, %v473_v29 }
 0x1a6   : > { %3761 = vmatmul.mubr.msk.bf16.gmra.mxu1 %vm368_vm0, %v4505_v18 }
 0x1a7   : > { %3863 = vmatmul.mubr.msk.bf16.gmra.mxu0 %vm368_vm0, %v4323_v60  ;;  %3764 = vmatprep.mubr.msk.bf16.mxu1 %vm368_vm0, %v4507_v23  ;;  %v476_v60 = vld [vmem:[#allocation2 + $0xe0] sm:$0xff] }
 0x1a8   : > { %3866 = vmatprep.mubr.msk.bf16.mxu0 %vm368_vm0, %v4329_v4  ;;  %v478_v4 = vld [vmem:[#allocation2 + $0xf8] sm:$0xff]  ;;  %v498_v34 = vpack.c.bf16 %v476_v60, %v475_v26  ;;  %v2551_v60 = vsel %vm604_vm2, %v3523_v7, 0 }
 0x1a9   : > { %v4529_v39 = vpack.c.bf16 %v478_v4, %v477_v38 }
 0x1ae   : > { %3765 = vmatmul.mubr.msk.bf16.gmra.mxu1 %vm368_vm0, %v4517_v25 }
 0x1af   : > { %3867 = vmatmul.mubr.msk.bf16.gmra.mxu0 %vm368_vm0, %v4336_v13  ;;  %3768 = vmatprep.mubr.msk.bf16.mxu1 %vm368_vm0, %v4519_v32  ;;  %v480_v13 = vld [vmem:[#allocation2 + $0x110] sm:$0xff] }
 0x1b0   : > { %3870 = vmatprep.mubr.msk.bf16.mxu0 %vm368_vm0, %v4359_v27  ;;  %v482_v27 = vld [vmem:[#allocation2 + $0x128] sm:$0xff]  ;;  %v500_v46 = vpack.c.bf16 %v480_v13, %v479_v44 }
 0x1b1   : > { %v501_v48 = vpack.c.bf16 %v482_v27, %v481_v47 }
 0x1b6   : > { %3769 = vmatmul.mubr.msk.bf16.gmra.mxu1 %vm368_vm0, %v498_v34 }
 0x1b7   : > { %3871 = vmatmul.mubr.msk.bf16.gmra.mxu0 %vm368_vm0, %v4382_v41  ;;  %3772 = vmatprep.mubr.msk.bf16.mxu1 %vm368_vm0, %v4529_v39  ;;  %v484_v41 = vld [vmem:[#allocation2 + $0x140] sm:$0xff] }
 0x1b8   : > { %3874 = vmatprep.mubr.msk.bf16.mxu0 %vm368_vm0, %v4396_v54  ;;  %v502_v54 = vpack.c.bf16 %v484_v41, %v483_v51 }
 0x1be   : > { %3773 = vmatmul.mubr.msk.bf16.gmra.mxu1 %vm368_vm0, %v500_v46 }
 0x1bf   : > { %3875 = vmatmul.mubr.msk.bf16.gmra.mxu0 %vm368_vm0, %v4410_v3  ;;  %3776 = vmatprep.mubr.msk.bf16.mxu1 %vm368_vm0, %v501_v48  ;;  %v1599_v3 = vld [vmem:[#allocation2 + $0x181] sm:$0xff] }
 0x1c0   : > { %3878 = vmatprep.mubr.msk.bf16.mxu0 %vm368_vm0, %v4424_v19  ;;  %v4550_v19 = vpack.c.bf16 %v1600_v61, %v1599_v3 }
 0x1c6   : > { %3777 = vmatmul.mubr.msk.bf16.gmra.mxu1 %vm368_vm0, %v502_v54 }
 0x1c7   : > { %3879 = vmatmul.mubr.msk.bf16.gmra.mxu0 %vm368_vm0, %v4438_v35  ;;  %3780 = vmatprep.mubr.msk.bf16.mxu1 %vm368_vm0, %v503_v59  ;;  %v1962_v35 = vsel %vm604_vm2, %v4478_v33, 0 }
 0x1c8   : > { %3882 = vmatprep.mubr.msk.bf16.mxu0 %vm368_vm0, %v4451_v53  ;;  %v2845_v53 = vsel %vm604_vm2, %v4483_v31, 0 }
 0x1ce   : > { %3781 = vmatmul.mubr.msk.bf16.gmra.mxu1 %vm368_vm0, %v504_v1 }
 0x1cf   : > { %3883 = vmatmul.mubr.msk.bf16.gmra.mxu0 %vm368_vm0, %v4550_v19  ;;  %3820 = vmatprep.mubr.msk.bf16.mxu1 %vm368_vm0, %v4463_v63 }
 0x1d0   : > { %3922 = vmatprep.mubr.msk.bf16.mxu0 %vm368_vm0, %v4467_v2 }
 0x1d6   : > { %3821 = vmatmul.mubr.msk.bf16.vlgmr.msra.gmra.mxu1 %vm368_vm0, %v4467_v2 }
 0x1d7   : > { %3923 = vmatmul.mubr.msk.bf16.vlgmr.msra.gmra.mxu0 %vm368_vm0, %v4493_v9  ;;  %3887 = vmatpush3.bf16.msra.mxu1 %v1962_v35  ;;  %v2775_v35 = vld [vmem:[#allocation2 + $0x18a] sm:$0xff] }
 0x1d8   : > { %3824 = vmatprep.mubr.msk.bf16.mxu1 %vm368_vm0, %v4493_v9  ;;  %3926 = vmatprep.mubr.msk.bf16.mxu0 %vm368_vm0, %v4495_v11 }
 0x1d9   : > { %3989 = vmatpush3.bf16.msra.mxu0 %v2845_v53  ;;  %4032 = vmatprep.subr.msk.bf16.mxu1 %vm604_vm2, %v3523_v7 }
 0x1de   : > { %3825 = vmatmul.mubr.msk.bf16.gmra.mxu1 %vm368_vm0, %v4495_v11  ;;  %v4583_v63 = vpop.f32.mrf.mxu0  ;;  %v2186_v11 = vld [vmem:[#allocation2 + $0x180] sm:$0xff] }
 0x1df   : > { %3927 = vmatmul.mubr.msk.bf16.gmra.mxu0 %vm368_vm0, %v4505_v18  ;;  %3828 = vmatprep.mubr.msk.bf16.mxu1 %vm368_vm0, %v4505_v18  ;;  %v2204_v12 = vpack.c.bf16 %v2187_v45, %v2186_v11  ;;  %v2188_v18 = vld [vmem:[#allocation2 + $0x198] sm:$0xff]  ;;  %v2777_v45 = vld [vmem:[#allocation2 + $0x1a2] sm:$0xff] }
 0x1e0   : > { %3930 = vmatprep.mubr.msk.bf16.mxu0 %vm368_vm0, %v4507_v23  ;;  %v4593_v2 = vpop.f32.mrf.mxu0  ;;  %v2205_v50 = vpack.c.bf16 %v2189_v22, %v2188_v18 }
 0x1e2   : > { %v4595_v33 = vpop.f32.mrf.mxu0 }
 0x1e4   : > { %v4603_v31 = vpop.f32.mrf.mxu0 }
 0x1e6   : > { %3829 = vmatmul.mubr.msk.bf16.gmra.mxu1 %vm368_vm0, %v4507_v23 }
 0x1e7   : > { %3931 = vmatmul.mubr.msk.bf16.gmra.mxu0 %vm368_vm0, %v4517_v25  ;;  %3832 = vmatprep.mubr.msk.bf16.mxu1 %vm368_vm0, %v4517_v25 }
 0x1e8   : > { %3934 = vmatprep.mubr.msk.bf16.mxu0 %vm368_vm0, %v4519_v32 }
 0x1ee   : > { %3833 = vmatmul.mubr.msk.bf16.gmra.mxu1 %vm368_vm0, %v4519_v32  ;;  %v4605_v17 = vpop.f32.mrf.mxu0 }
 0x1ef   : > { %3935 = vmatmul.mubr.msk.bf16.gmra.mxu0 %vm368_vm0, %v498_v34  ;;  %3836 = vmatprep.mubr.msk.bf16.mxu1 %vm368_vm0, %v498_v34 }
 0x1f0   : > { %3938 = vmatprep.mubr.msk.bf16.mxu0 %vm368_vm0, %v4529_v39  ;;  %v4607_v40 = vpop.f32.mrf.mxu0 }
 0x1f2   : > { %v4614_v8 = vpop.f32.mrf.mxu0 }
 0x1f4   : > { %v4616_v9 = vpop.f32.mrf.mxu0 }
 0x1f6   : > { %3837 = vmatmul.mubr.msk.bf16.gmra.mxu1 %vm368_vm0, %v4529_v39 }
 0x1f7   : > { %3939 = vmatmul.mubr.msk.bf16.gmra.mxu0 %vm368_vm0, %v500_v46  ;;  %3840 = vmatprep.mubr.msk.bf16.mxu1 %vm368_vm0, %v500_v46 }
 0x1f8   : > { %3942 = vmatprep.mubr.msk.bf16.mxu0 %vm368_vm0, %v501_v48 }
 0x1fe   : > { %3841 = vmatmul.mubr.msk.bf16.gmra.mxu1 %vm368_vm0, %v501_v48  ;;  %v4622_v10 = vpop.f32.mrf.mxu0 }
 0x1ff   : > { %3943 = vmatmul.mubr.msk.bf16.gmra.mxu0 %vm368_vm0, %v502_v54  ;;  %3844 = vmatprep.mubr.msk.bf16.mxu1 %vm368_vm0, %v502_v54 }
 0x200   : > { %3946 = vmatprep.mubr.msk.bf16.mxu0 %vm368_vm0, %v503_v59  ;;  %v4624_v15 = vpop.f32.mrf.mxu0 }
 0x202   : > { %v4630_v23 = vpop.f32.mrf.mxu0 }
 0x204   : > { %v4632_v55 = vpop.f32.mrf.mxu0 }
 0x206   : > { %3845 = vmatmul.mubr.msk.bf16.gmra.mxu1 %vm368_vm0, %v503_v59 }
 0x207   : > { %3947 = vmatmul.mubr.msk.bf16.gmra.mxu0 %vm368_vm0, %v504_v1  ;;  %3848 = vmatprep.mubr.msk.bf16.mxu1 %vm368_vm0, %v504_v1  ;;  %v2774_v1 = vld [vmem:[#allocation2 + $0x182] sm:$0xff] }
 0x208   : > { %3950 = vmatprep.mubr.msk.bf16.mxu0 %vm368_vm0, %v2204_v12  ;;  %v2792_v7 = vpack.c.bf16 %v2775_v35, %v2774_v1  ;;  %v2452_v35 = vld [vmem:[#allocation2 + $0x31] sm:$0xff] }
 0x20e   : > { %v4634_v24 = vpop.f32.mrf.mxu0  ;;  %3849 = vmatmul.mubr.msk.bf16.gmra.mxu1 %vm368_vm0, %v2204_v12 }
 0x20f   : > { %3951 = vmatmul.mubr.msk.bf16.gmra.mxu0 %vm368_vm0, %v2205_v50  ;;  %3888 = vmatprep.mubr.msk.bf16.mxu1 %vm368_vm0, %v4338_v14  ;;  %v2453_v50 = vld [vmem:[#allocation2 + $0x39] sm:$0xff] }
 0x210   : > { %3990 = vmatprep.mubr.msk.bf16.mxu0 %vm368_vm0, %v4342_v16  ;;  %v4642_v25 = vpop.f32.mrf.mxu0 }
 0x212   : > { %v4644_v29 = vpop.f32.mrf.mxu0 }
 0x214   : > { %v4646_v32 = vpop.f32.mrf.mxu0 }
 0x216   : > { %v4649_v4 = vpop.f32.mrf.mxu0  ;;  %3889 = vmatmul.mubr.msk.bf16.vlgmr.msra.gmra.mxu1 %vm368_vm0, %v4342_v16 }
 0x217   : > { %3991 = vmatmul.mubr.msk.bf16.vlgmr.msra.gmra.mxu0 %vm368_vm0, %v4361_v28  ;;  %3955 = vmatpush3.bf16.msra.mxu1 %v2551_v60 }
 0x218   : > { %3892 = vmatprep.mubr.msk.bf16.mxu1 %vm368_vm0, %v4361_v28  ;;  %3994 = vmatprep.mubr.msk.bf16.mxu0 %vm368_vm0, %v4365_v30  ;;  %v4659_v14 = vpop.f32.mrf.mxu0 }
 0x21a   : > { %v4661_v26 = vpop.f32.mrf.mxu0 }
 0x21c   : > { %v4663_v34 = vpop.f32.mrf.mxu0 }
 0x21e   : > { %v4665_v38 = vpop.f32.mrf.mxu0  ;;  %3893 = vmatmul.mubr.msk.bf16.gmra.mxu1 %vm368_vm0, %v4365_v30  ;;  %v4679_v39 = vpop.f32.mrf.mxu1 }
 0x21f   : > { %3995 = vmatmul.mubr.msk.bf16.gmra.mxu0 %vm368_vm0, %v4384_v42  ;;  %3896 = vmatprep.mubr.msk.bf16.mxu1 %vm368_vm0, %v4384_v42  ;;  %5756 = vst [vmem:[#allocation3_spill] sm:$0xff] %v4679_v39  ;;  %v2475_v39 = vld [vmem:[#allocation2 + $0x141] sm:$0xff] }
 0x220   : > { %3998 = vmatprep.mubr.msk.bf16.mxu0 %vm368_vm0, %v4386_v43  ;;  %v4675_v16 = vpop.f32.mrf.mxu0  ;;  %v4693_v30 = vpop.f32.mrf.mxu1 }
 0x221   : > { %5757 = vst [vmem:[#allocation4_spill] sm:$0xff] %v4693_v30 }
 0x222   : > { %v4677_v28 = vpop.f32.mrf.mxu0  ;;  %v4699_v46 = vpop.f32.mrf.mxu1 }
 0x223   : > { %5758 = vst [vmem:[#allocation5_spill] sm:$0xff] %v4699_v46  ;;  %v2471_v46 = vld [vmem:[#allocation2 + $0x111] sm:$0xff] }
 0x224   : > { %v4681_v13 = vpop.f32.mrf.mxu0 }
 0x226   : > { %v4683_v27 = vpop.f32.mrf.mxu0  ;;  %3897 = vmatmul.mubr.msk.bf16.gmra.mxu1 %vm368_vm0, %v4386_v43 }
 0x227   : > { %3999 = vmatmul.mubr.msk.bf16.gmra.mxu0 %vm368_vm0, %v4398_v56  ;;  %3900 = vmatprep.mubr.msk.bf16.mxu1 %vm368_vm0, %v4398_v56  ;;  %v4713_v56 = vpop.f32.mrf.mxu1 }
 0x228   : > { %4002 = vmatprep.mubr.msk.bf16.mxu0 %vm368_vm0, %v4400_v57  ;;  %v4695_v42 = vpop.f32.mrf.mxu0  ;;  %5759 = vst [vmem:[#allocation6_spill] sm:$0xff] %v4713_v56 }
 0x22a   : > { %v4697_v44 = vpop.f32.mrf.mxu0 }
 0x22c   : > { %v4701_v47 = vpop.f32.mrf.mxu0 }
 0x22e   : > { %v4703_v43 = vpop.f32.mrf.mxu0  ;;  %3901 = vmatmul.mubr.msk.bf16.gmra.mxu1 %vm368_vm0, %v4400_v57  ;;  %v4717_v41 = vpop.f32.mrf.mxu1 }
 0x22f   : > { %4003 = vmatmul.mubr.msk.bf16.gmra.mxu0 %vm368_vm0, %v4412_v5  ;;  %3904 = vmatprep.mubr.msk.bf16.mxu1 %vm368_vm0, %v4412_v5  ;;  %5761 = vst [vmem:[#allocation8_spill] sm:$0xff] %v4717_v41  ;;  %v2467_v41 = vld [vmem:[#allocation2 + $0xe1] sm:$0xff] }
 0x230   : > { %4006 = vmatprep.mubr.msk.bf16.mxu0 %vm368_vm0, %v4414_v6  ;;  %v4715_v48 = vpop.f32.mrf.mxu0  ;;  %v4723_v57 = vpop.f32.mrf.mxu1 }
 0x231   : > { %5760 = vst [vmem:[#allocation7_spill] sm:$0xff] %v4715_v48  ;;  %5764 = vst [vmem:[#allocation11_spill] sm:$0xff] %v4723_v57 }
 0x232   : > { %v4719_v49 = vpop.f32.mrf.mxu0  ;;  %v4737_v52 = vpop.f32.mrf.mxu1 }
 0x233   : > { %5762 = vst [vmem:[#allocation9_spill] sm:$0xff] %v4719_v49  ;;  %5767 = vst [vmem:[#allocation14_spill] sm:$0xff] %v4737_v52  ;;  %v2463_v52 = vld [vmem:[#allocation2 + $0xb1] sm:$0xff] }
 0x234   : > { %v4721_v51 = vpop.f32.mrf.mxu0  ;;  %v4743_v61 = vpop.f32.mrf.mxu1 }
 0x235   : > { %5763 = vst [vmem:[#allocation10_spill] sm:$0xff] %v4721_v51  ;;  %5770 = vst [vmem:[#allocation17_spill] sm:$0xff] %v4743_v61 }
 0x236   : > { %v4725_v54 = vpop.f32.mrf.mxu0  ;;  %3905 = vmatmul.mubr.msk.bf16.gmra.mxu1 %vm368_vm0, %v4414_v6 }
 0x237   : > { %5765 = vst [vmem:[#allocation12_spill] sm:$0xff] %v4725_v54  ;;  %4007 = vmatmul.mubr.msk.bf16.gmra.mxu0 %vm368_vm0, %v4426_v20  ;;  %3908 = vmatprep.mubr.msk.bf16.mxu1 %vm368_vm0, %v4426_v20 }
 0x238   : > { %4010 = vmatprep.mubr.msk.bf16.mxu0 %vm368_vm0, %v4428_v21  ;;  %v4735_v5 = vpop.f32.mrf.mxu0 }
 0x239   : > { %5766 = vst [vmem:[#allocation13_spill] sm:$0xff] %v4735_v5 }
 0x23a   : > { %v4739_v59 = vpop.f32.mrf.mxu0 }
 0x23b   : > { %5768 = vst [vmem:[#allocation15_spill] sm:$0xff] %v4739_v59 }
 0x23c   : > { %v4741_v3 = vpop.f32.mrf.mxu0 }
 0x23d   : > { %5769 = vst [vmem:[#allocation16_spill] sm:$0xff] %v4741_v3 }
 0x23e   : > { %v4745_v6 = vpop.f32.mrf.mxu0  ;;  %3909 = vmatmul.mubr.msk.bf16.gmra.mxu1 %vm368_vm0, %v4428_v21  ;;  %v4755_v20 = vpop.f32.mrf.mxu1 }
 0x23f   : > { %5771 = vst [vmem:[#allocation18_spill] sm:$0xff] %v4745_v6  ;;  %4011 = vmatmul.mubr.msk.bf16.gmra.mxu0 %vm368_vm0, %v4440_v36  ;;  %3912 = vmatprep.mubr.msk.bf16.mxu1 %vm368_vm0, %v4440_v36  ;;  %5772 = vst [vmem:[#allocation19_spill] sm:$0xff] %v4755_v20  ;;  %v2776_v36 = vld [vmem:[#allocation2 + $0x19a] sm:$0xff] }
 0x240   : > { %4014 = vmatprep.mubr.msk.bf16.mxu0 %vm368_vm0, %v4442_v37  ;;  %v4757_v62 = vpop.f32.mrf.mxu0  ;;  %v4761_v53 = vpop.f32.mrf.mxu1  ;;  %v2793_v60 = vpack.c.bf16 %v2777_v45, %v2776_v36  ;;  %v2455_v36 = vld [vmem:[#allocation2 + $0x51] sm:$0xff]  ;;  %v2459_v20 = vld [vmem:[#allocation2 + $0x81] sm:$0xff] }
 0x241   : > { %5773 = vst [vmem:[#allocation20_spill] sm:$0xff] %v4757_v62  ;;  %5775 = vst [vmem:[#allocation22_spill] sm:$0xff] %v4761_v53  ;;  %v2456_v53 = vld [vmem:[#allocation2 + $0x61] sm:$0xff] }
 0x242   : > { %v4759_v0 = vpop.f32.mrf.mxu0  ;;  %v4774_v12 = vpop.f32.mrf.mxu1 }
 0x243   : > { %5774 = vst [vmem:[#allocation21_spill] sm:$0xff] %v4759_v0  ;;  %5778 = vst [vmem:[#allocation25_spill] sm:$0xff] %v4774_v12 }
 0x244   : > { %v4763_v21 = vpop.f32.mrf.mxu0  ;;  %v4780_v1 = vpop.f32.mrf.mxu1 }
 0x245   : > { %5776 = vst [vmem:[#allocation23_spill] sm:$0xff] %v4763_v21 }
 0x246   : > { %v4765_v11 = vpop.f32.mrf.mxu0  ;;  %3913 = vmatmul.mubr.msk.bf16.gmra.mxu1 %vm368_vm0, %v4442_v37 }
 0x247   : > { %5777 = vst [vmem:[#allocation24_spill] sm:$0xff] %v4765_v11  ;;  %4015 = vmatmul.mubr.msk.bf16.gmra.mxu0 %vm368_vm0, %v4453_v58  ;;  %3916 = vmatprep.mubr.msk.bf16.mxu1 %vm368_vm0, %v4453_v58  ;;  %v2484_v11 = vpack.c.bf16 %v2453_v50, %v2452_v35  ;;  %v2457_v50 = vld [vmem:[#allocation2 + $0x69] sm:$0xff] }
 0x248   : > { %4018 = vmatprep.mubr.msk.bf16.mxu0 %vm368_vm0, %v2792_v7  ;;  %v4776_v18 = vpop.f32.mrf.mxu0  ;;  %v2454_v35 = vld [vmem:[#allocation2 + $0x49] sm:$0xff] }
 0x249   : > { %5779 = vst [vmem:[#allocation26_spill] sm:$0xff] %v4776_v18 }
 0x24a   : > { %v4778_v22 = vpop.f32.mrf.mxu0 }
 0x24b   : > { %5780 = vst [vmem:[#allocation27_spill] sm:$0xff] %v4778_v22 }
 0x24c   : > { %v4782_v37 = vpop.f32.mrf.mxu0 }
 0x24d   : > { %5781 = vst [vmem:[#allocation28_spill] sm:$0xff] %v4782_v37 }
 0x24e   : > { %v4784_v21 = vpop.f32.mrf.mxu1  ;;  %3917 = vmatmul.mubr.msk.bf16.gmra.mxu1 %vm368_vm0, %v2792_v7  ;;  %v2485_v7 = vpack.c.bf16 %v2455_v36, %v2454_v35  ;;  %v2461_v36 = vld [vmem:[#allocation2 + $0x99] sm:$0xff] }
 0x24f   : > { %v4786_v58 = vpop.f32.mrf.mxu0  ;;  %4019 = vmatmul.mubr.msk.bf16.gmra.mxu0 %vm368_vm0, %v2793_v60  ;;  %3956 = vmatprep.mubr.msk.bf16.mxu1 %vm368_vm0, %v2484_v11  ;;  %v2486_v60 = vpack.c.bf16 %v2457_v50, %v2456_v53  ;;  %v2458_v35 = vld [vmem:[#allocation2 + $0x79] sm:$0xff] }
 0x250   : > { %5782 = vst [vmem:[#allocation29_spill] sm:$0xff] %v4786_v58  ;;  %v4791_v18 = vpop.f32.mrf.mxu1 }
 0x251   : > { %v4793_v22 = vpop.f32.mrf.mxu0 }
 0x252   : > { %5783 = vst [vmem:[#allocation30_spill] sm:$0xff] %v4793_v22  ;;  %v4795_v45 = vpop.f32.mrf.mxu1 }
 0x253   : > { %v4797_v37 = vpop.f32.mrf.mxu0 }
 0x254   : > { %5784 = vst [vmem:[#allocation31_spill] sm:$0xff] %v4797_v37  ;;  %v4799_v12 = vpop.f32.mrf.mxu1 }
 0x255   : > { %v4801_v58 = vpop.f32.mrf.mxu0 }
 0x256   : > { %5785 = vst [vmem:[#allocation32_spill] sm:$0xff] %v4801_v58  ;;  %v4803_v0 = vpop.f32.mrf.mxu1  ;;  %3957 = vmatmul.mubr.msk.bf16.vlgmr.msra.gmra.mxu1 %vm368_vm0, %v2485_v7  ;;  %v2460_v58 = vld [vmem:[#allocation2 + $0x91] sm:$0xff] }
 0x257   : > { %v4805_v11 = vpop.f32.mrf.mxu0  ;;  %3960 = vmatprep.mubr.msk.bf16.mxu1 %vm368_vm0, %v2486_v60  ;;  %v2488_v7 = vpack.c.bf16 %v2461_v36, %v2460_v58 }
 0x258   : > { %5786 = vst [vmem:[#allocation33_spill] sm:$0xff] %v4805_v11  ;;  %v4809_v22 = vpop.f32.mrf.mxu1  ;;  %v2487_v11 = vpack.c.bf16 %v2459_v20, %v2458_v35  ;;  %v2465_v20 = vld [vmem:[#allocation2 + $0xc9] sm:$0xff] }
 0x259   : > { %v4811_v37 = vpop.f32.mrf.mxu0  ;;  %v2462_v35 = vld [vmem:[#allocation2 + $0xa9] sm:$0xff] }
 0x25a   : > { %5787 = vst [vmem:[#allocation34_spill] sm:$0xff] %v4811_v37  ;;  %v4813_v62 = vpop.f32.mrf.mxu1 }
 0x25b   : > { %v4815_v61 = vpop.f32.mrf.mxu0 }
 0x25c   : > { %5788 = vst [vmem:[#allocation35_spill] sm:$0xff] %v4815_v61  ;;  %v4817_v53 = vpop.f32.mrf.mxu1 }
 0x25d   : > { %v4819_v50 = vpop.f32.mrf.mxu0 }
 0x25e   : > { %5789 = vst [vmem:[#allocation36_spill] sm:$0xff] %v4819_v50  ;;  %v4821_v6 = vpop.f32.mrf.mxu1  ;;  %3961 = vmatmul.mubr.msk.bf16.gmra.mxu1 %vm368_vm0, %v2487_v11  ;;  %v2489_v50 = vpack.c.bf16 %v2463_v52, %v2462_v35  ;;  %v2469_v52 = vld [vmem:[#allocation2 + $0xf9] sm:$0xff] }
 0x25f   : > { %v4823_v60 = vpop.f32.mrf.mxu0  ;;  %3964 = vmatprep.mubr.msk.bf16.mxu1 %vm368_vm0, %v2488_v7  ;;  %v2466_v35 = vld [vmem:[#allocation2 + $0xd9] sm:$0xff] }
 0x260   : > { %5790 = vst [vmem:[#allocation37_spill] sm:$0xff] %v4823_v60  ;;  %v4827_v37 = vpop.f32.mrf.mxu1  ;;  %v2464_v60 = vld [vmem:[#allocation2 + $0xc1] sm:$0xff] }
 0x261   : > { %v4829_v61 = vpop.f32.mrf.mxu0  ;;  %v2490_v11 = vpack.c.bf16 %v2465_v20, %v2464_v60 }
 0x262   : > { %5791 = vst [vmem:[#allocation38_spill] sm:$0xff] %v4829_v61  ;;  %v4831_v3 = vpop.f32.mrf.mxu1 }
 0x263   : > { %v4833_v57 = vpop.f32.mrf.mxu0 }
 0x264   : > { %5792 = vst [vmem:[#allocation39_spill] sm:$0xff] %v4833_v57  ;;  %v4835_v58 = vpop.f32.mrf.mxu1 }
 0x265   : > { %v4837_v36 = vpop.f32.mrf.mxu0 }
 0x266   : > { %5793 = vst [vmem:[#allocation40_spill] sm:$0xff] %v4837_v36  ;;  %v4839_v59 = vpop.f32.mrf.mxu1  ;;  %3965 = vmatmul.mubr.msk.bf16.gmra.mxu1 %vm368_vm0, %v2489_v50  ;;  %v2491_v36 = vpack.c.bf16 %v2467_v41, %v2466_v35  ;;  %v2473_v41 = vld [vmem:[#allocation2 + $0x129] sm:$0xff] }
 0x267   : > { %v4841_v7 = vpop.f32.mrf.mxu0  ;;  %3968 = vmatprep.mubr.msk.bf16.mxu1 %vm368_vm0, %v2490_v11  ;;  %v2470_v35 = vld [vmem:[#allocation2 + $0x109] sm:$0xff] }
 0x268   : > { %5794 = vst [vmem:[#allocation41_spill] sm:$0xff] %v4841_v7  ;;  %v4845_v61 = vpop.f32.mrf.mxu1  ;;  %v2468_v7 = vld [vmem:[#allocation2 + $0xf1] sm:$0xff] }
 0x269   : > { %v4847_v57 = vpop.f32.mrf.mxu0  ;;  %v2492_v50 = vpack.c.bf16 %v2469_v52, %v2468_v7 }
 0x26a   : > { %5795 = vst [vmem:[#allocation42_spill] sm:$0xff] %v4847_v57  ;;  %v4849_v5 = vpop.f32.mrf.mxu1 }
 0x26b   : > { %v4851_v56 = vpop.f32.mrf.mxu0 }
 0x26c   : > { %5796 = vst [vmem:[#allocation43_spill] sm:$0xff] %v4851_v56  ;;  %v4853_v60 = vpop.f32.mrf.mxu1 }
 0x26d   : > { %v4855_v20 = vpop.f32.mrf.mxu0 }
 0x26e   : > { %5797 = vst [vmem:[#allocation44_spill] sm:$0xff] %v4855_v20  ;;  %v4857_v54 = vpop.f32.mrf.mxu1  ;;  %3969 = vmatmul.mubr.msk.bf16.gmra.mxu1 %vm368_vm0, %v2491_v36  ;;  %v2493_v20 = vpack.c.bf16 %v2471_v46, %v2470_v35  ;;  %v2477_v46 = vld [vmem:[#allocation2 + $0x159] sm:$0xff] }
 0x26f   : > { %v4859_v11 = vpop.f32.mrf.mxu0  ;;  %3972 = vmatprep.mubr.msk.bf16.mxu1 %vm368_vm0, %v2492_v50  ;;  %v2474_v35 = vld [vmem:[#allocation2 + $0x139] sm:$0xff] }
 0x270   : > { %5798 = vst [vmem:[#allocation45_spill] sm:$0xff] %v4859_v11  ;;  %v4863_v57 = vpop.f32.mrf.mxu1  ;;  %v2472_v11 = vld [vmem:[#allocation2 + $0x121] sm:$0xff] }
 0x271   : > { %v4865_v56 = vpop.f32.mrf.mxu0  ;;  %v2494_v36 = vpack.c.bf16 %v2473_v41, %v2472_v11 }
 0x272   : > { %5799 = vst [vmem:[#allocation46_spill] sm:$0xff] %v4865_v56  ;;  %v4867_v51 = vpop.f32.mrf.mxu1 }
 0x273   : > { %v4869_v30 = vpop.f32.mrf.mxu0 }
 0x274   : > { %5800 = vst [vmem:[#allocation47_spill] sm:$0xff] %v4869_v30  ;;  %v4871_v7 = vpop.f32.mrf.mxu1 }
 0x275   : > { %5801 = vst [vmem:[#allocation48_spill] sm:$0xff] %v4871_v7  ;;  %v4873_v52 = vpop.f32.mrf.mxu0 }
 0x276   : > { %5802 = vst [vmem:[#allocation49_spill] sm:$0xff] %v4873_v52  ;;  %v4875_v49 = vpop.f32.mrf.mxu1  ;;  %3973 = vmatmul.mubr.msk.bf16.gmra.mxu1 %vm368_vm0, %v2493_v20  ;;  %v2495_v52 = vpack.c.bf16 %v2475_v39, %v2474_v35  ;;  %v2478_v39 = vld [vmem:[#allocation2 + $0x169] sm:$0xff] }
 0x277   : > { %5803 = vst [vmem:[#allocation50_spill] sm:$0xff] %v4875_v49  ;;  %v4877_v50 = vpop.f32.mrf.mxu0  ;;  %3976 = vmatprep.mubr.msk.bf16.mxu1 %vm368_vm0, %v2494_v36 }
 0x278   : > { %5804 = vst [vmem:[#allocation51_spill] sm:$0xff] %v4877_v50  ;;  %v4881_v56 = vpop.f32.mrf.mxu1  ;;  %v2476_v50 = vld [vmem:[#allocation2 + $0x151] sm:$0xff] }
 0x279   : > { %5805 = vst [vmem:[#allocation52_spill] sm:$0xff] %v4881_v56  ;;  %v4883_v30 = vpop.f32.mrf.mxu0  ;;  %v2496_v20 = vpack.c.bf16 %v2477_v46, %v2476_v50 }
 0x27a   : > { %5806 = vst [vmem:[#allocation53_spill] sm:$0xff] %v4883_v30  ;;  %v4885_v48 = vpop.f32.mrf.mxu1 }
 0x27b   : > { %5807 = vst [vmem:[#allocation54_spill] sm:$0xff] %v4885_v48  ;;  %v4887_v7 = vpop.f32.mrf.mxu0  ;;  %v2479_v48 = vld [vmem:[#allocation2 + $0x171] sm:$0xff] }
 0x27c   : > { %5808 = vst [vmem:[#allocation55_spill] sm:$0xff] %v4887_v7  ;;  %v4889_v11 = vpop.f32.mrf.mxu1  ;;  %v2497_v46 = vpack.c.bf16 %v2479_v48, %v2478_v39 }
 0x27d   : > { %5809 = vst [vmem:[#allocation56_spill] sm:$0xff] %v4889_v11  ;;  %v4891_v41 = vpop.f32.mrf.mxu0 }
 0x27e   : > { %5810 = vst [vmem:[#allocation57_spill] sm:$0xff] %v4891_v41  ;;  %v4893_v49 = vpop.f32.mrf.mxu1  ;;  %3977 = vmatmul.mubr.msk.bf16.gmra.mxu1 %vm368_vm0, %v2495_v52 }
 0x27f   : > { %v4895_v36 = vpop.f32.mrf.mxu0  ;;  %3980 = vmatprep.mubr.msk.bf16.mxu1 %vm368_vm0, %v2496_v20  ;;  %v2482_v20 = vld [vmem:[#allocation2 + $0x199] sm:$0xff] }
 0x280   : > { %5811 = vst [vmem:[#allocation58_spill] sm:$0xff] %v4895_v36  ;;  %v4899_v30 = vpop.f32.mrf.mxu1 }
 0x281   : > { %v4901_v7 = vpop.f32.mrf.mxu0 }
 0x282   : > { %5812 = vst [vmem:[#allocation59_spill] sm:$0xff] %v4901_v7  ;;  %v4903_v56 = vpop.f32.mrf.mxu1  ;;  %v2483_v7 = vld [vmem:[#allocation2 + $0x1a1] sm:$0xff] }
 0x283   : > { %5813 = vst [vmem:[#allocation60_spill] sm:$0xff] %v4903_v56  ;;  %v4905_v11 = vpop.f32.mrf.mxu0  ;;  %v2499_v48 = vpack.c.bf16 %v2483_v7, %v2482_v20  ;;  %v863_v7 = vadd.f32 %v4803_v0, %v4583_v63 }
 0x284   : > { %5814 = vst [vmem:[#allocation61_spill] sm:$0xff] %v4905_v11  ;;  %v4907_v35 = vpop.f32.mrf.mxu1 }
 0x285   : > { %5815 = vst [vmem:[#allocation62_spill] sm:$0xff] %v4907_v35  ;;  %v4909_v50 = vpop.f32.mrf.mxu0  ;;  %v1245_v0 = vadd.f32 %v4649_v4, %v863_v7 }
 0x286   : > { %5816 = vst [vmem:[#allocation63_spill] sm:$0xff] %v4909_v50  ;;  %v4911_v41 = vpop.f32.mrf.mxu1  ;;  %3981 = vmatmul.mubr.msk.bf16.gmra.mxu1 %vm368_vm0, %v2497_v46 }
 0x287   : > { %5817 = vst [vmem:[#allocation64_spill] sm:$0xff] %v4911_v41  ;;  %v4913_v52 = vpop.f32.mrf.mxu0  ;;  %3984 = vmatprep.mubr.msk.bf16.mxu1 %vm368_vm0, %v4550_v19 }
 0x288   : > { %5818 = vst [vmem:[#allocation65_spill] sm:$0xff] %v4913_v52  ;;  %v4918_v36 = vpop.f32.mrf.mxu1 }
 0x289   : > { %5819 = vst [vmem:[#allocation66_spill] sm:$0xff] %v4918_v36  ;;  %v4920_v11 = vpop.f32.mrf.mxu0 }
 0x28a   : > { %5820 = vst [vmem:[#allocation67_spill] sm:$0xff] %v4920_v11  ;;  %v4922_v56 = vpop.f32.mrf.mxu1 }
 0x28b   : > { %v4924_v35 = vpop.f32.mrf.mxu0 }
 0x28c   : > { %v953_v39 = vpop.f32.mrf.mxu1 }
 0x28d   : > { %v4926_v50 = vpop.f32.mrf.mxu0  ;;  %v4929_v52 = vadd.f32 %v953_v39, %v4780_v1  ;;  %v855_v39 = vadd.f32 %v4809_v22, %v4593_v2  ;;  %v858_v2 = vadd.f32 %v4817_v53, %v4603_v31  ;;  %v871_v31 = vadd.f32 %v4827_v37, %v4607_v40 }
 0x28e   : > { %5821 = vst [vmem:[#allocation68_spill] sm:$0xff] %v4926_v50  ;;  %v3782_v46 = vpop.f32.mrf.mxu1  ;;  %3985 = vmatmul.mubr.msk.bf16.gmra.mxu1 %vm368_vm0, %v2499_v48  ;;  %v874_v40 = vadd.f32 %v4835_v58, %v4616_v9  ;;  %v887_v9 = vadd.f32 %v4845_v61, %v4624_v15  ;;  %v890_v15 = vadd.f32 %v4853_v60, %v4632_v55 }
 0x28f   : > { %v4931_v41 = vpop.f32.mrf.mxu0  ;;  %v4935_v19 = vadd.f32 %v3782_v46, %v4784_v21  ;;  %v903_v55 = vadd.f32 %v4863_v57, %v4642_v25 }
 0x290   : > { %v966_v11 = vpop.f32.mrf.mxu1 }
 0x291   : > { %v4937_v36 = vpop.f32.mrf.mxu0  ;;  %v4942_v20 = vadd.f32 %v966_v11, %v4791_v18 }
 0x292   : > { %5822 = vst [vmem:[#allocation69_spill] sm:$0xff] %v4937_v36  ;;  %v3783_v50 = vpop.f32.mrf.mxu1  ;;  %v866_v36 = vadd.f32 %v4813_v62, %v4595_v33  ;;  %v879_v33 = vadd.f32 %v4821_v6, %v4605_v17  ;;  %v882_v17 = vadd.f32 %v4831_v3, %v4614_v8  ;;  %v895_v8 = vadd.f32 %v4839_v59, %v4622_v10 }
 0x293   : > { %v4944_v1 = vpop.f32.mrf.mxu0  ;;  %v4949_v48 = vadd.f32 %v3783_v50, %v4795_v45  ;;  %v1243_v45 = vadd.f32 %v4659_v14, %v855_v39  ;;  %v1244_v14 = vadd.f32 %v4663_v34, %v858_v2  ;;  %v1247_v34 = vadd.f32 %v4675_v16, %v871_v31 }
 0x294   : > { %v969_v21 = vpop.f32.mrf.mxu1  ;;  %v1246_v4 = vadd.f32 %v4661_v26, %v866_v36  ;;  %v1249_v26 = vadd.f32 %v4665_v38, %v879_v33  ;;  %v1250_v38 = vadd.f32 %v4677_v28, %v882_v17  ;;  %v1248_v16 = vadd.f32 %v4681_v13, %v874_v40 }
 0x295   : > { %v4951_v46 = vpop.f32.mrf.mxu0  ;;  %v4956_v63 = vadd.f32 %v969_v21, %v4799_v12  ;;  %v898_v10 = vadd.f32 %v4849_v5, %v4630_v23  ;;  %v1253_v28 = vadd.f32 %v4683_v27, %v895_v8  ;;  %v1251_v13 = vadd.f32 %v4695_v42, %v887_v9  ;;  %v5828_v8 = vld [vmem:[#allocation48_spill] sm:$0xff] }
 0x296   : > { %5823 = vst [vmem:[#allocation70_spill] sm:$0xff] %v4951_v46  ;;  %v3822_v18 = vpop.f32.mrf.mxu1  ;;  %v911_v23 = vadd.f32 %v4857_v54, %v4634_v24  ;;  %v1252_v42 = vadd.f32 %v4701_v47, %v890_v15  ;;  %v914_v24 = vadd.f32 %v4867_v51, %v4644_v29  ;;  %v906_v25 = vadd.f32 %v5828_v8, %v4646_v32  ;;  %v5834_v15 = vld [vmem:[#allocation4_spill] sm:$0xff] }
 0x297   : > { %v4959_v11 = vpop.f32.mrf.mxu0  ;;  %v4963_v22 = vadd.f32 %v3822_v18, %v1245_v0  ;;  %v1254_v27 = vadd.f32 %v4697_v44, %v898_v10  ;;  %v5832_v10 = vld [vmem:[#allocation9_spill] sm:$0xff]  ;;  %v5840_v8 = vld [vmem:[#allocation12_spill] sm:$0xff] }
 0x298   : > { %v1410_v50 = vpop.f32.mrf.mxu1  ;;  %v1257_v44 = vadd.f32 %v4703_v43, %v911_v23  ;;  %v1258_v43 = vadd.f32 %v5832_v10, %v914_v24  ;;  %v5836_v23 = vld [vmem:[#allocation10_spill] sm:$0xff] }
 0x299   : > { %v4966_v46 = vpop.f32.mrf.mxu0  ;;  %v4970_v62 = vadd.f32 %v1410_v50, %v1243_v45 }
 0x29a   : > { %v3823_v12 = vpop.f32.mrf.mxu1 }
 0x29b   : > { %v4973_v7 = vpop.f32.mrf.mxu0  ;;  %v4977_v53 = vadd.f32 %v3823_v12, %v1246_v4 }
 0x29c   : > { %v1413_v39 = vpop.f32.mrf.mxu1 }
 0x29d   : > { %v4980_v21 = vpop.f32.mrf.mxu0  ;;  %v4984_v6 = vadd.f32 %v1413_v39, %v1244_v14 }
 0x29e   : > { %v3826_v36 = vpop.f32.mrf.mxu1 }
 0x29f   : > { %v4987_v0 = vpop.f32.mrf.mxu0  ;;  %v4991_v37 = vadd.f32 %v3826_v36, %v1249_v26 }
 0x2a0   : > { %v1426_v18 = vpop.f32.mrf.mxu1 }
 0x2a1   : > { %v4994_v2 = vpop.f32.mrf.mxu0  ;;  %v4998_v3 = vadd.f32 %v1426_v18, %v1247_v34 }
 0x2a2   : > { %v3827_v45 = vpop.f32.mrf.mxu1 }
 0x2a3   : > { %v5001_v50 = vpop.f32.mrf.mxu0  ;;  %v5005_v58 = vadd.f32 %v3827_v45, %v1250_v38  ;;  %v5829_v38 = vld [vmem:[#allocation7_spill] sm:$0xff] }
 0x2a4   : > { %v1429_v33 = vpop.f32.mrf.mxu1  ;;  %v1255_v47 = vadd.f32 %v5829_v38, %v903_v55 }
 0x2a5   : > { %v5008_v4 = vpop.f32.mrf.mxu0  ;;  %v5012_v59 = vadd.f32 %v1429_v33, %v1248_v16  ;;  %v5830_v16 = vld [vmem:[#allocation3_spill] sm:$0xff]  ;;  %v5831_v33 = vld [vmem:[#allocation50_spill] sm:$0xff] }
 0x2a6   : > { %v3830_v12 = vpop.f32.mrf.mxu1  ;;  %v927_v29 = vadd.f32 %v5831_v33, %v5830_v16  ;;  %v5843_v16 = vld [vmem:[#allocation56_spill] sm:$0xff] }
 0x2a7   : > { %v5015_v31 = vpop.f32.mrf.mxu0  ;;  %v5019_v61 = vadd.f32 %v3830_v12, %v1253_v28 }
 0x2a8   : > { %5824 = vst [vmem:[#allocation71_spill] sm:$0xff] %v5015_v31  ;;  %v1442_v14 = vpop.f32.mrf.mxu1  ;;  %v1261_v24 = vadd.f32 %v5840_v8, %v927_v29  ;;  %v5849_v8 = vld [vmem:[#allocation11_spill] sm:$0xff] }
 0x2a9   : > { %v5022_v39 = vpop.f32.mrf.mxu0  ;;  %v5026_v5 = vadd.f32 %v1442_v14, %v1251_v13  ;;  %v5835_v13 = vld [vmem:[#allocation52_spill] sm:$0xff] }
 0x2aa   : > { %v3831_v17 = vpop.f32.mrf.mxu1  ;;  %v919_v32 = vadd.f32 %v5835_v13, %v5834_v15  ;;  %v5846_v13 = vld [vmem:[#allocation8_spill] sm:$0xff] }
 0x2ab   : > { %v5029_v26 = vpop.f32.mrf.mxu0  ;;  %v5033_v60 = vadd.f32 %v3831_v17, %v1254_v27  ;;  %v1256_v27 = vadd.f32 %v5836_v23, %v906_v25  ;;  %v943_v23 = vadd.f32 %v4893_v49, %v5846_v13 }
 0x2ac   : > { %5825 = vst [vmem:[#allocation72_spill] sm:$0xff] %v5029_v26  ;;  %v1445_v36 = vpop.f32.mrf.mxu1 }
 0x2ad   : > { %v5036_v40 = vpop.f32.mrf.mxu0  ;;  %v5040_v54 = vadd.f32 %v1445_v36, %v1252_v42  ;;  %v5838_v42 = vld [vmem:[#allocation5_spill] sm:$0xff]  ;;  %v5839_v36 = vld [vmem:[#allocation54_spill] sm:$0xff] }
 0x2ae   : > { %5826 = vst [vmem:[#allocation73_spill] sm:$0xff] %v5036_v40  ;;  %v3834_v34 = vpop.f32.mrf.mxu1  ;;  %v5867_v40 = vld [vmem:[#allocation25_spill] sm:$0xff] }
 0x2af   : > { %v5043_v18 = vpop.f32.mrf.mxu0  ;;  %v5047_v57 = vadd.f32 %v3834_v34, %v1257_v44  ;;  %v930_v44 = vadd.f32 %v5839_v36, %v5838_v42 }
 0x2b0   : > { %5827 = vst [vmem:[#allocation74_spill] sm:$0xff] %v5043_v18  ;;  %v1458_v45 = vpop.f32.mrf.mxu1  ;;  %v5864_v18 = vld [vmem:[#allocation66_spill] sm:$0xff] }
 0x2b1   : > { %v5050_v9 = vpop.f32.mrf.mxu0  ;;  %v5054_v51 = vadd.f32 %v1458_v45, %v1255_v47  ;;  %v5842_v45 = vld [vmem:[#allocation6_spill] sm:$0xff] }
 0x2b2   : > { %v3835_v28 = vpop.f32.mrf.mxu1  ;;  %v922_v33 = vadd.f32 %v5843_v16, %v5842_v45  ;;  %v935_v45 = vadd.f32 %v4899_v30, %v5849_v8 }
 0x2b3   : > { %v5057_v12 = vpop.f32.mrf.mxu0  ;;  %v5061_v14 = vadd.f32 %v3835_v28, %v1258_v43  ;;  %v5844_v43 = vld [vmem:[#allocation13_spill] sm:$0xff] }
 0x2b4   : > { %5833 = vst [vmem:[#allocation48_spill] sm:$0xff] %v5057_v12  ;;  %v1461_v17 = vpop.f32.mrf.mxu1  ;;  %v1259_v25 = vadd.f32 %v5844_v43, %v919_v32  ;;  %v5860_v12 = vld [vmem:[#allocation64_spill] sm:$0xff] }
 0x2b5   : > { %v5064_v55 = vpop.f32.mrf.mxu0  ;;  %v5068_v34 = vadd.f32 %v1461_v17, %v1256_v27  ;;  %v5847_v17 = vld [vmem:[#allocation15_spill] sm:$0xff] }
 0x2b6   : > { %5837 = vst [vmem:[#allocation7_spill] sm:$0xff] %v5064_v55  ;;  %v3838_v38 = vpop.f32.mrf.mxu1  ;;  %v1262_v29 = vadd.f32 %v5847_v17, %v930_v44  ;;  %v5857_v55 = vld [vmem:[#allocation62_spill] sm:$0xff] }
 0x2b7   : > { %v5071_v47 = vpop.f32.mrf.mxu0  ;;  %v5075_v10 = vadd.f32 %v3838_v38, %v1261_v24  ;;  %v5850_v38 = vld [vmem:[#allocation16_spill] sm:$0xff] }
 0x2b8   : > { %5841 = vst [vmem:[#allocation3_spill] sm:$0xff] %v5071_v47  ;;  %v1474_v28 = vpop.f32.mrf.mxu1  ;;  %v1260_v32 = vadd.f32 %v5850_v38, %v922_v33  ;;  %v5853_v47 = vld [vmem:[#allocation60_spill] sm:$0xff] }
 0x2b9   : > { %v5078_v15 = vpop.f32.mrf.mxu0  ;;  %v5082_v27 = vadd.f32 %v1474_v28, %v1259_v25  ;;  %v5854_v28 = vld [vmem:[#allocation18_spill] sm:$0xff] }
 0x2ba   : > { %5845 = vst [vmem:[#allocation50_spill] sm:$0xff] %v5078_v15  ;;  %v3839_v42 = vpop.f32.mrf.mxu1  ;;  %v5852_v15 = vld [vmem:[#allocation14_spill] sm:$0xff]  ;;  %v1265_v44 = vadd.f32 %v5854_v28, %v943_v23 }
 0x2bb   : > { %v5085_v36 = vpop.f32.mrf.mxu0  ;;  %v5089_v24 = vadd.f32 %v3839_v42, %v1262_v29  ;;  %v946_v49 = vadd.f32 %v5853_v47, %v5852_v15  ;;  %v5858_v42 = vld [vmem:[#allocation20_spill] sm:$0xff] }
 0x2bc   : > { %5848 = vst [vmem:[#allocation9_spill] sm:$0xff] %v5085_v36  ;;  %v1477_v16 = vpop.f32.mrf.mxu1  ;;  %v5856_v36 = vld [vmem:[#allocation17_spill] sm:$0xff]  ;;  %v1263_v33 = vadd.f32 %v5858_v42, %v935_v45 }
 0x2bd   : > { %v5092_v43 = vpop.f32.mrf.mxu0  ;;  %v5096_v25 = vadd.f32 %v1477_v16, %v1260_v32  ;;  %v938_v30 = vadd.f32 %v5857_v55, %v5856_v36  ;;  %v5861_v32 = vld [vmem:[#allocation21_spill] sm:$0xff] }
 0x2be   : > { %5851 = vst [vmem:[#allocation4_spill] sm:$0xff] %v5092_v43  ;;  %v3842_v13 = vpop.f32.mrf.mxu1  ;;  %v5859_v43 = vld [vmem:[#allocation19_spill] sm:$0xff]  ;;  %v1266_v23 = vadd.f32 %v5861_v32, %v946_v49 }
 0x2bf   : > { %v5099_v17 = vpop.f32.mrf.mxu0  ;;  %v5103_v29 = vadd.f32 %v3842_v13, %v1265_v44  ;;  %v959_v47 = vadd.f32 %v5860_v12, %v5859_v43  ;;  %v5865_v44 = vld [vmem:[#allocation23_spill] sm:$0xff]  ;;  %v962_v12 = vadd.f32 %v4922_v56, %v5867_v40 }
 0x2c0   : > { %5855 = vst [vmem:[#allocation52_spill] sm:$0xff] %v5099_v17  ;;  %v1490_v8 = vpop.f32.mrf.mxu1  ;;  %v5863_v17 = vld [vmem:[#allocation22_spill] sm:$0xff]  ;;  %v1264_v45 = vadd.f32 %v5865_v44, %v938_v30  ;;  %v5871_v44 = vld [vmem:[#allocation27_spill] sm:$0xff] }
 0x2c1   : > { %v5106_v38 = vpop.f32.mrf.mxu0  ;;  %v5110_v15 = vadd.f32 %v1490_v8, %v1263_v33  ;;  %v951_v55 = vadd.f32 %v5864_v18, %v5863_v17  ;;  %v5868_v33 = vld [vmem:[#allocation24_spill] sm:$0xff]  ;;  %v5870_v18 = vld [vmem:[#allocation26_spill] sm:$0xff] }
 0x2c2   : > { %v3843_v16 = vpop.f32.mrf.mxu1  ;;  %v1269_v49 = vadd.f32 %v5868_v33, %v959_v47  ;;  %v5873_v47 = vld [vmem:[#allocation28_spill] sm:$0xff] }
 0x2c3   : > { %v5113_v28 = vpop.f32.mrf.mxu0  ;;  %v5117_v36 = vadd.f32 %v3843_v16, %v1266_v23  ;;  %v1267_v17 = vadd.f32 %v5870_v18, %v951_v55  ;;  %v5875_v55 = vld [vmem:[#allocation29_spill] sm:$0xff] }
 0x2c4   : > { %5862 = vst [vmem:[#allocation10_spill] sm:$0xff] %v5113_v28  ;;  %v1493_v13 = vpop.f32.mrf.mxu1 }
 0x2c5   : > { %v5120_v42 = vpop.f32.mrf.mxu0  ;;  %v5124_v43 = vadd.f32 %v1493_v13, %v1264_v45  ;;  %v1268_v45 = vadd.f32 %v5873_v47, %v4929_v52  ;;  %v5878_v47 = vld [vmem:[#allocation31_spill] sm:$0xff] }
 0x2c6   : > { %5866 = vst [vmem:[#allocation5_spill] sm:$0xff] %v5120_v42  ;;  %v3846_v8 = vpop.f32.mrf.mxu1  ;;  %v1270_v42 = vadd.f32 %v5871_v44, %v962_v12 }
 0x2c7   : > { %v5127_v32 = vpop.f32.mrf.mxu0  ;;  %v5129_v28 = vadd.f32 %v3846_v8, %v1269_v49  ;;  %v1273_v8 = vadd.f32 %v5875_v55, %v4935_v19  ;;  %v5879_v19 = vld [vmem:[#allocation32_spill] sm:$0xff] }
 0x2c8   : > { %5869 = vst [vmem:[#allocation54_spill] sm:$0xff] %v5127_v32  ;;  %v1506_v23 = vpop.f32.mrf.mxu1  ;;  %v1272_v55 = vadd.f32 %v5879_v19, %v4956_v63  ;;  %v5884_v63 = vld [vmem:[#allocation35_spill] sm:$0xff] }
 0x2c9   : > { %v5132_v16 = vpop.f32.mrf.mxu0  ;;  %v5134_v30 = vadd.f32 %v1506_v23, %v1267_v17  ;;  %v5877_v23 = vld [vmem:[#allocation30_spill] sm:$0xff]  ;;  %v1834_v19 = vadd.f32 %v5884_v63, %v4977_v53 }
 0x2ca   : > { %v3847_v26 = vpop.f32.mrf.mxu1 }
 0x2cb   : > { %v5137_v56 = vpop.f32.mrf.mxu0  ;;  %v5139_v40 = vadd.f32 %v3847_v26, %v1270_v42  ;;  %v1271_v26 = vadd.f32 %v5877_v23, %v4942_v20  ;;  %v5881_v20 = vld [vmem:[#allocation33_spill] sm:$0xff] }
 0x2cc   : > { %5872 = vst [vmem:[#allocation12_spill] sm:$0xff] %v5137_v56  ;;  %v1509_v13 = vpop.f32.mrf.mxu1  ;;  %v1833_v23 = vadd.f32 %v5881_v20, %v4963_v22  ;;  %v5882_v56 = vld [vmem:[#allocation34_spill] sm:$0xff]  ;;  %v5885_v20 = vld [vmem:[#allocation37_spill] sm:$0xff] }
 0x2cd   : > { %v5143_v33 = vpop.f32.mrf.mxu0  ;;  %v5145_v49 = vadd.f32 %v1509_v13, %v1268_v45  ;;  %v1274_v45 = vadd.f32 %v5878_v47, %v4949_v48  ;;  %v1831_v48 = vadd.f32 %v5882_v56, %v4970_v62  ;;  %v5886_v56 = vld [vmem:[#allocation38_spill] sm:$0xff] }
 0x2ce   : > { %5874 = vst [vmem:[#allocation6_spill] sm:$0xff] %v5143_v33  ;;  %v3850_v18 = vpop.f32.mrf.mxu1 }
 0x2cf   : > { %v5149_v17 = vpop.f32.mrf.mxu0  ;;  %v5151_v12 = vadd.f32 %v3850_v18, %v1273_v8 }
 0x2d0   : > { %5876 = vst [vmem:[#allocation56_spill] sm:$0xff] %v5149_v17  ;;  %v1522_v42 = vpop.f32.mrf.mxu1 }
 0x2d1   : > { %v5155_v44 = vadd.f32 %v1522_v42, %v1271_v26  ;;  %v5157_v52 = vpop.f32.mrf.mxu0 }
 0x2d2   : > { %v3851_v13 = vpop.f32.mrf.mxu1 }
 0x2d3   : > { %v5161_v33 = vadd.f32 %v3851_v13, %v1274_v45  ;;  %v5165_v8 = vpop.f32.mrf.mxu0 }
 0x2d4   : > { %v1525_v17 = vpop.f32.mrf.mxu1  ;;  %5880 = vst [vmem:[#allocation13_spill] sm:$0xff] %v5165_v8 }
 0x2d5   : > { %v5167_v18 = vadd.f32 %v1525_v17, %v1272_v55  ;;  %v5175_v45 = vpop.f32.mrf.mxu0 }
 0x2d6   : > { %v3890_v26 = vpop.f32.mrf.mxu1  ;;  %5883 = vst [vmem:[#allocation8_spill] sm:$0xff] %v5175_v45 }
 0x2d7   : > { %v5171_v42 = vadd.f32 %v3890_v26, %v1833_v23  ;;  %v5185_v22 = vpop.f32.mrf.mxu0  ;;  %v1837_v23 = vadd.f32 %v5885_v20, %v4991_v37 }
 0x2d8   : > { %v1998_v47 = vpop.f32.mrf.mxu1 }
 0x2d9   : > { %v5177_v13 = vadd.f32 %v1998_v47, %v1831_v48  ;;  %v1835_v48 = vadd.f32 %v5886_v56, %v4998_v3  ;;  %v5193_v45 = vpop.f32.mrf.mxu0 }
 0x2da   : > { %v3891_v8 = vpop.f32.mrf.mxu1 }
 0x2db   : > { %v5181_v17 = vadd.f32 %v3891_v8, %v1834_v19  ;;  %v5887_v8 = vld [vmem:[#allocation39_spill] sm:$0xff]  ;;  %v5204_v20 = vpop.f32.mrf.mxu0 }
 0x2dc   : > { %v5183_v55 = vpop.f32.mrf.mxu1  ;;  %v1838_v63 = vadd.f32 %v5887_v8, %v5005_v58  ;;  %5889 = vst [vmem:[#allocation11_spill] sm:$0xff] %v5204_v20 }
 0x2dd   : > { %v5212_v8 = vpop.f32.mrf.mxu0 }
 0x2de   : > { %v3894_v26 = vpop.f32.mrf.mxu1 }
 0x2df   : > { %v5189_v62 = vadd.f32 %v3894_v26, %v1837_v23  ;;  %v5890_v23 = vld [vmem:[#allocation41_spill] sm:$0xff] }
 0x2e0   : > { %v2014_v47 = vpop.f32.mrf.mxu1  ;;  %v1841_v3 = vadd.f32 %v5890_v23, %v5019_v61  ;;  %v5223_v23 = vpop.f32.mrf.mxu0 }
 0x2e1   : > { %v2129_v53 = vadd.f32 %v2014_v47, %v1835_v48  ;;  %v5891_v48 = vld [vmem:[#allocation42_spill] sm:$0xff]  ;;  %5894 = vst [vmem:[#allocation14_spill] sm:$0xff] %v5223_v23 }
 0x2e2   : > { %v3895_v19 = vpop.f32.mrf.mxu1  ;;  %v1839_v47 = vadd.f32 %v5891_v48, %v5026_v5 }
 0x2e3   : > { %v5197_v32 = vadd.f32 %v3895_v19, %v1838_v63  ;;  %v5200_v31 = vadd.f32 %v4994_v2, %v2129_v53  ;;  %v5892_v2 = vld [vmem:[#allocation43_spill] sm:$0xff] }
 0x2e4   : > { %v5202_v37 = vpop.f32.mrf.mxu1  ;;  %v1842_v53 = vadd.f32 %v5892_v2, %v5033_v60  ;;  %v5231_v2 = vpop.f32.mrf.mxu0 }
 0x2e5   : > { %5888 = vst [vmem:[#allocation15_spill] sm:$0xff] %v5200_v31  ;;  %5897 = vst [vmem:[#allocation60_spill] sm:$0xff] %v5231_v2 }
 0x2e6   : > { %v3898_v26 = vpop.f32.mrf.mxu1 }
 0x2e7   : > { %v5208_v56 = vadd.f32 %v3898_v26, %v1841_v3  ;;  %v5895_v3 = vld [vmem:[#allocation45_spill] sm:$0xff] }
 0x2e8   : > { %v2030_v58 = vpop.f32.mrf.mxu1  ;;  %v1845_v5 = vadd.f32 %v5895_v3, %v5047_v57  ;;  %v5242_v3 = vpop.f32.mrf.mxu0 }
 0x2e9   : > { %v2133_v63 = vadd.f32 %v2030_v58, %v1839_v47  ;;  %v5896_v47 = vld [vmem:[#allocation46_spill] sm:$0xff]  ;;  %5900 = vst [vmem:[#allocation17_spill] sm:$0xff] %v5242_v3 }
 0x2ea   : > { %v3899_v19 = vpop.f32.mrf.mxu1  ;;  %v1843_v58 = vadd.f32 %v5896_v47, %v5054_v51 }
 0x2eb   : > { %v5216_v31 = vadd.f32 %v3899_v19, %v1842_v53  ;;  %v5219_v20 = vadd.f32 %v5022_v39, %v2133_v63  ;;  %v5898_v39 = vld [vmem:[#allocation47_spill] sm:$0xff] }
 0x2ec   : > { %v5221_v61 = vpop.f32.mrf.mxu1  ;;  %v1846_v63 = vadd.f32 %v5898_v39, %v5061_v14  ;;  %v5903_v14 = vld [vmem:[#allocation55_spill] sm:$0xff] }
 0x2ed   : > { %5893 = vst [vmem:[#allocation16_spill] sm:$0xff] %v5219_v20  ;;  %v1850_v39 = vadd.f32 %v5903_v14, %v5089_v24  ;;  %v5908_v14 = vld [vmem:[#allocation61_spill] sm:$0xff] }
 0x2ee   : > { %v3902_v26 = vpop.f32.mrf.mxu1 }
 0x2ef   : > { %v5227_v48 = vadd.f32 %v3902_v26, %v1845_v5  ;;  %v5901_v5 = vld [vmem:[#allocation51_spill] sm:$0xff] }
 0x2f0   : > { %v2046_v60 = vpop.f32.mrf.mxu1  ;;  %v1849_v51 = vadd.f32 %v5901_v5, %v5075_v10 }
 0x2f1   : > { %v2137_v53 = vadd.f32 %v2046_v60, %v1843_v58  ;;  %v5250_v60 = vpop.f32.mrf.mxu0 }
 0x2f2   : > { %v3903_v19 = vpop.f32.mrf.mxu1  ;;  %5902 = vst [vmem:[#allocation62_spill] sm:$0xff] %v5250_v60 }
 0x2f3   : > { %v5235_v20 = vadd.f32 %v3903_v19, %v1846_v63  ;;  %v5238_v23 = vadd.f32 %v5050_v9, %v2137_v53  ;;  %v5258_v19 = vpop.f32.mrf.mxu0 }
 0x2f4   : > { %v5240_v57 = vpop.f32.mrf.mxu1  ;;  %5905 = vst [vmem:[#allocation19_spill] sm:$0xff] %v5258_v19 }
 0x2f5   : > { %5899 = vst [vmem:[#allocation18_spill] sm:$0xff] %v5238_v23  ;;  %v5906_v23 = vld [vmem:[#allocation58_spill] sm:$0xff]  ;;  %v5266_v2 = vpop.f32.mrf.mxu0 }
 0x2f6   : > { %v3906_v26 = vpop.f32.mrf.mxu1  ;;  %v1853_v10 = vadd.f32 %v5906_v23, %v5103_v29 }
 0x2f7   : > { %v5246_v47 = vadd.f32 %v3906_v26, %v1849_v51  ;;  %v5907_v26 = vld [vmem:[#allocation59_spill] sm:$0xff]  ;;  %v5277_v23 = vpop.f32.mrf.mxu0 }
 0x2f8   : > { %v5248_v58 = vpop.f32.mrf.mxu1  ;;  %v1851_v3 = vadd.f32 %v5907_v26, %v5110_v15 }
 0x2fa   : > { %v3907_v63 = vpop.f32.mrf.mxu1 }
 0x2fb   : > { %v5254_v9 = vadd.f32 %v3907_v63, %v1850_v39  ;;  %v1854_v39 = vadd.f32 %v5908_v14, %v5117_v36  ;;  %v5285_v14 = vpop.f32.mrf.mxu0 }
 0x2fc   : > { %v5256_v53 = vpop.f32.mrf.mxu1 }
 0x2fd   : > { %5904 = vst [vmem:[#allocation20_spill] sm:$0xff] %v5254_v9 }
 0x2fe   : > { %v3910_v5 = vpop.f32.mrf.mxu1 }
 0x2ff   : > { %v5262_v51 = vadd.f32 %v3910_v5, %v1853_v10  ;;  %v5910_v10 = vld [vmem:[#allocation65_spill] sm:$0xff] }
 0x300   : > { %v2078_v60 = vpop.f32.mrf.mxu1  ;;  %v1857_v15 = vadd.f32 %v5910_v10, %v5129_v28  ;;  %v5296_v10 = vpop.f32.mrf.mxu0 }
 0x301   : > { %v2145_v24 = vadd.f32 %v2078_v60, %v1851_v3  ;;  %v5911_v3 = vld [vmem:[#allocation67_spill] sm:$0xff] }
 0x302   : > { %v3911_v63 = vpop.f32.mrf.mxu1  ;;  %v1855_v60 = vadd.f32 %v5911_v3, %v5134_v30  ;;  %v1861_v30 = vadd.f32 %v4931_v41, %v5151_v12  ;;  %v5912_v3 = vld [vmem:[#allocation69_spill] sm:$0xff] }
 0x303   : > { %v5270_v9 = vadd.f32 %v3911_v63, %v1854_v39  ;;  %v5273_v19 = vadd.f32 %v5106_v38, %v2145_v24  ;;  %v1858_v38 = vadd.f32 %v4924_v35, %v5139_v40  ;;  %v5304_v40 = vpop.f32.mrf.mxu0 }
 0x304   : > { %v5275_v29 = vpop.f32.mrf.mxu1 }
 0x305   : > { %5909 = vst [vmem:[#allocation64_spill] sm:$0xff] %v5273_v19  ;;  %v5315_v12 = vpop.f32.mrf.mxu0 }
 0x306   : > { %v3914_v5 = vpop.f32.mrf.mxu1 }
 0x307   : > { %v5281_v26 = vadd.f32 %v3914_v5, %v1857_v15 }
 0x308   : > { %v2094_v36 = vpop.f32.mrf.mxu1 }
 0x309   : > { %v2149_v39 = vadd.f32 %v2094_v36, %v1855_v60  ;;  %v1859_v60 = vadd.f32 %v5912_v3, %v5155_v44  ;;  %v2420_v3 = vadd.f32 %v4966_v46, %v5177_v13 }
 0x30a   : > { %v3915_v24 = vpop.f32.mrf.mxu1 }
 0x30b   : > { %v5289_v63 = vadd.f32 %v3915_v24, %v1858_v38  ;;  %v5292_v19 = vadd.f32 %v5132_v16, %v2149_v39  ;;  %v1862_v16 = vadd.f32 %v4944_v1, %v5161_v33  ;;  %v5915_v1 = vld [vmem:[#allocation40_spill] sm:$0xff] }
 0x30c   : > { %v5294_v28 = vpop.f32.mrf.mxu1  ;;  %v1836_v33 = vadd.f32 %v5915_v1, %v5012_v59 }
 0x30e   : > { %v3918_v15 = vpop.f32.mrf.mxu1 }
 0x30f   : > { %v5300_v5 = vadd.f32 %v3918_v15, %v1861_v30  ;;  %v5914_v30 = vld [vmem:[#allocation36_spill] sm:$0xff] }
 0x310   : > { %v2110_v35 = vpop.f32.mrf.mxu1  ;;  %v1832_v44 = vadd.f32 %v5914_v30, %v4984_v6  ;;  %v2130_v6 = vadd.f32 %v5202_v37, %v1836_v33  ;;  %v5917_v30 = vld [vmem:[#allocation49_spill] sm:$0xff] }
 0x311   : > { %v2153_v36 = vadd.f32 %v2110_v35, %v1859_v60  ;;  %v1844_v46 = vadd.f32 %v5917_v30, %v5068_v34  ;;  %v5925_v30 = vld [vmem:[#allocation73_spill] sm:$0xff] }
 0x312   : > { %v3919_v39 = vpop.f32.mrf.mxu1  ;;  %v2126_v60 = vadd.f32 %v5183_v55, %v1832_v44  ;;  %v2423_v55 = vadd.f32 %v4973_v7, %v5181_v17 }
 0x313   : > { %v5308_v38 = vadd.f32 %v3919_v39, %v1862_v16  ;;  %v5311_v24 = vadd.f32 %v5157_v52, %v2153_v36  ;;  %v2422_v52 = vadd.f32 %v4959_v11, %v5171_v42  ;;  %v5916_v36 = vld [vmem:[#allocation44_spill] sm:$0xff]  ;;  %v5328_v39 = vpop.f32.mrf.mxu0  ;;  %v5918_v11 = vld [vmem:[#allocation53_spill] sm:$0xff]  ;;  %v2138_v37 = vadd.f32 %v5240_v57, %v1844_v46 }
 0x314   : > { %v5313_v41 = vpop.f32.mrf.mxu1  ;;  %v1840_v16 = vadd.f32 %v5916_v36, %v5040_v54  ;;  %v1847_v42 = vadd.f32 %v5918_v11, %v5082_v27  ;;  %v5919_v54 = vld [vmem:[#allocation57_spill] sm:$0xff]  ;;  %v2421_v7 = vadd.f32 %v4980_v21, %v2126_v60  ;;  %v5921_v27 = vld [vmem:[#allocation68_spill] sm:$0xff]  ;;  %v2425_v60 = vadd.f32 %v5008_v4, %v2130_v6 }
 0x315   : > { %5913 = vst [vmem:[#allocation21_spill] sm:$0xff] %v5311_v24  ;;  %v1848_v1 = vadd.f32 %v5919_v54, %v5096_v25  ;;  %v5353_v33 = vadd.f32 %v5921_v27, %v5145_v49  ;;  %v5922_v25 = vld [vmem:[#allocation70_spill] sm:$0xff]  ;;  %v5923_v49 = vld [vmem:[#allocation71_spill] sm:$0xff]  ;;  %v5932_v27 = vld [vmem:[#allocation60_spill] sm:$0xff] }
 0x316   : > { %v3958_v15 = vpop.f32.mrf.mxu1  ;;  %v2134_v44 = vadd.f32 %v5221_v61, %v1840_v16  ;;  %v5349_v61 = vpop.f32.mrf.mxu0  ;;  %v2430_v36 = vadd.f32 %v5923_v49, %v5208_v56  ;;  %v5924_v16 = vld [vmem:[#allocation72_spill] sm:$0xff]  ;;  %v5931_v54 = vld [vmem:[#allocation3_spill] sm:$0xff] }
 0x317   : > { %v2716_v13 = vadd.f32 %v3958_v15, %v2422_v52  ;;  %v5357_v52 = vadd.f32 %v5922_v25, %v5167_v18  ;;  %v5371_v18 = vadd.f32 %v5924_v16, %v5216_v31 }
 0x318   : > { %v2587_v35 = vpop.f32.mrf.mxu1  ;;  %v5374_v46 = vadd.f32 %v5925_v30, %v2134_v44 }
 0x319   : > { %v2714_v24 = vadd.f32 %v2587_v35, %v2420_v3  ;;  %v5920_v3 = vld [vmem:[#allocation63_spill] sm:$0xff]  ;;  %v5364_v57 = vadd.f32 %v5185_v22, %v2716_v13 }
 0x31a   : > { %v3959_v59 = vpop.f32.mrf.mxu1  ;;  %v5342_v35 = vadd.f32 %v5920_v3, %v5124_v43  ;;  %v2426_v43 = vadd.f32 %v4987_v0, %v5189_v62  ;;  %v5926_v0 = vld [vmem:[#allocation74_spill] sm:$0xff]  ;;  %v5928_v62 = vld [vmem:[#allocation11_spill] sm:$0xff]  ;;  %v5401_v3 = vadd.f32 %v5931_v54, %v5246_v47 }
 0x31b   : > { %v5346_v34 = vadd.f32 %v5193_v45, %v2714_v24  ;;  %v2717_v15 = vadd.f32 %v3959_v59, %v2423_v55  ;;  %v2427_v45 = vadd.f32 %v5001_v50, %v5197_v32  ;;  %v5378_v50 = vadd.f32 %v5926_v0, %v5227_v48  ;;  %v5927_v32 = vld [vmem:[#allocation48_spill] sm:$0xff]  ;;  %v5929_v13 = vld [vmem:[#allocation7_spill] sm:$0xff]  ;;  %v5396_v59 = vpop.f32.mrf.mxu0 }
 0x31c   : > { %v2590_v17 = vpop.f32.mrf.mxu1  ;;  %v5382_v22 = vadd.f32 %v5927_v32, %v5235_v20  ;;  %v5393_v55 = vadd.f32 %v5929_v13, %v2138_v37  ;;  %v2141_v48 = vadd.f32 %v5248_v58, %v1847_v42  ;;  %v5930_v20 = vld [vmem:[#allocation15_spill] sm:$0xff] }
 0x31d   : > { %v2715_v21 = vadd.f32 %v2590_v17, %v2421_v7  ;;  %v3189_v4 = vmul.f32 %v5346_v34, %v5346_v34  ;;  %v5387_v56 = vadd.f32 %v5928_v62, %v2717_v15  ;;  %v3191_v15 = vmul.f32 %v5364_v57, %v5364_v57  ;;  %v5421_v30 = vpop.f32.mrf.mxu0  ;;  %v5934_v62 = vld [vmem:[#allocation50_spill] sm:$0xff] }
 0x31e   : > { %v3962_v24 = vpop.f32.mrf.mxu1  ;;  %v2142_v7 = vadd.f32 %v5256_v53, %v1848_v1  ;;  %v3121_v17 = vsel %vm368_vm0, %v5364_v57, 0.0  ;;  %v5933_v1 = vld [vmem:[#allocation14_spill] sm:$0xff] }
 0x31f   : > { %v5390_v31 = vadd.f32 %v5212_v8, %v2715_v21  ;;  %v2720_v44 = vadd.f32 %v3962_v24, %v2426_v43  ;;  %v3118_v8 = vsel %vm368_vm0, %v5346_v34, 0.0  ;;  %v3221_v43 = vsel %vm368_vm0, %v3189_v4, 0.0 }
 0x320   : > { %v2603_v6 = vpop.f32.mrf.mxu1  ;;  %v3192_v21 = vmul.f32 %v5387_v56, %v5387_v56  ;;  %v3224_v13 = vsel %vm368_vm0, %v3191_v15, 0.0  ;;  %v3123_v4 = vsel %vm368_vm0, %v5387_v56, 0.0 }
 0x321   : > { %v2718_v11 = vadd.f32 %v2603_v6, %v5930_v20  ;;  %v3119_v37 = vsel %vm368_vm0, %v5390_v31, 0.0  ;;  %v3190_v58 = vmul.f32 %v5390_v31, %v5390_v31  ;;  %v5424_v32 = vadd.f32 %v5933_v1, %v2720_v44  ;;  %v5937_v44 = vld [vmem:[#allocation4_spill] sm:$0xff] }
 0x322   : > { %v3963_v42 = vpop.f32.mrf.mxu1  ;;  %v3120_v47 = vadd.f32 %v3119_v37, %v3118_v8  ;;  %v5427_v6 = vadd.f32 %v5934_v62, %v2141_v48  ;;  %v5935_v37 = vld [vmem:[#allocation20_spill] sm:$0xff]  ;;  %v3226_v48 = vsel %vm368_vm0, %v3192_v21, 0.0 }
 0x323   : > { %v5415_v25 = vadd.f32 %v5932_v27, %v2718_v11  ;;  %v3222_v24 = vsel %vm368_vm0, %v3190_v58, 0.0  ;;  %v2721_v49 = vadd.f32 %v3963_v42, %v2427_v45  ;;  %v5936_v58 = vld [vmem:[#allocation9_spill] sm:$0xff]  ;;  %v5940_v1 = vld [vmem:[#allocation16_spill] sm:$0xff] }
 0x324   : > { %v2606_v16 = vpop.f32.mrf.mxu1  ;;  %v3122_v0 = vadd.f32 %v3121_v17, %v3120_v47  ;;  %v3223_v53 = vadd.f32 %v3222_v24, %v3221_v43  ;;  %v5436_v42 = vadd.f32 %v5936_v58, %v5935_v37  ;;  %v5439_v17 = vadd.f32 %v5937_v44, %v2142_v7  ;;  %v5938_v47 = vld [vmem:[#allocation17_spill] sm:$0xff]  ;;  %v5939_v43 = vld [vmem:[#allocation62_spill] sm:$0xff] }
 0x325   : > { %v3193_v20 = vmul.f32 %v5415_v25, %v5415_v25  ;;  %v2719_v45 = vadd.f32 %v2606_v16, %v2425_v60  ;;  %v3125_v15 = vsel %vm368_vm0, %v5415_v25, 0.0  ;;  %v5445_v27 = vadd.f32 %v5938_v47, %v2721_v49  ;;  %v5450_v16 = vpop.f32.mrf.mxu0 }
 0x326   : > { %v3966_v11 = vpop.f32.mrf.mxu1  ;;  %v3225_v54 = vadd.f32 %v3224_v13, %v3223_v53  ;;  %v3124_v8 = vadd.f32 %v3123_v4, %v3122_v0  ;;  %v3195_v0 = vmul.f32 %v5424_v32, %v5424_v32  ;;  %v3129_v37 = vsel %vm368_vm0, %v5424_v32, 0.0 }
 0x327   : > { %v5448_v60 = vadd.f32 %v5939_v43, %v2719_v45  ;;  %v3228_v21 = vsel %vm368_vm0, %v3193_v20, 0.0  ;;  %v2724_v4 = vadd.f32 %v3966_v11, %v2430_v36  ;;  %v3196_v20 = vmul.f32 %v5445_v27, %v5445_v27  ;;  %v5473_v47 = vpop.f32.mrf.mxu0 }
 0x328   : > { %v2619_v24 = vpop.f32.mrf.mxu1  ;;  %v3126_v53 = vadd.f32 %v3125_v15, %v3124_v8  ;;  %v3227_v7 = vadd.f32 %v3226_v48, %v3225_v54  ;;  %v5941_v8 = vld [vmem:[#allocation52_spill] sm:$0xff]  ;;  %v3232_v43 = vsel %vm368_vm0, %v3195_v0, 0.0  ;;  %v2146_v0 = vadd.f32 %v5275_v29, %v5342_v35 }
 0x329   : > { %v2722_v62 = vadd.f32 %v2619_v24, %v5940_v1  ;;  %v3127_v13 = vsel %vm368_vm0, %v5448_v60, 0.0  ;;  %v3194_v49 = vmul.f32 %v5448_v60, %v5448_v60  ;;  %v5464_v54 = vadd.f32 %v5941_v8, %v5262_v51  ;;  %v5942_v1 = vld [vmem:[#allocation19_spill] sm:$0xff]  ;;  %v5500_v8 = vpop.f32.mrf.mxu0 }
 0x32a   : > { %v3967_v45 = vpop.f32.mrf.mxu1  ;;  %v3229_v58 = vadd.f32 %v3228_v21, %v3227_v7  ;;  %v3128_v44 = vadd.f32 %v3127_v13, %v3126_v53  ;;  %v3131_v7 = vsel %vm368_vm0, %v5445_v27, 0.0  ;;  %v5480_v21 = vadd.f32 %v5942_v1, %v2724_v4 }
 0x32b   : > { %v3230_v48 = vsel %vm368_vm0, %v3194_v49, 0.0  ;;  %v5470_v15 = vadd.f32 %v5266_v2, %v2722_v62  ;;  %v2725_v36 = vadd.f32 %v3967_v45, %v5371_v18  ;;  %v3234_v45 = vsel %vm368_vm0, %v3196_v20, 0.0 }
 0x32c   : > { %v2622_v11 = vpop.f32.mrf.mxu1  ;;  %v3130_v24 = vadd.f32 %v3129_v37, %v3128_v44  ;;  %v3231_v53 = vadd.f32 %v3230_v48, %v3229_v58  ;;  %v3199_v48 = vmul.f32 %v5480_v21, %v5480_v21  ;;  %v3137_v1 = vsel %vm368_vm0, %v5480_v21, 0.0 }
 0x32d   : > { %v2723_v51 = vadd.f32 %v2622_v11, %v5374_v46  ;;  %v3197_v2 = vmul.f32 %v5470_v15, %v5470_v15  ;;  %v5485_v18 = vadd.f32 %v5277_v23, %v2725_v36  ;;  %v3133_v4 = vsel %vm368_vm0, %v5470_v15, 0.0  ;;  %v5943_v23 = vld [vmem:[#allocation10_spill] sm:$0xff] }
 0x32e   : > { %v3970_v62 = vpop.f32.mrf.mxu1  ;;  %v3233_v13 = vadd.f32 %v3232_v43, %v3231_v53  ;;  %v3132_v49 = vadd.f32 %v3131_v7, %v3130_v24  ;;  %v5498_v44 = vadd.f32 %v5943_v23, %v5270_v9  ;;  %v5944_v9 = vld [vmem:[#allocation18_spill] sm:$0xff] }
 0x32f   : > { %v5490_v46 = vadd.f32 %v5285_v14, %v2723_v51  ;;  %v2728_v37 = vadd.f32 %v3970_v62, %v5378_v50  ;;  %v3236_v50 = vsel %vm368_vm0, %v3197_v2, 0.0  ;;  %v3200_v36 = vmul.f32 %v5485_v18, %v5485_v18 }
 0x330   : > { %v2635_v58 = vpop.f32.mrf.mxu1  ;;  %v3134_v29 = vadd.f32 %v3133_v4, %v3132_v49  ;;  %v3235_v35 = vadd.f32 %v3234_v45, %v3233_v13  ;;  %v5945_v49 = vld [vmem:[#allocation5_spill] sm:$0xff]  ;;  %v5525_v4 = vpop.f32.mrf.mxu0 }
 0x331   : > { %v3135_v14 = vsel %vm368_vm0, %v5490_v46, 0.0  ;;  %v3198_v20 = vmul.f32 %v5490_v46, %v5490_v46  ;;  %v2726_v11 = vadd.f32 %v2635_v58, %v5944_v9  ;;  %v5517_v62 = vadd.f32 %v5296_v10, %v2728_v37 }
 0x332   : > { %v3971_v43 = vpop.f32.mrf.mxu1  ;;  %v3237_v24 = vadd.f32 %v3236_v50, %v3235_v35  ;;  %v3136_v53 = vadd.f32 %v3135_v14, %v3134_v29  ;;  %v5523_v45 = vadd.f32 %v5945_v49, %v2146_v0  ;;  %v3240_v35 = vsel %vm368_vm0, %v3199_v48, 0.0  ;;  %v5946_v0 = vld [vmem:[#allocation54_spill] sm:$0xff] }
 0x333   : > { %v3238_v51 = vsel %vm368_vm0, %v3198_v20, 0.0  ;;  %v2729_v7 = vadd.f32 %v3971_v43, %v5382_v22  ;;  %v5520_v2 = vadd.f32 %v5304_v40, %v2726_v11  ;;  %v3139_v10 = vsel %vm368_vm0, %v5485_v18, 0.0 }
 0x334   : > { %v2638_v13 = vpop.f32.mrf.mxu1  ;;  %v3138_v58 = vadd.f32 %v3137_v1, %v3136_v53  ;;  %v3239_v23 = vadd.f32 %v3238_v51, %v3237_v24  ;;  %v5538_v14 = vadd.f32 %v5946_v0, %v5281_v26  ;;  %v5542_v20 = vadd.f32 %v5294_v28, %v5353_v33  ;;  %v5553_v24 = vpop.f32.mrf.mxu0 }
 0x335   : > { %v5528_v29 = vadd.f32 %v5315_v12, %v2729_v7  ;;  %v2727_v22 = vadd.f32 %v2638_v13, %v5393_v55  ;;  %v3201_v40 = vmul.f32 %v5520_v2, %v5520_v2  ;;  %v3242_v12 = vsel %vm368_vm0, %v3200_v36, 0.0 }
 0x336   : > { %v3974_v37 = vpop.f32.mrf.mxu1  ;;  %v3241_v55 = vadd.f32 %v3240_v35, %v3239_v23  ;;  %v3140_v50 = vadd.f32 %v3139_v10, %v3138_v58  ;;  %v3203_v48 = vmul.f32 %v5517_v62, %v5517_v62  ;;  %v3141_v9 = vsel %vm368_vm0, %v5520_v2, 0.0 }
 0x337   : > { %v5550_v11 = vadd.f32 %v5328_v39, %v2727_v22  ;;  %v2732_v26 = vadd.f32 %v3974_v37, %v5401_v3  ;;  %v3204_v36 = vmul.f32 %v5528_v29, %v5528_v29  ;;  %v3244_v51 = vsel %vm368_vm0, %v3201_v40, 0.0  ;;  %v5947_v40 = vld [vmem:[#allocation12_spill] sm:$0xff]  ;;  %v5577_v37 = vpop.f32.mrf.mxu0 }
 0x338   : > { %v2651_v43 = vpop.f32.mrf.mxu1  ;;  %v3142_v28 = vadd.f32 %v3141_v9, %v3140_v50  ;;  %v3243_v33 = vadd.f32 %v3242_v12, %v3241_v55  ;;  %v3248_v0 = vsel %vm368_vm0, %v3203_v48, 0.0 }
 0x339   : > { %v2730_v53 = vadd.f32 %v2651_v43, %v5427_v6  ;;  %v3143_v7 = vsel %vm368_vm0, %v5550_v11, 0.0  ;;  %v3202_v39 = vmul.f32 %v5550_v11, %v5550_v11  ;;  %v5564_v3 = vadd.f32 %v5349_v61, %v2732_v26 }
 0x33a   : > { %v3975_v1 = vpop.f32.mrf.mxu1  ;;  %v3245_v13 = vadd.f32 %v3244_v51, %v3243_v33  ;;  %v3144_v49 = vadd.f32 %v3143_v7, %v3142_v28  ;;  %v3145_v6 = vsel %vm368_vm0, %v5517_v62, 0.0  ;;  %v5575_v61 = vadd.f32 %v5947_v40, %v5289_v63  ;;  %v5595_v7 = vpop.f32.mrf.mxu0 }
 0x33b   : > { %v3024_v58 = vadd.f32 %v5396_v59, %v2730_v53  ;;  %v2733_v23 = vadd.f32 %v3975_v1, %v5436_v42  ;;  %v3246_v22 = vsel %vm368_vm0, %v3202_v39, 0.0  ;;  %v4050_v35 = vpack.i.bf16 %v5564_v3, %v5364_v57 }
 0x33c   : > { %v2654_v10 = vpop.f32.mrf.mxu1  ;;  %v3147_v59 = vsel %vm368_vm0, %v5528_v29, 0.0  ;;  %v3146_v42 = vadd.f32 %v3145_v6, %v3144_v49  ;;  %v3247_v12 = vadd.f32 %v3246_v22, %v3245_v13  ;;  %v3250_v63 = vsel %vm368_vm0, %v3204_v36, 0.0 }
 0x33d   : > { %v3205_v55 = vmul.f32 %v3024_v58, %v3024_v58  ;;  %v5583_v50 = vadd.f32 %v5421_v30, %v2733_v23  ;;  %v2731_v57 = vadd.f32 %v2654_v10, %v5439_v17  ;;  %v4046_v26 = vpack.i.bf16 %v3024_v58, %v5346_v34 }
 0x33e   : > { %v3978_v9 = vpop.f32.mrf.mxu1  ;;  %v3249_v43 = vadd.f32 %v3248_v0, %v3247_v12  ;;  %v3148_v28 = vadd.f32 %v3147_v59, %v3146_v42  ;;  %v3207_v33 = vmul.f32 %v5564_v3, %v5564_v3  ;;  %v3149_v53 = vsel %vm368_vm0, %v3024_v58, 0.0  ;;  %v4017_v12 = vpop.f32.mrf.mxu0 }
 0x33f   : > { %v2736_v48 = vadd.f32 %v3978_v9, %v5464_v54  ;;  %v4052_v30 = vpack.i.bf16 %v5583_v50, %v5387_v56  ;;  %v3025_v51 = vadd.f32 %v5450_v16, %v2731_v57  ;;  %4047 = vxpose.xlu0.b32.start [1/16] (narrow) %v4046_v26, 8  ;;  %v5948_v54 = vld [vmem:[#allocation64_spill] sm:$0xff]  ;;  %v3252_v13 = vsel %vm368_vm0, %v3205_v55, 0.0  ;;  %v5949_v9 = vld [vmem:[#allocation6_spill] sm:$0xff] }
 0x340   : > { %v2667_v17 = vpop.f32.mrf.mxu1  ;;  %v3150_v34 = vadd.f32 %v3149_v53, %v3148_v28  ;;  %v3251_v36 = vadd.f32 %v3250_v63, %v3249_v43  ;;  %v3153_v16 = vsel %vm368_vm0, %v5564_v3, 0.0  ;;  %v2445_v26 = vadd.f32 %v5949_v9, %v5542_v20 }
 0x341   : > { %v5598_v39 = vadd.f32 %v5473_v47, %v2736_v48  ;;  %v2734_v1 = vadd.f32 %v2667_v17, %v5948_v54  ;;  %v4048_v49 = vpack.i.bf16 %v3025_v51, %v5390_v31  ;;  %v3151_v58 = vsel %vm368_vm0, %v3025_v51, 0.0  ;;  %v2980_v54 = vpop.f32.mrf.mxu0 }
 0x342   : > { %v3206_v23 = vmul.f32 %v3025_v51, %v3025_v51  ;;  %v3979_v6 = vpop.f32.mrf.mxu1  ;;  %v3253_v22 = vadd.f32 %v3252_v13, %v3251_v36  ;;  %v3152_v10 = vadd.f32 %v3151_v58, %v3150_v34  ;;  %v3208_v47 = vmul.f32 %v5583_v50, %v5583_v50  ;;  %v5950_v34 = vld [vmem:[#allocation56_spill] sm:$0xff] }
 0x343   : > { %v4058_v40 = vpack.i.bf16 %v5598_v39, %v5424_v32  ;;  %v5612_v59 = vadd.f32 %v5500_v8, %v2734_v1  ;;  %v2737_v31 = vadd.f32 %v3979_v6, %v5498_v44  ;;  %4049 = vxpose.xlu0.b32.cont [2/16] (narrow) %v4048_v49, 8  ;;  %v3256_v63 = vsel %vm368_vm0, %v3207_v33, 0.0 }
 0x344   : > { %v3254_v0 = vsel %vm368_vm0, %v3206_v23, 0.0  ;;  %v2670_v42 = vpop.f32.mrf.mxu1  ;;  %v3154_v55 = vadd.f32 %v3153_v16, %v3152_v10  ;;  %v3155_v43 = vsel %vm368_vm0, %v5583_v50, 0.0  ;;  %v3258_v20 = vsel %vm368_vm0, %v3208_v47, 0.0  ;;  %v4020_v10 = vpop.f32.mrf.mxu0 }
 0x345   : > { %v3255_v3 = vadd.f32 %v3254_v0, %v3253_v22  ;;  %v2735_v57 = vadd.f32 %v2670_v42, %v5523_v45  ;;  %v4054_v8 = vpack.i.bf16 %v5612_v59, %v5415_v25  ;;  %v3209_v44 = vmul.f32 %v5612_v59, %v5612_v59 }
 0x346   : > { %v3982_v28 = vpop.f32.mrf.mxu1  ;;  %v3156_v53 = vadd.f32 %v3155_v43, %v3154_v55  ;;  %v5626_v51 = vadd.f32 %v5525_v4, %v2737_v31  ;;  %v3157_v33 = vsel %vm368_vm0, %v5612_v59, 0.0  ;;  %v2450_v36 = vadd.f32 %v5950_v34, %v5300_v5 }
 0x347   : > { %v3257_v48 = vadd.f32 %v3256_v63, %v3255_v3  ;;  %v5629_v45 = vadd.f32 %v5553_v24, %v2735_v57  ;;  %v2740_v17 = vadd.f32 %v3982_v28, %v5538_v14  ;;  %4051 = vxpose.xlu0.b32.cont [3/16] (narrow) %v4050_v35, 8  ;;  %v3211_v4 = vmul.f32 %v5598_v39, %v5598_v39 }
 0x348   : > { %v2683_v25 = vpop.f32.mrf.mxu1  ;;  %v3158_v13 = vadd.f32 %v3157_v33, %v3156_v53  ;;  %v4060_v24 = vpack.i.bf16 %v5626_v51, %v5445_v27  ;;  %v3260_v49 = vsel %vm368_vm0, %v3209_v44, 0.0  ;;  %v3161_v47 = vsel %vm368_vm0, %v5598_v39, 0.0  ;;  %v2993_v44 = vpop.f32.mrf.mxu0 }
 0x349   : > { %v3259_v1 = vadd.f32 %v3258_v20, %v3257_v48  ;;  %v4056_v58 = vpack.i.bf16 %v5629_v45, %v5448_v60  ;;  %v3159_v14 = vsel %vm368_vm0, %v5629_v45, 0.0  ;;  %v3210_v5 = vmul.f32 %v5629_v45, %v5629_v45 }
 0x34a   : > { %v3983_v35 = vpop.f32.mrf.mxu1  ;;  %v3160_v6 = vadd.f32 %v3159_v14, %v3158_v13  ;;  %v5649_v16 = vadd.f32 %v5577_v37, %v2740_v17  ;;  %v2738_v22 = vadd.f32 %v2683_v25, %v5292_v19  ;;  %v3212_v60 = vmul.f32 %v5626_v51, %v5626_v51  ;;  %v5952_v25 = vld [vmem:[#allocation21_spill] sm:$0xff] }
 0x34b   : > { %v3261_v23 = vadd.f32 %v3260_v49, %v3259_v1  ;;  %v3262_v0 = vsel %vm368_vm0, %v3210_v5, 0.0  ;;  %v2741_v59 = vadd.f32 %v3983_v35, %v5575_v61  ;;  %4053 = vxpose.xlu0.b32.cont [4/16] (narrow) %v4052_v30, 8  ;;  %v3264_v37 = vsel %vm368_vm0, %v3211_v4, 0.0  ;;  %v4021_v49 = vpop.f32.mrf.mxu0 }
 0x34c   : > { %v2686_v31 = vpop.f32.mrf.mxu1  ;;  %v3162_v42 = vadd.f32 %v3161_v47, %v3160_v6  ;;  %v4066_v55 = vpack.i.bf16 %v5649_v16, %v5480_v21  ;;  %v3163_v3 = vsel %vm368_vm0, %v5626_v51, 0.0  ;;  %v5667_v57 = vadd.f32 %v5595_v7, %v2738_v22 }
 0x34d   : > { %v3263_v19 = vadd.f32 %v3262_v0, %v3261_v23  ;;  %v5669_v9 = vadd.f32 %v4017_v12, %v2741_v59  ;;  %v2739_v61 = vadd.f32 %v2686_v31, %v2445_v26  ;;  %v2154_v56 = vadd.f32 %v5313_v41, %v5357_v52  ;;  %v5951_v52 = vld [vmem:[#allocation13_spill] sm:$0xff] }
 0x34e   : > { %v3986_v63 = vpop.f32.mrf.mxu1  ;;  %v3164_v30 = vadd.f32 %v3163_v3, %v3162_v42  ;;  %v3266_v28 = vsel %vm368_vm0, %v3212_v60, 0.0  ;;  %v4062_v48 = vpack.i.bf16 %v5667_v57, %v5470_v15  ;;  %v3165_v7 = vsel %vm368_vm0, %v5667_v57, 0.0  ;;  %v2996_v42 = vpop.f32.mrf.mxu0 }
 0x34f   : > { %v3265_v50 = vadd.f32 %v3264_v37, %v3263_v19  ;;  %v2744_v43 = vadd.f32 %v3986_v63, %v2450_v36  ;;  %v3213_v12 = vmul.f32 %v5667_v57, %v5667_v57  ;;  %4055 = vxpose.xlu0.b32.cont [5/16] (narrow) %v4054_v8, 8  ;;  %v4068_v41 = vpack.i.bf16 %v5669_v9, %v5485_v18 }
 0x350   : > { %v2699_v26 = vpop.f32.mrf.mxu1  ;;  %v3166_v45 = vadd.f32 %v3165_v7, %v3164_v30  ;;  %v2451_v20 = vadd.f32 %v5951_v52, %v5308_v38  ;;  %v3033_v17 = vadd.f32 %v2980_v54, %v2739_v61  ;;  %v3215_v4 = vmul.f32 %v5649_v16, %v5649_v16  ;;  %v5953_v38 = vld [vmem:[#allocation8_spill] sm:$0xff] }
 0x351   : > { %v3267_v53 = vadd.f32 %v3266_v28, %v3265_v50  ;;  %v3268_v33 = vsel %vm368_vm0, %v3213_v12, 0.0  ;;  %v2742_v34 = vadd.f32 %v2699_v26, %v5952_v25  ;;  %v5688_v8 = vadd.f32 %v4020_v10, %v2744_v43 }
 0x352   : > { %v3987_v36 = vpop.f32.mrf.mxu1  ;;  %v4064_v14 = vpack.i.bf16 %v3033_v17, %v5490_v46  ;;  %v3167_v5 = vsel %vm368_vm0, %v3033_v17, 0.0  ;;  %v3214_v35 = vmul.f32 %v3033_v17, %v3033_v17  ;;  %v2449_v23 = vadd.f32 %v5953_v38, %v2154_v56 }
 0x353   : > { %v3269_v1 = vadd.f32 %v3268_v33, %v3267_v53  ;;  %v2745_v13 = vadd.f32 %v3987_v36, %v2451_v20  ;;  %4057 = vxpose.xlu0.b32.cont [6/16] (narrow) %v4056_v58, 8  ;;  %v3169_v6 = vsel %vm368_vm0, %v5649_v16, 0.0  ;;  %v3216_v22 = vmul.f32 %v5669_v9, %v5669_v9 }
 0x354   : > { %v2702_v54 = vpop.f32.mrf.mxu1  ;;  %v3168_v47 = vadd.f32 %v3167_v5, %v3166_v45  ;;  %v4074_v10 = vpack.i.bf16 %v5688_v8, %v5517_v62  ;;  %v3270_v60 = vsel %vm368_vm0, %v3214_v35, 0.0  ;;  %v3036_v46 = vadd.f32 %v2993_v44, %v2742_v34 }
 0x355   : > { %v2743_v0 = vadd.f32 %v2702_v54, %v2449_v23  ;;  %v3039_v59 = vadd.f32 %v4021_v49, %v2745_v13  ;;  %v3272_v58 = vsel %vm368_vm0, %v3215_v4, 0.0  ;;  %v3271_v31 = vadd.f32 %v3270_v60, %v3269_v1 }
 0x356   : > { %v3170_v37 = vadd.f32 %v3169_v6, %v3168_v47  ;;  %v3171_v19 = vsel %vm368_vm0, %v5669_v9, 0.0  ;;  %v4070_v3 = vpack.i.bf16 %v3036_v46, %v5520_v2  ;;  %v3217_v61 = vmul.f32 %v3036_v46, %v3036_v46 }
 0x357   : > { %v4076_v63 = vpack.i.bf16 %v3039_v59, %v5528_v29  ;;  %4059 = vxpose.xlu0.b32.cont [7/16] (narrow) %v4058_v40, 8  ;;  %v3273_v56 = vadd.f32 %v3272_v58, %v3271_v31  ;;  %v3274_v50 = vsel %vm368_vm0, %v3216_v22, 0.0  ;;  %v3173_v30 = vsel %vm368_vm0, %v3036_v46, 0.0 }
 0x358   : > { %v3172_v62 = vadd.f32 %v3171_v19, %v3170_v37  ;;  %v3037_v43 = vadd.f32 %v2996_v42, %v2743_v0  ;;  %v3219_v44 = vmul.f32 %v5688_v8, %v5688_v8  ;;  %v3276_v2 = vsel %vm368_vm0, %v3217_v61, 0.0 }
 0x359   : > { %v3275_v28 = vadd.f32 %v3274_v50, %v3273_v56  ;;  %v3177_v26 = vsel %vm368_vm0, %v5688_v8, 0.0  ;;  %v3220_v53 = vmul.f32 %v3039_v59, %v3039_v59 }
 0x35a   : > { %v3174_v7 = vadd.f32 %v3173_v30, %v3172_v62  ;;  %v4072_v29 = vpack.i.bf16 %v3037_v43, %v5550_v11  ;;  %v3175_v12 = vsel %vm368_vm0, %v3037_v43, 0.0  ;;  %v3218_v32 = vmul.f32 %v3037_v43, %v3037_v43 }
 0x35b   : > { %4061 = vxpose.xlu0.b32.cont [8/16] (narrow) %v4060_v24, 8  ;;  %v3277_v39 = vadd.f32 %v3276_v2, %v3275_v28  ;;  %v3280_v33 = vsel %vm368_vm0, %v3219_v44, 0.0  ;;  %v3179_v11 = vsel %vm368_vm0, %v3039_v59, 0.0  ;;  %v3282_v24 = vsel %vm368_vm0, %v3220_v53, 0.0 }
 0x35c   : > { %v3176_v40 = vadd.f32 %v3175_v12, %v3174_v7  ;;  %v3278_v45 = vsel %vm368_vm0, %v3218_v32, 0.0 }
 0x35d   : > { %v3279_v20 = vadd.f32 %v3278_v45, %v3277_v39 }
 0x35e   : > { %v3178_v52 = vadd.f32 %v3177_v26, %v3176_v40 }
 0x35f   : > { %4063 = vxpose.xlu0.b32.cont [9/16] (narrow) %v4062_v48, 8  ;;  %v3281_v51 = vadd.f32 %v3280_v33, %v3279_v20 }
 0x360   : > { %v3180_v27 = vadd.f32 %v3179_v11, %v3178_v52 }
 0x361   : > { %v3283_v25 = vadd.f32 %v3282_v24, %v3281_v51 }
 0x362   : > { %v3181_v17 = vrot.slane %v3180_v27, 4 }
 0x363   : > { %4065 = vxpose.xlu0.b32.cont [10/16] (narrow) %v4064_v14, 8  ;;  %v3284_v36 = vrot.slane %v3283_v25, 4 }
 0x364   : > { %v3182_v34 = vadd.f32 %v3181_v17, %v3180_v27 }
 0x365   : > { %v3285_v1 = vadd.f32 %v3284_v36, %v3283_v25 }
 0x366   : > { %v3183_v4 = vrot.slane %v3182_v34, 2 }
 0x367   : > { %4067 = vxpose.xlu0.b32.cont [11/16] (narrow) %v4066_v55, 8  ;;  %v3286_v15 = vrot.slane %v3285_v1, 2 }
 0x368   : > { %v3184_v8 = vadd.f32 %v3183_v4, %v3182_v34 }
 0x369   : > { %v3287_v48 = vadd.f32 %v3286_v15, %v3285_v1 }
 0x36a   : > { %v3185_v57 = vrot.slane %v3184_v8, 1 }
 0x36b   : > { %4069 = vxpose.xlu0.b32.cont [12/16] (narrow) %v4068_v41, 8  ;;  %v3288_v49 = vrot.slane %v3287_v48, 1 }
 0x36c   : > { %v3186_v13 = vadd.f32 %v3185_v57, %v3184_v8 }
 0x36d   : > { %v3289_v21 = vadd.f32 %v3288_v49, %v3287_v48 }
 0x36e   : > { %3188 = vst.msk [vmem:[%s265_s30] sm:$0x1] %vm3187_vm3, %v3186_v13 }
 0x36f   : > { %4071 = vxpose.xlu0.b32.cont [13/16] (narrow) %v4070_v3, 8  ;;  %3290 = vst.msk [vmem:[%s268_s9] sm:$0x1] %vm3187_vm3, %v3289_v21 }
 0x373   : > { %4073 = vxpose.xlu0.b32.cont [14/16] (narrow) %v4072_v29, 8 }
 0x377   : > { %4075 = vxpose.xlu0.b32.cont [15/16] (narrow) %v4074_v10, 8 }
 0x37b   : > { %4077 = vxpose.xlu0.b32.end [16/16] (narrow) %v4076_v63, 8 }
 0x3bb   : > { %v4078_v16 = vpop.trf.xlu0 }
 0x3bc   : > { %v4082_v55 = vunpack.i.h.bf16 %v4078_v16  ;;  %v4079_v14 = vunpack.i.l.bf16 %v4078_v16 }
 0x3be   : > { %v3557_v18 = vpack.c.bf16 %v4082_v55, %v4079_v14 }
 0x3c0   : > { %3558 = vst.sshfl [vmem:[%s262_s12] sm:$0x33 pattern:$0x76325410] %v3557_v18 }
 0x3c1 PF: > { %s17_s21 = sadd.s32 1, %s4089_s21  }
 0x3c2   : > { %p14_p4 = scmp.ge.s32.totalorder %s17_s21, 4  }
 0x3c4   :  { %16 = sbr.rel (!%p14_p4) target bundleno = 1 (0x1), region = 100 }

</bundles_post_ra>
